<compile_context>
chip_gen: v6e
topology: v6e:2x2x1
jax: 0.10.0
libtpu: 0.0.40
codegen_flags: <defaults>
</compile_context>

<pallas_src>
import functools

import jax
import jax.numpy as jnp
from jax import lax
from jax.experimental import pallas as pl
from jax.experimental.pallas import tpu as pltpu

EPS = 1e-5  # PyTorch BatchNorm2d default


# --------------------------------------------------------------------------- #
# In-kernel helpers
# --------------------------------------------------------------------------- #
def _floordiv_by_const(x, q, xmax):
    """Exact floor(x / q) for int32 vectors with 0 <= x <= xmax via multiply+shift."""
    if q == 1:
        return x
    k = (xmax * q).bit_length()          # 2**k > xmax * q  ==> result is exact
    m = -((-(1 << k)) // q)              # ceil(2**k / q)
    assert xmax * m < 2 ** 31, "floordiv magic would overflow int32"
    return (x * m) >> k


def _interior_mask(h, w, sp):
    """(1, SP) f32 mask: 1.0 on real-pixel lanes of the zero-padded (H+2, W+2)
    plane, 0.0 on halo rows/cols and on the lane tail padding."""
    p = lax.broadcasted_iota(jnp.int32, (1, sp), 1)
    row = _floordiv_by_const(p, w + 2, sp - 1)
    col = p - row * (w + 2)
    ok = (row >= 1) & (row <= h) & (col >= 1) & (col <= w)
    return jnp.where(ok, 1.0, 0.0).astype(jnp.float32)


def _batch_group_sum(v, n, cn):
    """v: (C*N, 1) per-row partial sums, rows ordered [channel-major, batch-minor].
    Returns (C*N, 1) where every row holds its channel's total over the N batch
    rows (per-channel sum broadcast back to all rows of that channel)."""
    if n == 1:
        return v
    pos = lax.broadcasted_iota(jnp.int32, v.shape, 0)
    pos = pos - _floordiv_by_const(pos, n, cn - 1) * n      # row index within its channel group
    total = v
    for d in range(1, n):
        fwd = pltpu.roll(v, shift=(cn - d) % cn, axis=0)    # v[(row + d) % cn]
        bwd = pltpu.roll(v, shift=n - d, axis=0)            # v[(row + d - n) % cn]
        total = total + jnp.where(pos + d < n, fwd, bwd)
    return total


def _conv3x3(xin, wcols_ref, *, c, n, row_stride, sp):
    """3x3 SAME conv on the (C*N, SP) slab, fully vectorized over vregs.

    xin must be zero on halo / tail lanes.  wcols_ref: (C, 9, C*N, 1) with
    wcols[d, k, co*N + b, 0] = w[co, (co + d) % C, k // 3, k % 3].  For each
    channel diagonal d the slab is sublane-rotated so row (co, b) carries input
    channel (co + d) % C of the same image; one per-sublane-broadcast
    multiply-add per tap then produces every output channel at once."""
    cn = c * n
    acc = jnp.zeros((cn, sp), jnp.float32)
    for d in range(c):
        xd = xin if d == 0 else pltpu.roll(xin, shift=(cn - d * n) % cn, axis=0)
        for dh in range(3):
            for dw in range(3):
                off = (dh - 1) * row_stride + (dw - 1)
                tap = xd if off == 0 else pltpu.roll(xd, shift=(-off) % sp, axis=1)
                acc = acc + wcols_ref[d, dh * 3 + dw] * tap
    return acc


def _bn_train(y, gamma_col, beta_col, mask, *, n, cn, inv_count):
    """Training-mode BatchNorm over (batch, interior spatial) per channel.
    Two-pass (mean, then centered second moment) for numerical robustness.
    gamma_col/beta_col are (C*N, 1) per-row columns; mask is (1, SP)."""
    s1 = _batch_group_sum(jnp.sum(y * mask, axis=1, keepdims=True), n, cn)
    mean = s1 * inv_count                                    # equal within a channel
    d = (y - mean) * mask
    s2 = _batch_group_sum(jnp.sum(d * d, axis=1, keepdims=True), n, cn)
    var = s2 * inv_count                                     # biased variance (PyTorch training fwd)
    scale = gamma_col * lax.rsqrt(var + EPS)                 # EUP rsqrt
    return (y - mean) * scale + beta_col


def _resblock_kernel(x_ref, w1_ref, w2_ref, g1_ref, b1_ref, g2_ref, b2_ref,
                     out_ref, *, c, n, h, w, sp, inv_count):
    cn = c * n
    x = x_ref[...]                           # (C*N, SP); zero on halo / tail lanes
    mask = _interior_mask(h, w, sp)          # generated in-kernel: no mask DMA / VMEM input

    # conv1 -> BN1 -> ReLU
    y1 = _conv3x3(x, w1_ref, c=c, n=n, row_stride=w + 2, sp=sp)
    y1 = _bn_train(y1, g1_ref[...], b1_ref[...], mask, n=n, cn=cn, inv_count=inv_count)
    # NOTE: the `* mask` below is load-bearing for conv2 correctness: BN1 maps the
    # zero halo lanes to (beta - mean*scale), ReLU keeps the positive ones, and
    # conv2's rolls would otherwise pull that garbage into interior taps.
    r = jnp.maximum(y1, 0.0) * mask

    # conv2 -> BN2
    y2 = _conv3x3(r, w2_ref, c=c, n=n, row_stride=w + 2, sp=sp)
    y2 = _bn_train(y2, g2_ref[...], b2_ref[...], mask, n=n, cn=cn, inv_count=inv_count)

    # residual add (x already holds the original values on interior lanes)
    out_ref[...] = x + y2


# --------------------------------------------------------------------------- #
# Wrapper-side parameter staging
# --------------------------------------------------------------------------- #
def _make_weight_columns(w, c, n):
    """(C, C, 3, 3) OIHW -> (C, 9, C*N, 1) per-sublane broadcast weight columns:
    wcols[d, k, co*N + b, 0] = w[co, (co + d) % C, k // 3, k % 3]."""
    wk = w.astype(jnp.float32).reshape(c, c, 9)
    co = jnp.arange(c)
    diags = [jnp.repeat(wk[co, (co + d) % c, :], n, axis=0) for d in range(c)]   # each (C*N, 9)
    return jnp.transpose(jnp.stack(diags, axis=0), (0, 2, 1))[..., None]


def _per_row_column(v, n):
    """(C,) BN affine parameter -> (C*N, 1) column in [channel-major, batch-minor] row order."""
    return jnp.repeat(v.astype(jnp.float32), n).reshape(-1, 1)


@jax.jit
def resblock_forward(x_nchw, w1, w2, g1, b1, g2, b2):
    """x_nchw: (N, C, H, W); w1/w2: (C, C, 3, 3) OIHW; g*/b*: (C,).  Training-mode BN."""
    N, C, H, W = x_nchw.shape
    sp_img = (H + 2) * (W + 2)
    SP = ((sp_img + 127) // 128) * 128        # lane-dense padded plane length
    CN = C * N
    assert SP <= 32768                        # keeps the in-kernel multiply+shift floordiv exact

    # NCHW -> (C*N, SP): row c*N + n holds image n's zero-padded channel-c plane.
    xp = jnp.pad(x_nchw.astype(jnp.float32), ((0, 0), (0, 0), (1, 1), (1, 1)))
    x2d = jnp.transpose(xp, (1, 0, 2, 3)).reshape(CN, sp_img)
    x2d = jnp.pad(x2d, ((0, 0), (0, SP - sp_img)))

    w1cols = _make_weight_columns(w1, C, N)
    w2cols = _make_weight_columns(w2, C, N)
    g1c, b1c = _per_row_column(g1, N), _per_row_column(b1, N)
    g2c, b2c = _per_row_column(g2, N), _per_row_column(b2, N)

    kernel = functools.partial(_resblock_kernel, c=C, n=N, h=H, w=W, sp=SP,
                               inv_count=1.0 / float(N * H * W))
    vmem = pl.BlockSpec(memory_space=pltpu.MemorySpace.VMEM)

    # TODO(synk): for large N*H*W, tile over a grid (halo-exchange conv; BN sum /
    # sumsq accumulated in VMEM scratch with pl.when init/finalize on a trailing
    # 'arbitrary' axis) with a leading 'parallel' axis so v7x's two TensorCores
    # both get work, and budget tiles for v7x's 64 MiB VMEM.  For C >= 64 replace
    # the roll+VPU conv with 9 MXU matmuls.  If this runs per-layer, keep the
    # activations in slab layout across ResBlocks (the NCHW<->slab relayout around
    # the call dominates at these tiny shapes) and consider bf16 slabs with f32
    # accumulation on v6e/v7x (not v5e).
    out2d = pl.pallas_call(
        kernel,
        out_shape=jax.ShapeDtypeStruct((CN, SP), jnp.float32),
        in_specs=[vmem] * 7,
        out_specs=vmem,
        compiler_params=pltpu.CompilerParams(vmem_limit_bytes=32 * 1024 * 1024),
    )(x2d, w1cols, w2cols, g1c, b1c, g2c, b2c)

    # back to NCHW (pure layout plumbing, outside the kernel)
    out = out2d[:, :sp_img].reshape(C, N, H + 2, W + 2)[:, :, 1:H + 1, 1:W + 1]
    return jnp.transpose(out, (1, 0, 2, 3))


# --------------------------------------------------------------------------- #
# Pure-JAX reference (mirrors the PyTorch module in training mode)
# --------------------------------------------------------------------------- #
def _reference_forward(x, w1, w2, g1, b1, g2, b2):
    def conv(y, w):
        return lax.conv_general_dilated(
            y, w, window_strides=(1, 1), padding="SAME",
            dimension_numbers=("NCHW", "OIHW", "NCHW"),
            precision=lax.Precision.HIGHEST)

    def bn(y, g, b):
        mu = jnp.mean(y, axis=(0, 2, 3), keepdims=True)
        var = jnp.mean((y - mu) ** 2, axis=(0, 2, 3), keepdims=True)
        return (y - mu) * lax.rsqrt(var + EPS) * g.reshape(1, -1, 1, 1) + b.reshape(1, -1, 1, 1)

    h = jax.nn.relu(bn(conv(x, w1), g1, b1))
    return x + bn(conv(h, w2), g2, b2)


if __name__ == "__main__":
    N, C, H, W = 2, 4, 16, 16
    key = jax.random.PRNGKey(0)
    kx, kw1, kw2, kg1, kb1, kg2, kb2 = jax.random.split(key, 7)

    x = jax.random.normal(kx, (N, C, H, W), jnp.float32)
    w1 = 0.1 * jax.random.normal(kw1, (C, C, 3, 3), jnp.float32)   # Conv2d(C, C, 3, 1, 1, bias=False)
    w2 = 0.1 * jax.random.normal(kw2, (C, C, 3, 3), jnp.float32)
    g1 = 1.0 + 0.1 * jax.random.normal(kg1, (C,), jnp.float32)      # BatchNorm2d affine params
    b1 = 0.1 * jax.random.normal(kb1, (C,), jnp.float32)
    g2 = 1.0 + 0.1 * jax.random.normal(kg2, (C,), jnp.float32)
    b2 = 0.1 * jax.random.normal(kb2, (C,), jnp.float32)

    out = jax.block_until_ready(resblock_forward(x, w1, w2, g1, b1, g2, b2))

    ref = _reference_forward(x, w1, w2, g1, b1, g2, b2)
    assert out.shape == (N, C, H, W)
    err = float(jnp.max(jnp.abs(out - ref)))
    assert err < 1e-3, f"max abs err {err}"
    print("KERNEL_OK")
</pallas_src>

<mosaic_0001>
module attributes {stable_mosaic.version = 11 : i64} {
  func.func @_resblock_kernel(%arg0: memref<8x384xf32, #tpu.memory_space<vmem>>, %arg1: memref<4x9x8x1xf32, #tpu.memory_space<vmem>>, %arg2: memref<4x9x8x1xf32, #tpu.memory_space<vmem>>, %arg3: memref<8x1xf32, #tpu.memory_space<vmem>>, %arg4: memref<8x1xf32, #tpu.memory_space<vmem>>, %arg5: memref<8x1xf32, #tpu.memory_space<vmem>>, %arg6: memref<8x1xf32, #tpu.memory_space<vmem>>, %arg7: memref<8x384xf32, #tpu.memory_space<vmem>>) attributes {dimension_semantics = [], scalar_prefetch = 0 : i64, scratch_operands = 0 : i64, tpu.core_type = #tpu.core_type<tc>} {
    %c0 = arith.constant 0 : index
    %c0_0 = arith.constant 0 : index
    %0 = vector.load %arg0[%c0, %c0_0] : memref<8x384xf32, #tpu.memory_space<vmem>>, vector<8x384xf32>
    %1 = tpu.iota {dimensions = array<i32: 1>} : vector<1x384xi32>
    %c456_i32 = arith.constant 456 : i32
    %2 = vector.broadcast %c456_i32 : i32 to vector<1x384xi32>
    %3 = arith.muli %1, %2 : vector<1x384xi32>
    %c13_i32 = arith.constant 13 : i32
    %4 = vector.broadcast %c13_i32 : i32 to vector<1x384xi32>
    %5 = arith.shrsi %3, %4 : vector<1x384xi32>
    %c18_i32 = arith.constant 18 : i32
    %6 = vector.broadcast %c18_i32 : i32 to vector<1x384xi32>
    %7 = arith.muli %5, %6 : vector<1x384xi32>
    %8 = arith.subi %1, %7 : vector<1x384xi32>
    %c1_i32 = arith.constant 1 : i32
    %9 = vector.broadcast %c1_i32 : i32 to vector<1x384xi32>
    %10 = arith.cmpi sge, %5, %9 : vector<1x384xi32>
    %c16_i32 = arith.constant 16 : i32
    %11 = vector.broadcast %c16_i32 : i32 to vector<1x384xi32>
    %12 = arith.cmpi sle, %5, %11 : vector<1x384xi32>
    %13 = arith.andi %10, %12 : vector<1x384xi1>
    %c1_i32_1 = arith.constant 1 : i32
    %14 = vector.broadcast %c1_i32_1 : i32 to vector<1x384xi32>
    %15 = arith.cmpi sge, %8, %14 : vector<1x384xi32>
    %16 = arith.andi %13, %15 : vector<1x384xi1>
    %c16_i32_2 = arith.constant 16 : i32
    %17 = vector.broadcast %c16_i32_2 : i32 to vector<1x384xi32>
    %18 = arith.cmpi sle, %8, %17 : vector<1x384xi32>
    %19 = arith.andi %16, %18 : vector<1x384xi1>
    %cst = arith.constant 1.000000e+00 : f32
    %cst_3 = arith.constant 0.000000e+00 : f32
    %20 = vector.broadcast %cst : f32 to vector<1x384xf32>
    %21 = vector.broadcast %cst_3 : f32 to vector<1x384xf32>
    %22 = arith.select %19, %20, %21 : vector<1x384xi1>, vector<1x384xf32>
    %cst_4 = arith.constant 0.000000e+00 : f32
    %23 = vector.broadcast %cst_4 : f32 to vector<8x384xf32>
    %c19_i32 = arith.constant 19 : i32
    %24 = tpu.dynamic_rotate %0 by %c19_i32 dim 1 : vector<8x384xf32>, i32 -> vector<8x384xf32>
    %c0_5 = arith.constant 0 : index
    %c0_6 = arith.constant 0 : index
    %c0_7 = arith.constant 0 : index
    %c0_8 = arith.constant 0 : index
    %25 = vector.load %arg1[%c0_5, %c0_6, %c0_7, %c0_8] : memref<4x9x8x1xf32, #tpu.memory_space<vmem>>, vector<1x1x8x1xf32>
    %26 = vector.shape_cast %25 : vector<1x1x8x1xf32> to vector<8x1xf32>
    %27 = vector.broadcast %26 : vector<8x1xf32> to vector<8x384xf32>
    %28 = arith.mulf %27, %24 : vector<8x384xf32>
    %29 = arith.addf %23, %28 : vector<8x384xf32>
    %c18_i32_9 = arith.constant 18 : i32
    %30 = tpu.dynamic_rotate %0 by %c18_i32_9 dim 1 : vector<8x384xf32>, i32 -> vector<8x384xf32>
    %c0_10 = arith.constant 0 : index
    %c1 = arith.constant 1 : index
    %c0_11 = arith.constant 0 : index
    %c0_12 = arith.constant 0 : index
    %31 = vector.load %arg1[%c0_10, %c1, %c0_11, %c0_12] : memref<4x9x8x1xf32, #tpu.memory_space<vmem>>, vector<1x1x8x1xf32>
    %32 = vector.shape_cast %31 : vector<1x1x8x1xf32> to vector<8x1xf32>
    %33 = vector.broadcast %32 : vector<8x1xf32> to vector<8x384xf32>
    %34 = arith.mulf %33, %30 : vector<8x384xf32>
    %35 = arith.addf %29, %34 : vector<8x384xf32>
    %c17_i32 = arith.constant 17 : i32
    %36 = tpu.dynamic_rotate %0 by %c17_i32 dim 1 : vector<8x384xf32>, i32 -> vector<8x384xf32>
    %c0_13 = arith.constant 0 : index
    %c2 = arith.constant 2 : index
    %c0_14 = arith.constant 0 : index
    %c0_15 = arith.constant 0 : index
    %37 = vector.load %arg1[%c0_13, %c2, %c0_14, %c0_15] : memref<4x9x8x1xf32, #tpu.memory_space<vmem>>, vector<1x1x8x1xf32>
    %38 = vector.shape_cast %37 : vector<1x1x8x1xf32> to vector<8x1xf32>
    %39 = vector.broadcast %38 : vector<8x1xf32> to vector<8x384xf32>
    %40 = arith.mulf %39, %36 : vector<8x384xf32>
    %41 = arith.addf %35, %40 : vector<8x384xf32>
    %c1_i32_16 = arith.constant 1 : i32
    %42 = tpu.dynamic_rotate %0 by %c1_i32_16 dim 1 : vector<8x384xf32>, i32 -> vector<8x384xf32>
    %c0_17 = arith.constant 0 : index
    %c3 = arith.constant 3 : index
    %c0_18 = arith.constant 0 : index
    %c0_19 = arith.constant 0 : index
    %43 = vector.load %arg1[%c0_17, %c3, %c0_18, %c0_19] : memref<4x9x8x1xf32, #tpu.memory_space<vmem>>, vector<1x1x8x1xf32>
    %44 = vector.shape_cast %43 : vector<1x1x8x1xf32> to vector<8x1xf32>
    %45 = vector.broadcast %44 : vector<8x1xf32> to vector<8x384xf32>
    %46 = arith.mulf %45, %42 : vector<8x384xf32>
    %47 = arith.addf %41, %46 : vector<8x384xf32>
    %c0_20 = arith.constant 0 : index
    %c4 = arith.constant 4 : index
    %c0_21 = arith.constant 0 : index
    %c0_22 = arith.constant 0 : index
    %48 = vector.load %arg1[%c0_20, %c4, %c0_21, %c0_22] : memref<4x9x8x1xf32, #tpu.memory_space<vmem>>, vector<1x1x8x1xf32>
    %49 = vector.shape_cast %48 : vector<1x1x8x1xf32> to vector<8x1xf32>
    %50 = vector.broadcast %49 : vector<8x1xf32> to vector<8x384xf32>
    %51 = arith.mulf %50, %0 : vector<8x384xf32>
    %52 = arith.addf %47, %51 : vector<8x384xf32>
    %c383_i32 = arith.constant 383 : i32
    %53 = tpu.dynamic_rotate %0 by %c383_i32 dim 1 : vector<8x384xf32>, i32 -> vector<8x384xf32>
    %c0_23 = arith.constant 0 : index
    %c5 = arith.constant 5 : index
    %c0_24 = arith.constant 0 : index
    %c0_25 = arith.constant 0 : index
    %54 = vector.load %arg1[%c0_23, %c5, %c0_24, %c0_25] : memref<4x9x8x1xf32, #tpu.memory_space<vmem>>, vector<1x1x8x1xf32>
    %55 = vector.shape_cast %54 : vector<1x1x8x1xf32> to vector<8x1xf32>
    %56 = vector.broadcast %55 : vector<8x1xf32> to vector<8x384xf32>
    %57 = arith.mulf %56, %53 : vector<8x384xf32>
    %58 = arith.addf %52, %57 : vector<8x384xf32>
    %c367_i32 = arith.constant 367 : i32
    %59 = tpu.dynamic_rotate %0 by %c367_i32 dim 1 : vector<8x384xf32>, i32 -> vector<8x384xf32>
    %c0_26 = arith.constant 0 : index
    %c6 = arith.constant 6 : index
    %c0_27 = arith.constant 0 : index
    %c0_28 = arith.constant 0 : index
    %60 = vector.load %arg1[%c0_26, %c6, %c0_27, %c0_28] : memref<4x9x8x1xf32, #tpu.memory_space<vmem>>, vector<1x1x8x1xf32>
    %61 = vector.shape_cast %60 : vector<1x1x8x1xf32> to vector<8x1xf32>
    %62 = vector.broadcast %61 : vector<8x1xf32> to vector<8x384xf32>
    %63 = arith.mulf %62, %59 : vector<8x384xf32>
    %64 = arith.addf %58, %63 : vector<8x384xf32>
    %c366_i32 = arith.constant 366 : i32
    %65 = tpu.dynamic_rotate %0 by %c366_i32 dim 1 : vector<8x384xf32>, i32 -> vector<8x384xf32>
    %c0_29 = arith.constant 0 : index
    %c7 = arith.constant 7 : index
    %c0_30 = arith.constant 0 : index
    %c0_31 = arith.constant 0 : index
    %66 = vector.load %arg1[%c0_29, %c7, %c0_30, %c0_31] : memref<4x9x8x1xf32, #tpu.memory_space<vmem>>, vector<1x1x8x1xf32>
    %67 = vector.shape_cast %66 : vector<1x1x8x1xf32> to vector<8x1xf32>
    %68 = vector.broadcast %67 : vector<8x1xf32> to vector<8x384xf32>
    %69 = arith.mulf %68, %65 : vector<8x384xf32>
    %70 = arith.addf %64, %69 : vector<8x384xf32>
    %c365_i32 = arith.constant 365 : i32
    %71 = tpu.dynamic_rotate %0 by %c365_i32 dim 1 : vector<8x384xf32>, i32 -> vector<8x384xf32>
    %c0_32 = arith.constant 0 : index
    %c8 = arith.constant 8 : index
    %c0_33 = arith.constant 0 : index
    %c0_34 = arith.constant 0 : index
    %72 = vector.load %arg1[%c0_32, %c8, %c0_33, %c0_34] : memref<4x9x8x1xf32, #tpu.memory_space<vmem>>, vector<1x1x8x1xf32>
    %73 = vector.shape_cast %72 : vector<1x1x8x1xf32> to vector<8x1xf32>
    %74 = vector.broadcast %73 : vector<8x1xf32> to vector<8x384xf32>
    %75 = arith.mulf %74, %71 : vector<8x384xf32>
    %76 = arith.addf %70, %75 : vector<8x384xf32>
    %c6_i32 = arith.constant 6 : i32
    %77 = tpu.dynamic_rotate %0 by %c6_i32 dim 0 : vector<8x384xf32>, i32 -> vector<8x384xf32>
    %c19_i32_35 = arith.constant 19 : i32
    %78 = tpu.dynamic_rotate %77 by %c19_i32_35 dim 1 : vector<8x384xf32>, i32 -> vector<8x384xf32>
    %c1_36 = arith.constant 1 : index
    %c0_37 = arith.constant 0 : index
    %c0_38 = arith.constant 0 : index
    %c0_39 = arith.constant 0 : index
    %79 = vector.load %arg1[%c1_36, %c0_37, %c0_38, %c0_39] : memref<4x9x8x1xf32, #tpu.memory_space<vmem>>, vector<1x1x8x1xf32>
    %80 = vector.shape_cast %79 : vector<1x1x8x1xf32> to vector<8x1xf32>
    %81 = vector.broadcast %80 : vector<8x1xf32> to vector<8x384xf32>
    %82 = arith.mulf %81, %78 : vector<8x384xf32>
    %83 = arith.addf %76, %82 : vector<8x384xf32>
    %c18_i32_40 = arith.constant 18 : i32
    %84 = tpu.dynamic_rotate %77 by %c18_i32_40 dim 1 : vector<8x384xf32>, i32 -> vector<8x384xf32>
    %c1_41 = arith.constant 1 : index
    %c1_42 = arith.constant 1 : index
    %c0_43 = arith.constant 0 : index
    %c0_44 = arith.constant 0 : index
    %85 = vector.load %arg1[%c1_41, %c1_42, %c0_43, %c0_44] : memref<4x9x8x1xf32, #tpu.memory_space<vmem>>, vector<1x1x8x1xf32>
    %86 = vector.shape_cast %85 : vector<1x1x8x1xf32> to vector<8x1xf32>
    %87 = vector.broadcast %86 : vector<8x1xf32> to vector<8x384xf32>
    %88 = arith.mulf %87, %84 : vector<8x384xf32>
    %89 = arith.addf %83, %88 : vector<8x384xf32>
    %c17_i32_45 = arith.constant 17 : i32
    %90 = tpu.dynamic_rotate %77 by %c17_i32_45 dim 1 : vector<8x384xf32>, i32 -> vector<8x384xf32>
    %c1_46 = arith.constant 1 : index
    %c2_47 = arith.constant 2 : index
    %c0_48 = arith.constant 0 : index
    %c0_49 = arith.constant 0 : index
    %91 = vector.load %arg1[%c1_46, %c2_47, %c0_48, %c0_49] : memref<4x9x8x1xf32, #tpu.memory_space<vmem>>, vector<1x1x8x1xf32>
    %92 = vector.shape_cast %91 : vector<1x1x8x1xf32> to vector<8x1xf32>
    %93 = vector.broadcast %92 : vector<8x1xf32> to vector<8x384xf32>
    %94 = arith.mulf %93, %90 : vector<8x384xf32>
    %95 = arith.addf %89, %94 : vector<8x384xf32>
    %c1_i32_50 = arith.constant 1 : i32
    %96 = tpu.dynamic_rotate %77 by %c1_i32_50 dim 1 : vector<8x384xf32>, i32 -> vector<8x384xf32>
    %c1_51 = arith.constant 1 : index
    %c3_52 = arith.constant 3 : index
    %c0_53 = arith.constant 0 : index
    %c0_54 = arith.constant 0 : index
    %97 = vector.load %arg1[%c1_51, %c3_52, %c0_53, %c0_54] : memref<4x9x8x1xf32, #tpu.memory_space<vmem>>, vector<1x1x8x1xf32>
    %98 = vector.shape_cast %97 : vector<1x1x8x1xf32> to vector<8x1xf32>
    %99 = vector.broadcast %98 : vector<8x1xf32> to vector<8x384xf32>
    %100 = arith.mulf %99, %96 : vector<8x384xf32>
    %101 = arith.addf %95, %100 : vector<8x384xf32>
    %c1_55 = arith.constant 1 : index
    %c4_56 = arith.constant 4 : index
    %c0_57 = arith.constant 0 : index
    %c0_58 = arith.constant 0 : index
    %102 = vector.load %arg1[%c1_55, %c4_56, %c0_57, %c0_58] : memref<4x9x8x1xf32, #tpu.memory_space<vmem>>, vector<1x1x8x1xf32>
    %103 = vector.shape_cast %102 : vector<1x1x8x1xf32> to vector<8x1xf32>
    %104 = vector.broadcast %103 : vector<8x1xf32> to vector<8x384xf32>
    %105 = arith.mulf %104, %77 : vector<8x384xf32>
    %106 = arith.addf %101, %105 : vector<8x384xf32>
    %c383_i32_59 = arith.constant 383 : i32
    %107 = tpu.dynamic_rotate %77 by %c383_i32_59 dim 1 : vector<8x384xf32>, i32 -> vector<8x384xf32>
    %c1_60 = arith.constant 1 : index
    %c5_61 = arith.constant 5 : index
    %c0_62 = arith.constant 0 : index
    %c0_63 = arith.constant 0 : index
    %108 = vector.load %arg1[%c1_60, %c5_61, %c0_62, %c0_63] : memref<4x9x8x1xf32, #tpu.memory_space<vmem>>, vector<1x1x8x1xf32>
    %109 = vector.shape_cast %108 : vector<1x1x8x1xf32> to vector<8x1xf32>
    %110 = vector.broadcast %109 : vector<8x1xf32> to vector<8x384xf32>
    %111 = arith.mulf %110, %107 : vector<8x384xf32>
    %112 = arith.addf %106, %111 : vector<8x384xf32>
    %c367_i32_64 = arith.constant 367 : i32
    %113 = tpu.dynamic_rotate %77 by %c367_i32_64 dim 1 : vector<8x384xf32>, i32 -> vector<8x384xf32>
    %c1_65 = arith.constant 1 : index
    %c6_66 = arith.constant 6 : index
    %c0_67 = arith.constant 0 : index
    %c0_68 = arith.constant 0 : index
    %114 = vector.load %arg1[%c1_65, %c6_66, %c0_67, %c0_68] : memref<4x9x8x1xf32, #tpu.memory_space<vmem>>, vector<1x1x8x1xf32>
    %115 = vector.shape_cast %114 : vector<1x1x8x1xf32> to vector<8x1xf32>
    %116 = vector.broadcast %115 : vector<8x1xf32> to vector<8x384xf32>
    %117 = arith.mulf %116, %113 : vector<8x384xf32>
    %118 = arith.addf %112, %117 : vector<8x384xf32>
    %c366_i32_69 = arith.constant 366 : i32
    %119 = tpu.dynamic_rotate %77 by %c366_i32_69 dim 1 : vector<8x384xf32>, i32 -> vector<8x384xf32>
    %c1_70 = arith.constant 1 : index
    %c7_71 = arith.constant 7 : index
    %c0_72 = arith.constant 0 : index
    %c0_73 = arith.constant 0 : index
    %120 = vector.load %arg1[%c1_70, %c7_71, %c0_72, %c0_73] : memref<4x9x8x1xf32, #tpu.memory_space<vmem>>, vector<1x1x8x1xf32>
    %121 = vector.shape_cast %120 : vector<1x1x8x1xf32> to vector<8x1xf32>
    %122 = vector.broadcast %121 : vector<8x1xf32> to vector<8x384xf32>
    %123 = arith.mulf %122, %119 : vector<8x384xf32>
    %124 = arith.addf %118, %123 : vector<8x384xf32>
    %c365_i32_74 = arith.constant 365 : i32
    %125 = tpu.dynamic_rotate %77 by %c365_i32_74 dim 1 : vector<8x384xf32>, i32 -> vector<8x384xf32>
    %c1_75 = arith.constant 1 : index
    %c8_76 = arith.constant 8 : index
    %c0_77 = arith.constant 0 : index
    %c0_78 = arith.constant 0 : index
    %126 = vector.load %arg1[%c1_75, %c8_76, %c0_77, %c0_78] : memref<4x9x8x1xf32, #tpu.memory_space<vmem>>, vector<1x1x8x1xf32>
    %127 = vector.shape_cast %126 : vector<1x1x8x1xf32> to vector<8x1xf32>
    %128 = vector.broadcast %127 : vector<8x1xf32> to vector<8x384xf32>
    %129 = arith.mulf %128, %125 : vector<8x384xf32>
    %130 = arith.addf %124, %129 : vector<8x384xf32>
    %c4_i32 = arith.constant 4 : i32
    %131 = tpu.dynamic_rotate %0 by %c4_i32 dim 0 : vector<8x384xf32>, i32 -> vector<8x384xf32>
    %c19_i32_79 = arith.constant 19 : i32
    %132 = tpu.dynamic_rotate %131 by %c19_i32_79 dim 1 : vector<8x384xf32>, i32 -> vector<8x384xf32>
    %c2_80 = arith.constant 2 : index
    %c0_81 = arith.constant 0 : index
    %c0_82 = arith.constant 0 : index
    %c0_83 = arith.constant 0 : index
    %133 = vector.load %arg1[%c2_80, %c0_81, %c0_82, %c0_83] : memref<4x9x8x1xf32, #tpu.memory_space<vmem>>, vector<1x1x8x1xf32>
    %134 = vector.shape_cast %133 : vector<1x1x8x1xf32> to vector<8x1xf32>
    %135 = vector.broadcast %134 : vector<8x1xf32> to vector<8x384xf32>
    %136 = arith.mulf %135, %132 : vector<8x384xf32>
    %137 = arith.addf %130, %136 : vector<8x384xf32>
    %c18_i32_84 = arith.constant 18 : i32
    %138 = tpu.dynamic_rotate %131 by %c18_i32_84 dim 1 : vector<8x384xf32>, i32 -> vector<8x384xf32>
    %c2_85 = arith.constant 2 : index
    %c1_86 = arith.constant 1 : index
    %c0_87 = arith.constant 0 : index
    %c0_88 = arith.constant 0 : index
    %139 = vector.load %arg1[%c2_85, %c1_86, %c0_87, %c0_88] : memref<4x9x8x1xf32, #tpu.memory_space<vmem>>, vector<1x1x8x1xf32>
    %140 = vector.shape_cast %139 : vector<1x1x8x1xf32> to vector<8x1xf32>
    %141 = vector.broadcast %140 : vector<8x1xf32> to vector<8x384xf32>
    %142 = arith.mulf %141, %138 : vector<8x384xf32>
    %143 = arith.addf %137, %142 : vector<8x384xf32>
    %c17_i32_89 = arith.constant 17 : i32
    %144 = tpu.dynamic_rotate %131 by %c17_i32_89 dim 1 : vector<8x384xf32>, i32 -> vector<8x384xf32>
    %c2_90 = arith.constant 2 : index
    %c2_91 = arith.constant 2 : index
    %c0_92 = arith.constant 0 : index
    %c0_93 = arith.constant 0 : index
    %145 = vector.load %arg1[%c2_90, %c2_91, %c0_92, %c0_93] : memref<4x9x8x1xf32, #tpu.memory_space<vmem>>, vector<1x1x8x1xf32>
    %146 = vector.shape_cast %145 : vector<1x1x8x1xf32> to vector<8x1xf32>
    %147 = vector.broadcast %146 : vector<8x1xf32> to vector<8x384xf32>
    %148 = arith.mulf %147, %144 : vector<8x384xf32>
    %149 = arith.addf %143, %148 : vector<8x384xf32>
    %c1_i32_94 = arith.constant 1 : i32
    %150 = tpu.dynamic_rotate %131 by %c1_i32_94 dim 1 : vector<8x384xf32>, i32 -> vector<8x384xf32>
    %c2_95 = arith.constant 2 : index
    %c3_96 = arith.constant 3 : index
    %c0_97 = arith.constant 0 : index
    %c0_98 = arith.constant 0 : index
    %151 = vector.load %arg1[%c2_95, %c3_96, %c0_97, %c0_98] : memref<4x9x8x1xf32, #tpu.memory_space<vmem>>, vector<1x1x8x1xf32>
    %152 = vector.shape_cast %151 : vector<1x1x8x1xf32> to vector<8x1xf32>
    %153 = vector.broadcast %152 : vector<8x1xf32> to vector<8x384xf32>
    %154 = arith.mulf %153, %150 : vector<8x384xf32>
    %155 = arith.addf %149, %154 : vector<8x384xf32>
    %c2_99 = arith.constant 2 : index
    %c4_100 = arith.constant 4 : index
    %c0_101 = arith.constant 0 : index
    %c0_102 = arith.constant 0 : index
    %156 = vector.load %arg1[%c2_99, %c4_100, %c0_101, %c0_102] : memref<4x9x8x1xf32, #tpu.memory_space<vmem>>, vector<1x1x8x1xf32>
    %157 = vector.shape_cast %156 : vector<1x1x8x1xf32> to vector<8x1xf32>
    %158 = vector.broadcast %157 : vector<8x1xf32> to vector<8x384xf32>
    %159 = arith.mulf %158, %131 : vector<8x384xf32>
    %160 = arith.addf %155, %159 : vector<8x384xf32>
    %c383_i32_103 = arith.constant 383 : i32
    %161 = tpu.dynamic_rotate %131 by %c383_i32_103 dim 1 : vector<8x384xf32>, i32 -> vector<8x384xf32>
    %c2_104 = arith.constant 2 : index
    %c5_105 = arith.constant 5 : index
    %c0_106 = arith.constant 0 : index
    %c0_107 = arith.constant 0 : index
    %162 = vector.load %arg1[%c2_104, %c5_105, %c0_106, %c0_107] : memref<4x9x8x1xf32, #tpu.memory_space<vmem>>, vector<1x1x8x1xf32>
    %163 = vector.shape_cast %162 : vector<1x1x8x1xf32> to vector<8x1xf32>
    %164 = vector.broadcast %163 : vector<8x1xf32> to vector<8x384xf32>
    %165 = arith.mulf %164, %161 : vector<8x384xf32>
    %166 = arith.addf %160, %165 : vector<8x384xf32>
    %c367_i32_108 = arith.constant 367 : i32
    %167 = tpu.dynamic_rotate %131 by %c367_i32_108 dim 1 : vector<8x384xf32>, i32 -> vector<8x384xf32>
    %c2_109 = arith.constant 2 : index
    %c6_110 = arith.constant 6 : index
    %c0_111 = arith.constant 0 : index
    %c0_112 = arith.constant 0 : index
    %168 = vector.load %arg1[%c2_109, %c6_110, %c0_111, %c0_112] : memref<4x9x8x1xf32, #tpu.memory_space<vmem>>, vector<1x1x8x1xf32>
    %169 = vector.shape_cast %168 : vector<1x1x8x1xf32> to vector<8x1xf32>
    %170 = vector.broadcast %169 : vector<8x1xf32> to vector<8x384xf32>
    %171 = arith.mulf %170, %167 : vector<8x384xf32>
    %172 = arith.addf %166, %171 : vector<8x384xf32>
    %c366_i32_113 = arith.constant 366 : i32
    %173 = tpu.dynamic_rotate %131 by %c366_i32_113 dim 1 : vector<8x384xf32>, i32 -> vector<8x384xf32>
    %c2_114 = arith.constant 2 : index
    %c7_115 = arith.constant 7 : index
    %c0_116 = arith.constant 0 : index
    %c0_117 = arith.constant 0 : index
    %174 = vector.load %arg1[%c2_114, %c7_115, %c0_116, %c0_117] : memref<4x9x8x1xf32, #tpu.memory_space<vmem>>, vector<1x1x8x1xf32>
    %175 = vector.shape_cast %174 : vector<1x1x8x1xf32> to vector<8x1xf32>
    %176 = vector.broadcast %175 : vector<8x1xf32> to vector<8x384xf32>
    %177 = arith.mulf %176, %173 : vector<8x384xf32>
    %178 = arith.addf %172, %177 : vector<8x384xf32>
    %c365_i32_118 = arith.constant 365 : i32
    %179 = tpu.dynamic_rotate %131 by %c365_i32_118 dim 1 : vector<8x384xf32>, i32 -> vector<8x384xf32>
    %c2_119 = arith.constant 2 : index
    %c8_120 = arith.constant 8 : index
    %c0_121 = arith.constant 0 : index
    %c0_122 = arith.constant 0 : index
    %180 = vector.load %arg1[%c2_119, %c8_120, %c0_121, %c0_122] : memref<4x9x8x1xf32, #tpu.memory_space<vmem>>, vector<1x1x8x1xf32>
    %181 = vector.shape_cast %180 : vector<1x1x8x1xf32> to vector<8x1xf32>
    %182 = vector.broadcast %181 : vector<8x1xf32> to vector<8x384xf32>
    %183 = arith.mulf %182, %179 : vector<8x384xf32>
    %184 = arith.addf %178, %183 : vector<8x384xf32>
    %c2_i32 = arith.constant 2 : i32
    %185 = tpu.dynamic_rotate %0 by %c2_i32 dim 0 : vector<8x384xf32>, i32 -> vector<8x384xf32>
    %c19_i32_123 = arith.constant 19 : i32
    %186 = tpu.dynamic_rotate %185 by %c19_i32_123 dim 1 : vector<8x384xf32>, i32 -> vector<8x384xf32>
    %c3_124 = arith.constant 3 : index
    %c0_125 = arith.constant 0 : index
    %c0_126 = arith.constant 0 : index
    %c0_127 = arith.constant 0 : index
    %187 = vector.load %arg1[%c3_124, %c0_125, %c0_126, %c0_127] : memref<4x9x8x1xf32, #tpu.memory_space<vmem>>, vector<1x1x8x1xf32>
    %188 = vector.shape_cast %187 : vector<1x1x8x1xf32> to vector<8x1xf32>
    %189 = vector.broadcast %188 : vector<8x1xf32> to vector<8x384xf32>
    %190 = arith.mulf %189, %186 : vector<8x384xf32>
    %191 = arith.addf %184, %190 : vector<8x384xf32>
    %c18_i32_128 = arith.constant 18 : i32
    %192 = tpu.dynamic_rotate %185 by %c18_i32_128 dim 1 : vector<8x384xf32>, i32 -> vector<8x384xf32>
    %c3_129 = arith.constant 3 : index
    %c1_130 = arith.constant 1 : index
    %c0_131 = arith.constant 0 : index
    %c0_132 = arith.constant 0 : index
    %193 = vector.load %arg1[%c3_129, %c1_130, %c0_131, %c0_132] : memref<4x9x8x1xf32, #tpu.memory_space<vmem>>, vector<1x1x8x1xf32>
    %194 = vector.shape_cast %193 : vector<1x1x8x1xf32> to vector<8x1xf32>
    %195 = vector.broadcast %194 : vector<8x1xf32> to vector<8x384xf32>
    %196 = arith.mulf %195, %192 : vector<8x384xf32>
    %197 = arith.addf %191, %196 : vector<8x384xf32>
    %c17_i32_133 = arith.constant 17 : i32
    %198 = tpu.dynamic_rotate %185 by %c17_i32_133 dim 1 : vector<8x384xf32>, i32 -> vector<8x384xf32>
    %c3_134 = arith.constant 3 : index
    %c2_135 = arith.constant 2 : index
    %c0_136 = arith.constant 0 : index
    %c0_137 = arith.constant 0 : index
    %199 = vector.load %arg1[%c3_134, %c2_135, %c0_136, %c0_137] : memref<4x9x8x1xf32, #tpu.memory_space<vmem>>, vector<1x1x8x1xf32>
    %200 = vector.shape_cast %199 : vector<1x1x8x1xf32> to vector<8x1xf32>
    %201 = vector.broadcast %200 : vector<8x1xf32> to vector<8x384xf32>
    %202 = arith.mulf %201, %198 : vector<8x384xf32>
    %203 = arith.addf %197, %202 : vector<8x384xf32>
    %c1_i32_138 = arith.constant 1 : i32
    %204 = tpu.dynamic_rotate %185 by %c1_i32_138 dim 1 : vector<8x384xf32>, i32 -> vector<8x384xf32>
    %c3_139 = arith.constant 3 : index
    %c3_140 = arith.constant 3 : index
    %c0_141 = arith.constant 0 : index
    %c0_142 = arith.constant 0 : index
    %205 = vector.load %arg1[%c3_139, %c3_140, %c0_141, %c0_142] : memref<4x9x8x1xf32, #tpu.memory_space<vmem>>, vector<1x1x8x1xf32>
    %206 = vector.shape_cast %205 : vector<1x1x8x1xf32> to vector<8x1xf32>
    %207 = vector.broadcast %206 : vector<8x1xf32> to vector<8x384xf32>
    %208 = arith.mulf %207, %204 : vector<8x384xf32>
    %209 = arith.addf %203, %208 : vector<8x384xf32>
    %c3_143 = arith.constant 3 : index
    %c4_144 = arith.constant 4 : index
    %c0_145 = arith.constant 0 : index
    %c0_146 = arith.constant 0 : index
    %210 = vector.load %arg1[%c3_143, %c4_144, %c0_145, %c0_146] : memref<4x9x8x1xf32, #tpu.memory_space<vmem>>, vector<1x1x8x1xf32>
    %211 = vector.shape_cast %210 : vector<1x1x8x1xf32> to vector<8x1xf32>
    %212 = vector.broadcast %211 : vector<8x1xf32> to vector<8x384xf32>
    %213 = arith.mulf %212, %185 : vector<8x384xf32>
    %214 = arith.addf %209, %213 : vector<8x384xf32>
    %c383_i32_147 = arith.constant 383 : i32
    %215 = tpu.dynamic_rotate %185 by %c383_i32_147 dim 1 : vector<8x384xf32>, i32 -> vector<8x384xf32>
    %c3_148 = arith.constant 3 : index
    %c5_149 = arith.constant 5 : index
    %c0_150 = arith.constant 0 : index
    %c0_151 = arith.constant 0 : index
    %216 = vector.load %arg1[%c3_148, %c5_149, %c0_150, %c0_151] : memref<4x9x8x1xf32, #tpu.memory_space<vmem>>, vector<1x1x8x1xf32>
    %217 = vector.shape_cast %216 : vector<1x1x8x1xf32> to vector<8x1xf32>
    %218 = vector.broadcast %217 : vector<8x1xf32> to vector<8x384xf32>
    %219 = arith.mulf %218, %215 : vector<8x384xf32>
    %220 = arith.addf %214, %219 : vector<8x384xf32>
    %c367_i32_152 = arith.constant 367 : i32
    %221 = tpu.dynamic_rotate %185 by %c367_i32_152 dim 1 : vector<8x384xf32>, i32 -> vector<8x384xf32>
    %c3_153 = arith.constant 3 : index
    %c6_154 = arith.constant 6 : index
    %c0_155 = arith.constant 0 : index
    %c0_156 = arith.constant 0 : index
    %222 = vector.load %arg1[%c3_153, %c6_154, %c0_155, %c0_156] : memref<4x9x8x1xf32, #tpu.memory_space<vmem>>, vector<1x1x8x1xf32>
    %223 = vector.shape_cast %222 : vector<1x1x8x1xf32> to vector<8x1xf32>
    %224 = vector.broadcast %223 : vector<8x1xf32> to vector<8x384xf32>
    %225 = arith.mulf %224, %221 : vector<8x384xf32>
    %226 = arith.addf %220, %225 : vector<8x384xf32>
    %c366_i32_157 = arith.constant 366 : i32
    %227 = tpu.dynamic_rotate %185 by %c366_i32_157 dim 1 : vector<8x384xf32>, i32 -> vector<8x384xf32>
    %c3_158 = arith.constant 3 : index
    %c7_159 = arith.constant 7 : index
    %c0_160 = arith.constant 0 : index
    %c0_161 = arith.constant 0 : index
    %228 = vector.load %arg1[%c3_158, %c7_159, %c0_160, %c0_161] : memref<4x9x8x1xf32, #tpu.memory_space<vmem>>, vector<1x1x8x1xf32>
    %229 = vector.shape_cast %228 : vector<1x1x8x1xf32> to vector<8x1xf32>
    %230 = vector.broadcast %229 : vector<8x1xf32> to vector<8x384xf32>
    %231 = arith.mulf %230, %227 : vector<8x384xf32>
    %232 = arith.addf %226, %231 : vector<8x384xf32>
    %c365_i32_162 = arith.constant 365 : i32
    %233 = tpu.dynamic_rotate %185 by %c365_i32_162 dim 1 : vector<8x384xf32>, i32 -> vector<8x384xf32>
    %c3_163 = arith.constant 3 : index
    %c8_164 = arith.constant 8 : index
    %c0_165 = arith.constant 0 : index
    %c0_166 = arith.constant 0 : index
    %234 = vector.load %arg1[%c3_163, %c8_164, %c0_165, %c0_166] : memref<4x9x8x1xf32, #tpu.memory_space<vmem>>, vector<1x1x8x1xf32>
    %235 = vector.shape_cast %234 : vector<1x1x8x1xf32> to vector<8x1xf32>
    %236 = vector.broadcast %235 : vector<8x1xf32> to vector<8x384xf32>
    %237 = arith.mulf %236, %233 : vector<8x384xf32>
    %238 = arith.addf %232, %237 : vector<8x384xf32>
    %c0_167 = arith.constant 0 : index
    %c0_168 = arith.constant 0 : index
    %239 = vector.load %arg3[%c0_167, %c0_168] : memref<8x1xf32, #tpu.memory_space<vmem>>, vector<8x1xf32>
    %c0_169 = arith.constant 0 : index
    %c0_170 = arith.constant 0 : index
    %240 = vector.load %arg4[%c0_169, %c0_170] : memref<8x1xf32, #tpu.memory_space<vmem>>, vector<8x1xf32>
    %241 = vector.broadcast %22 : vector<1x384xf32> to vector<8x384xf32>
    %242 = arith.mulf %238, %241 : vector<8x384xf32>
    %cst_171 = arith.constant dense<0.000000e+00> : vector<8xf32>
    %243 = vector.multi_reduction <add>, %242, %cst_171 [1] : vector<8x384xf32> to vector<8xf32>
    %244 = vector.shape_cast %243 : vector<8xf32> to vector<8x1xf32>
    %245 = tpu.iota {dimensions = array<i32: 0>} : vector<8x1xi32>
    %c8_i32 = arith.constant 8 : i32
    %246 = vector.broadcast %c8_i32 : i32 to vector<8x1xi32>
    %247 = arith.muli %245, %246 : vector<8x1xi32>
    %c4_i32_172 = arith.constant 4 : i32
    %248 = vector.broadcast %c4_i32_172 : i32 to vector<8x1xi32>
    %249 = arith.shrsi %247, %248 : vector<8x1xi32>
    %c2_i32_173 = arith.constant 2 : i32
    %250 = vector.broadcast %c2_i32_173 : i32 to vector<8x1xi32>
    %251 = arith.muli %249, %250 : vector<8x1xi32>
    %252 = arith.subi %245, %251 : vector<8x1xi32>
    %c7_i32 = arith.constant 7 : i32
    %253 = tpu.dynamic_rotate %244 by %c7_i32 dim 0 : vector<8x1xf32>, i32 -> vector<8x1xf32>
    %c1_i32_174 = arith.constant 1 : i32
    %254 = tpu.dynamic_rotate %244 by %c1_i32_174 dim 0 : vector<8x1xf32>, i32 -> vector<8x1xf32>
    %c1_i32_175 = arith.constant 1 : i32
    %255 = vector.broadcast %c1_i32_175 : i32 to vector<8x1xi32>
    %256 = arith.addi %252, %255 : vector<8x1xi32>
    %c2_i32_176 = arith.constant 2 : i32
    %257 = vector.broadcast %c2_i32_176 : i32 to vector<8x1xi32>
    %258 = arith.cmpi slt, %256, %257 : vector<8x1xi32>
    %259 = arith.select %258, %253, %254 : vector<8x1xi1>, vector<8x1xf32>
    %260 = arith.addf %244, %259 : vector<8x1xf32>
    %cst_177 = arith.constant 0.001953125 : f32
    %261 = vector.broadcast %cst_177 : f32 to vector<8x1xf32>
    %262 = arith.mulf %260, %261 : vector<8x1xf32>
    %263 = vector.broadcast %262 : vector<8x1xf32> to vector<8x384xf32>
    %264 = arith.subf %238, %263 : vector<8x384xf32>
    %265 = vector.broadcast %22 : vector<1x384xf32> to vector<8x384xf32>
    %266 = arith.mulf %264, %265 : vector<8x384xf32>
    %267 = arith.mulf %266, %266 : vector<8x384xf32>
    %cst_178 = arith.constant dense<0.000000e+00> : vector<8xf32>
    %268 = vector.multi_reduction <add>, %267, %cst_178 [1] : vector<8x384xf32> to vector<8xf32>
    %269 = vector.shape_cast %268 : vector<8xf32> to vector<8x1xf32>
    %270 = tpu.iota {dimensions = array<i32: 0>} : vector<8x1xi32>
    %c8_i32_179 = arith.constant 8 : i32
    %271 = vector.broadcast %c8_i32_179 : i32 to vector<8x1xi32>
    %272 = arith.muli %270, %271 : vector<8x1xi32>
    %c4_i32_180 = arith.constant 4 : i32
    %273 = vector.broadcast %c4_i32_180 : i32 to vector<8x1xi32>
    %274 = arith.shrsi %272, %273 : vector<8x1xi32>
    %c2_i32_181 = arith.constant 2 : i32
    %275 = vector.broadcast %c2_i32_181 : i32 to vector<8x1xi32>
    %276 = arith.muli %274, %275 : vector<8x1xi32>
    %277 = arith.subi %270, %276 : vector<8x1xi32>
    %c7_i32_182 = arith.constant 7 : i32
    %278 = tpu.dynamic_rotate %269 by %c7_i32_182 dim 0 : vector<8x1xf32>, i32 -> vector<8x1xf32>
    %c1_i32_183 = arith.constant 1 : i32
    %279 = tpu.dynamic_rotate %269 by %c1_i32_183 dim 0 : vector<8x1xf32>, i32 -> vector<8x1xf32>
    %c1_i32_184 = arith.constant 1 : i32
    %280 = vector.broadcast %c1_i32_184 : i32 to vector<8x1xi32>
    %281 = arith.addi %277, %280 : vector<8x1xi32>
    %c2_i32_185 = arith.constant 2 : i32
    %282 = vector.broadcast %c2_i32_185 : i32 to vector<8x1xi32>
    %283 = arith.cmpi slt, %281, %282 : vector<8x1xi32>
    %284 = arith.select %283, %278, %279 : vector<8x1xi1>, vector<8x1xf32>
    %285 = arith.addf %269, %284 : vector<8x1xf32>
    %cst_186 = arith.constant 0.001953125 : f32
    %286 = vector.broadcast %cst_186 : f32 to vector<8x1xf32>
    %287 = arith.mulf %285, %286 : vector<8x1xf32>
    %cst_187 = arith.constant 9.99999974E-6 : f32
    %288 = vector.broadcast %cst_187 : f32 to vector<8x1xf32>
    %289 = arith.addf %287, %288 : vector<8x1xf32>
    %290 = math.rsqrt %289 : vector<8x1xf32>
    %291 = arith.mulf %239, %290 : vector<8x1xf32>
    %292 = vector.broadcast %262 : vector<8x1xf32> to vector<8x384xf32>
    %293 = arith.subf %238, %292 : vector<8x384xf32>
    %294 = vector.broadcast %291 : vector<8x1xf32> to vector<8x384xf32>
    %295 = arith.mulf %293, %294 : vector<8x384xf32>
    %296 = vector.broadcast %240 : vector<8x1xf32> to vector<8x384xf32>
    %297 = arith.addf %295, %296 : vector<8x384xf32>
    %cst_188 = arith.constant 0.000000e+00 : f32
    %298 = vector.broadcast %cst_188 : f32 to vector<8x384xf32>
    %299 = arith.maximumf %297, %298 : vector<8x384xf32>
    %300 = vector.broadcast %22 : vector<1x384xf32> to vector<8x384xf32>
    %301 = arith.mulf %299, %300 : vector<8x384xf32>
    %cst_189 = arith.constant 0.000000e+00 : f32
    %302 = vector.broadcast %cst_189 : f32 to vector<8x384xf32>
    %c19_i32_190 = arith.constant 19 : i32
    %303 = tpu.dynamic_rotate %301 by %c19_i32_190 dim 1 : vector<8x384xf32>, i32 -> vector<8x384xf32>
    %c0_191 = arith.constant 0 : index
    %c0_192 = arith.constant 0 : index
    %c0_193 = arith.constant 0 : index
    %c0_194 = arith.constant 0 : index
    %304 = vector.load %arg2[%c0_191, %c0_192, %c0_193, %c0_194] : memref<4x9x8x1xf32, #tpu.memory_space<vmem>>, vector<1x1x8x1xf32>
    %305 = vector.shape_cast %304 : vector<1x1x8x1xf32> to vector<8x1xf32>
    %306 = vector.broadcast %305 : vector<8x1xf32> to vector<8x384xf32>
    %307 = arith.mulf %306, %303 : vector<8x384xf32>
    %308 = arith.addf %302, %307 : vector<8x384xf32>
    %c18_i32_195 = arith.constant 18 : i32
    %309 = tpu.dynamic_rotate %301 by %c18_i32_195 dim 1 : vector<8x384xf32>, i32 -> vector<8x384xf32>
    %c0_196 = arith.constant 0 : index
    %c1_197 = arith.constant 1 : index
    %c0_198 = arith.constant 0 : index
    %c0_199 = arith.constant 0 : index
    %310 = vector.load %arg2[%c0_196, %c1_197, %c0_198, %c0_199] : memref<4x9x8x1xf32, #tpu.memory_space<vmem>>, vector<1x1x8x1xf32>
    %311 = vector.shape_cast %310 : vector<1x1x8x1xf32> to vector<8x1xf32>
    %312 = vector.broadcast %311 : vector<8x1xf32> to vector<8x384xf32>
    %313 = arith.mulf %312, %309 : vector<8x384xf32>
    %314 = arith.addf %308, %313 : vector<8x384xf32>
    %c17_i32_200 = arith.constant 17 : i32
    %315 = tpu.dynamic_rotate %301 by %c17_i32_200 dim 1 : vector<8x384xf32>, i32 -> vector<8x384xf32>
    %c0_201 = arith.constant 0 : index
    %c2_202 = arith.constant 2 : index
    %c0_203 = arith.constant 0 : index
    %c0_204 = arith.constant 0 : index
    %316 = vector.load %arg2[%c0_201, %c2_202, %c0_203, %c0_204] : memref<4x9x8x1xf32, #tpu.memory_space<vmem>>, vector<1x1x8x1xf32>
    %317 = vector.shape_cast %316 : vector<1x1x8x1xf32> to vector<8x1xf32>
    %318 = vector.broadcast %317 : vector<8x1xf32> to vector<8x384xf32>
    %319 = arith.mulf %318, %315 : vector<8x384xf32>
    %320 = arith.addf %314, %319 : vector<8x384xf32>
    %c1_i32_205 = arith.constant 1 : i32
    %321 = tpu.dynamic_rotate %301 by %c1_i32_205 dim 1 : vector<8x384xf32>, i32 -> vector<8x384xf32>
    %c0_206 = arith.constant 0 : index
    %c3_207 = arith.constant 3 : index
    %c0_208 = arith.constant 0 : index
    %c0_209 = arith.constant 0 : index
    %322 = vector.load %arg2[%c0_206, %c3_207, %c0_208, %c0_209] : memref<4x9x8x1xf32, #tpu.memory_space<vmem>>, vector<1x1x8x1xf32>
    %323 = vector.shape_cast %322 : vector<1x1x8x1xf32> to vector<8x1xf32>
    %324 = vector.broadcast %323 : vector<8x1xf32> to vector<8x384xf32>
    %325 = arith.mulf %324, %321 : vector<8x384xf32>
    %326 = arith.addf %320, %325 : vector<8x384xf32>
    %c0_210 = arith.constant 0 : index
    %c4_211 = arith.constant 4 : index
    %c0_212 = arith.constant 0 : index
    %c0_213 = arith.constant 0 : index
    %327 = vector.load %arg2[%c0_210, %c4_211, %c0_212, %c0_213] : memref<4x9x8x1xf32, #tpu.memory_space<vmem>>, vector<1x1x8x1xf32>
    %328 = vector.shape_cast %327 : vector<1x1x8x1xf32> to vector<8x1xf32>
    %329 = vector.broadcast %328 : vector<8x1xf32> to vector<8x384xf32>
    %330 = arith.mulf %329, %301 : vector<8x384xf32>
    %331 = arith.addf %326, %330 : vector<8x384xf32>
    %c383_i32_214 = arith.constant 383 : i32
    %332 = tpu.dynamic_rotate %301 by %c383_i32_214 dim 1 : vector<8x384xf32>, i32 -> vector<8x384xf32>
    %c0_215 = arith.constant 0 : index
    %c5_216 = arith.constant 5 : index
    %c0_217 = arith.constant 0 : index
    %c0_218 = arith.constant 0 : index
    %333 = vector.load %arg2[%c0_215, %c5_216, %c0_217, %c0_218] : memref<4x9x8x1xf32, #tpu.memory_space<vmem>>, vector<1x1x8x1xf32>
    %334 = vector.shape_cast %333 : vector<1x1x8x1xf32> to vector<8x1xf32>
    %335 = vector.broadcast %334 : vector<8x1xf32> to vector<8x384xf32>
    %336 = arith.mulf %335, %332 : vector<8x384xf32>
    %337 = arith.addf %331, %336 : vector<8x384xf32>
    %c367_i32_219 = arith.constant 367 : i32
    %338 = tpu.dynamic_rotate %301 by %c367_i32_219 dim 1 : vector<8x384xf32>, i32 -> vector<8x384xf32>
    %c0_220 = arith.constant 0 : index
    %c6_221 = arith.constant 6 : index
    %c0_222 = arith.constant 0 : index
    %c0_223 = arith.constant 0 : index
    %339 = vector.load %arg2[%c0_220, %c6_221, %c0_222, %c0_223] : memref<4x9x8x1xf32, #tpu.memory_space<vmem>>, vector<1x1x8x1xf32>
    %340 = vector.shape_cast %339 : vector<1x1x8x1xf32> to vector<8x1xf32>
    %341 = vector.broadcast %340 : vector<8x1xf32> to vector<8x384xf32>
    %342 = arith.mulf %341, %338 : vector<8x384xf32>
    %343 = arith.addf %337, %342 : vector<8x384xf32>
    %c366_i32_224 = arith.constant 366 : i32
    %344 = tpu.dynamic_rotate %301 by %c366_i32_224 dim 1 : vector<8x384xf32>, i32 -> vector<8x384xf32>
    %c0_225 = arith.constant 0 : index
    %c7_226 = arith.constant 7 : index
    %c0_227 = arith.constant 0 : index
    %c0_228 = arith.constant 0 : index
    %345 = vector.load %arg2[%c0_225, %c7_226, %c0_227, %c0_228] : memref<4x9x8x1xf32, #tpu.memory_space<vmem>>, vector<1x1x8x1xf32>
    %346 = vector.shape_cast %345 : vector<1x1x8x1xf32> to vector<8x1xf32>
    %347 = vector.broadcast %346 : vector<8x1xf32> to vector<8x384xf32>
    %348 = arith.mulf %347, %344 : vector<8x384xf32>
    %349 = arith.addf %343, %348 : vector<8x384xf32>
    %c365_i32_229 = arith.constant 365 : i32
    %350 = tpu.dynamic_rotate %301 by %c365_i32_229 dim 1 : vector<8x384xf32>, i32 -> vector<8x384xf32>
    %c0_230 = arith.constant 0 : index
    %c8_231 = arith.constant 8 : index
    %c0_232 = arith.constant 0 : index
    %c0_233 = arith.constant 0 : index
    %351 = vector.load %arg2[%c0_230, %c8_231, %c0_232, %c0_233] : memref<4x9x8x1xf32, #tpu.memory_space<vmem>>, vector<1x1x8x1xf32>
    %352 = vector.shape_cast %351 : vector<1x1x8x1xf32> to vector<8x1xf32>
    %353 = vector.broadcast %352 : vector<8x1xf32> to vector<8x384xf32>
    %354 = arith.mulf %353, %350 : vector<8x384xf32>
    %355 = arith.addf %349, %354 : vector<8x384xf32>
    %c6_i32_234 = arith.constant 6 : i32
    %356 = tpu.dynamic_rotate %301 by %c6_i32_234 dim 0 : vector<8x384xf32>, i32 -> vector<8x384xf32>
    %c19_i32_235 = arith.constant 19 : i32
    %357 = tpu.dynamic_rotate %356 by %c19_i32_235 dim 1 : vector<8x384xf32>, i32 -> vector<8x384xf32>
    %c1_236 = arith.constant 1 : index
    %c0_237 = arith.constant 0 : index
    %c0_238 = arith.constant 0 : index
    %c0_239 = arith.constant 0 : index
    %358 = vector.load %arg2[%c1_236, %c0_237, %c0_238, %c0_239] : memref<4x9x8x1xf32, #tpu.memory_space<vmem>>, vector<1x1x8x1xf32>
    %359 = vector.shape_cast %358 : vector<1x1x8x1xf32> to vector<8x1xf32>
    %360 = vector.broadcast %359 : vector<8x1xf32> to vector<8x384xf32>
    %361 = arith.mulf %360, %357 : vector<8x384xf32>
    %362 = arith.addf %355, %361 : vector<8x384xf32>
    %c18_i32_240 = arith.constant 18 : i32
    %363 = tpu.dynamic_rotate %356 by %c18_i32_240 dim 1 : vector<8x384xf32>, i32 -> vector<8x384xf32>
    %c1_241 = arith.constant 1 : index
    %c1_242 = arith.constant 1 : index
    %c0_243 = arith.constant 0 : index
    %c0_244 = arith.constant 0 : index
    %364 = vector.load %arg2[%c1_241, %c1_242, %c0_243, %c0_244] : memref<4x9x8x1xf32, #tpu.memory_space<vmem>>, vector<1x1x8x1xf32>
    %365 = vector.shape_cast %364 : vector<1x1x8x1xf32> to vector<8x1xf32>
    %366 = vector.broadcast %365 : vector<8x1xf32> to vector<8x384xf32>
    %367 = arith.mulf %366, %363 : vector<8x384xf32>
    %368 = arith.addf %362, %367 : vector<8x384xf32>
    %c17_i32_245 = arith.constant 17 : i32
    %369 = tpu.dynamic_rotate %356 by %c17_i32_245 dim 1 : vector<8x384xf32>, i32 -> vector<8x384xf32>
    %c1_246 = arith.constant 1 : index
    %c2_247 = arith.constant 2 : index
    %c0_248 = arith.constant 0 : index
    %c0_249 = arith.constant 0 : index
    %370 = vector.load %arg2[%c1_246, %c2_247, %c0_248, %c0_249] : memref<4x9x8x1xf32, #tpu.memory_space<vmem>>, vector<1x1x8x1xf32>
    %371 = vector.shape_cast %370 : vector<1x1x8x1xf32> to vector<8x1xf32>
    %372 = vector.broadcast %371 : vector<8x1xf32> to vector<8x384xf32>
    %373 = arith.mulf %372, %369 : vector<8x384xf32>
    %374 = arith.addf %368, %373 : vector<8x384xf32>
    %c1_i32_250 = arith.constant 1 : i32
    %375 = tpu.dynamic_rotate %356 by %c1_i32_250 dim 1 : vector<8x384xf32>, i32 -> vector<8x384xf32>
    %c1_251 = arith.constant 1 : index
    %c3_252 = arith.constant 3 : index
    %c0_253 = arith.constant 0 : index
    %c0_254 = arith.constant 0 : index
    %376 = vector.load %arg2[%c1_251, %c3_252, %c0_253, %c0_254] : memref<4x9x8x1xf32, #tpu.memory_space<vmem>>, vector<1x1x8x1xf32>
    %377 = vector.shape_cast %376 : vector<1x1x8x1xf32> to vector<8x1xf32>
    %378 = vector.broadcast %377 : vector<8x1xf32> to vector<8x384xf32>
    %379 = arith.mulf %378, %375 : vector<8x384xf32>
    %380 = arith.addf %374, %379 : vector<8x384xf32>
    %c1_255 = arith.constant 1 : index
    %c4_256 = arith.constant 4 : index
    %c0_257 = arith.constant 0 : index
    %c0_258 = arith.constant 0 : index
    %381 = vector.load %arg2[%c1_255, %c4_256, %c0_257, %c0_258] : memref<4x9x8x1xf32, #tpu.memory_space<vmem>>, vector<1x1x8x1xf32>
    %382 = vector.shape_cast %381 : vector<1x1x8x1xf32> to vector<8x1xf32>
    %383 = vector.broadcast %382 : vector<8x1xf32> to vector<8x384xf32>
    %384 = arith.mulf %383, %356 : vector<8x384xf32>
    %385 = arith.addf %380, %384 : vector<8x384xf32>
    %c383_i32_259 = arith.constant 383 : i32
    %386 = tpu.dynamic_rotate %356 by %c383_i32_259 dim 1 : vector<8x384xf32>, i32 -> vector<8x384xf32>
    %c1_260 = arith.constant 1 : index
    %c5_261 = arith.constant 5 : index
    %c0_262 = arith.constant 0 : index
    %c0_263 = arith.constant 0 : index
    %387 = vector.load %arg2[%c1_260, %c5_261, %c0_262, %c0_263] : memref<4x9x8x1xf32, #tpu.memory_space<vmem>>, vector<1x1x8x1xf32>
    %388 = vector.shape_cast %387 : vector<1x1x8x1xf32> to vector<8x1xf32>
    %389 = vector.broadcast %388 : vector<8x1xf32> to vector<8x384xf32>
    %390 = arith.mulf %389, %386 : vector<8x384xf32>
    %391 = arith.addf %385, %390 : vector<8x384xf32>
    %c367_i32_264 = arith.constant 367 : i32
    %392 = tpu.dynamic_rotate %356 by %c367_i32_264 dim 1 : vector<8x384xf32>, i32 -> vector<8x384xf32>
    %c1_265 = arith.constant 1 : index
    %c6_266 = arith.constant 6 : index
    %c0_267 = arith.constant 0 : index
    %c0_268 = arith.constant 0 : index
    %393 = vector.load %arg2[%c1_265, %c6_266, %c0_267, %c0_268] : memref<4x9x8x1xf32, #tpu.memory_space<vmem>>, vector<1x1x8x1xf32>
    %394 = vector.shape_cast %393 : vector<1x1x8x1xf32> to vector<8x1xf32>
    %395 = vector.broadcast %394 : vector<8x1xf32> to vector<8x384xf32>
    %396 = arith.mulf %395, %392 : vector<8x384xf32>
    %397 = arith.addf %391, %396 : vector<8x384xf32>
    %c366_i32_269 = arith.constant 366 : i32
    %398 = tpu.dynamic_rotate %356 by %c366_i32_269 dim 1 : vector<8x384xf32>, i32 -> vector<8x384xf32>
    %c1_270 = arith.constant 1 : index
    %c7_271 = arith.constant 7 : index
    %c0_272 = arith.constant 0 : index
    %c0_273 = arith.constant 0 : index
    %399 = vector.load %arg2[%c1_270, %c7_271, %c0_272, %c0_273] : memref<4x9x8x1xf32, #tpu.memory_space<vmem>>, vector<1x1x8x1xf32>
    %400 = vector.shape_cast %399 : vector<1x1x8x1xf32> to vector<8x1xf32>
    %401 = vector.broadcast %400 : vector<8x1xf32> to vector<8x384xf32>
    %402 = arith.mulf %401, %398 : vector<8x384xf32>
    %403 = arith.addf %397, %402 : vector<8x384xf32>
    %c365_i32_274 = arith.constant 365 : i32
    %404 = tpu.dynamic_rotate %356 by %c365_i32_274 dim 1 : vector<8x384xf32>, i32 -> vector<8x384xf32>
    %c1_275 = arith.constant 1 : index
    %c8_276 = arith.constant 8 : index
    %c0_277 = arith.constant 0 : index
    %c0_278 = arith.constant 0 : index
    %405 = vector.load %arg2[%c1_275, %c8_276, %c0_277, %c0_278] : memref<4x9x8x1xf32, #tpu.memory_space<vmem>>, vector<1x1x8x1xf32>
    %406 = vector.shape_cast %405 : vector<1x1x8x1xf32> to vector<8x1xf32>
    %407 = vector.broadcast %406 : vector<8x1xf32> to vector<8x384xf32>
    %408 = arith.mulf %407, %404 : vector<8x384xf32>
    %409 = arith.addf %403, %408 : vector<8x384xf32>
    %c4_i32_279 = arith.constant 4 : i32
    %410 = tpu.dynamic_rotate %301 by %c4_i32_279 dim 0 : vector<8x384xf32>, i32 -> vector<8x384xf32>
    %c19_i32_280 = arith.constant 19 : i32
    %411 = tpu.dynamic_rotate %410 by %c19_i32_280 dim 1 : vector<8x384xf32>, i32 -> vector<8x384xf32>
    %c2_281 = arith.constant 2 : index
    %c0_282 = arith.constant 0 : index
    %c0_283 = arith.constant 0 : index
    %c0_284 = arith.constant 0 : index
    %412 = vector.load %arg2[%c2_281, %c0_282, %c0_283, %c0_284] : memref<4x9x8x1xf32, #tpu.memory_space<vmem>>, vector<1x1x8x1xf32>
    %413 = vector.shape_cast %412 : vector<1x1x8x1xf32> to vector<8x1xf32>
    %414 = vector.broadcast %413 : vector<8x1xf32> to vector<8x384xf32>
    %415 = arith.mulf %414, %411 : vector<8x384xf32>
    %416 = arith.addf %409, %415 : vector<8x384xf32>
    %c18_i32_285 = arith.constant 18 : i32
    %417 = tpu.dynamic_rotate %410 by %c18_i32_285 dim 1 : vector<8x384xf32>, i32 -> vector<8x384xf32>
    %c2_286 = arith.constant 2 : index
    %c1_287 = arith.constant 1 : index
    %c0_288 = arith.constant 0 : index
    %c0_289 = arith.constant 0 : index
    %418 = vector.load %arg2[%c2_286, %c1_287, %c0_288, %c0_289] : memref<4x9x8x1xf32, #tpu.memory_space<vmem>>, vector<1x1x8x1xf32>
    %419 = vector.shape_cast %418 : vector<1x1x8x1xf32> to vector<8x1xf32>
    %420 = vector.broadcast %419 : vector<8x1xf32> to vector<8x384xf32>
    %421 = arith.mulf %420, %417 : vector<8x384xf32>
    %422 = arith.addf %416, %421 : vector<8x384xf32>
    %c17_i32_290 = arith.constant 17 : i32
    %423 = tpu.dynamic_rotate %410 by %c17_i32_290 dim 1 : vector<8x384xf32>, i32 -> vector<8x384xf32>
    %c2_291 = arith.constant 2 : index
    %c2_292 = arith.constant 2 : index
    %c0_293 = arith.constant 0 : index
    %c0_294 = arith.constant 0 : index
    %424 = vector.load %arg2[%c2_291, %c2_292, %c0_293, %c0_294] : memref<4x9x8x1xf32, #tpu.memory_space<vmem>>, vector<1x1x8x1xf32>
    %425 = vector.shape_cast %424 : vector<1x1x8x1xf32> to vector<8x1xf32>
    %426 = vector.broadcast %425 : vector<8x1xf32> to vector<8x384xf32>
    %427 = arith.mulf %426, %423 : vector<8x384xf32>
    %428 = arith.addf %422, %427 : vector<8x384xf32>
    %c1_i32_295 = arith.constant 1 : i32
    %429 = tpu.dynamic_rotate %410 by %c1_i32_295 dim 1 : vector<8x384xf32>, i32 -> vector<8x384xf32>
    %c2_296 = arith.constant 2 : index
    %c3_297 = arith.constant 3 : index
    %c0_298 = arith.constant 0 : index
    %c0_299 = arith.constant 0 : index
    %430 = vector.load %arg2[%c2_296, %c3_297, %c0_298, %c0_299] : memref<4x9x8x1xf32, #tpu.memory_space<vmem>>, vector<1x1x8x1xf32>
    %431 = vector.shape_cast %430 : vector<1x1x8x1xf32> to vector<8x1xf32>
    %432 = vector.broadcast %431 : vector<8x1xf32> to vector<8x384xf32>
    %433 = arith.mulf %432, %429 : vector<8x384xf32>
    %434 = arith.addf %428, %433 : vector<8x384xf32>
    %c2_300 = arith.constant 2 : index
    %c4_301 = arith.constant 4 : index
    %c0_302 = arith.constant 0 : index
    %c0_303 = arith.constant 0 : index
    %435 = vector.load %arg2[%c2_300, %c4_301, %c0_302, %c0_303] : memref<4x9x8x1xf32, #tpu.memory_space<vmem>>, vector<1x1x8x1xf32>
    %436 = vector.shape_cast %435 : vector<1x1x8x1xf32> to vector<8x1xf32>
    %437 = vector.broadcast %436 : vector<8x1xf32> to vector<8x384xf32>
    %438 = arith.mulf %437, %410 : vector<8x384xf32>
    %439 = arith.addf %434, %438 : vector<8x384xf32>
    %c383_i32_304 = arith.constant 383 : i32
    %440 = tpu.dynamic_rotate %410 by %c383_i32_304 dim 1 : vector<8x384xf32>, i32 -> vector<8x384xf32>
    %c2_305 = arith.constant 2 : index
    %c5_306 = arith.constant 5 : index
    %c0_307 = arith.constant 0 : index
    %c0_308 = arith.constant 0 : index
    %441 = vector.load %arg2[%c2_305, %c5_306, %c0_307, %c0_308] : memref<4x9x8x1xf32, #tpu.memory_space<vmem>>, vector<1x1x8x1xf32>
    %442 = vector.shape_cast %441 : vector<1x1x8x1xf32> to vector<8x1xf32>
    %443 = vector.broadcast %442 : vector<8x1xf32> to vector<8x384xf32>
    %444 = arith.mulf %443, %440 : vector<8x384xf32>
    %445 = arith.addf %439, %444 : vector<8x384xf32>
    %c367_i32_309 = arith.constant 367 : i32
    %446 = tpu.dynamic_rotate %410 by %c367_i32_309 dim 1 : vector<8x384xf32>, i32 -> vector<8x384xf32>
    %c2_310 = arith.constant 2 : index
    %c6_311 = arith.constant 6 : index
    %c0_312 = arith.constant 0 : index
    %c0_313 = arith.constant 0 : index
    %447 = vector.load %arg2[%c2_310, %c6_311, %c0_312, %c0_313] : memref<4x9x8x1xf32, #tpu.memory_space<vmem>>, vector<1x1x8x1xf32>
    %448 = vector.shape_cast %447 : vector<1x1x8x1xf32> to vector<8x1xf32>
    %449 = vector.broadcast %448 : vector<8x1xf32> to vector<8x384xf32>
    %450 = arith.mulf %449, %446 : vector<8x384xf32>
    %451 = arith.addf %445, %450 : vector<8x384xf32>
    %c366_i32_314 = arith.constant 366 : i32
    %452 = tpu.dynamic_rotate %410 by %c366_i32_314 dim 1 : vector<8x384xf32>, i32 -> vector<8x384xf32>
    %c2_315 = arith.constant 2 : index
    %c7_316 = arith.constant 7 : index
    %c0_317 = arith.constant 0 : index
    %c0_318 = arith.constant 0 : index
    %453 = vector.load %arg2[%c2_315, %c7_316, %c0_317, %c0_318] : memref<4x9x8x1xf32, #tpu.memory_space<vmem>>, vector<1x1x8x1xf32>
    %454 = vector.shape_cast %453 : vector<1x1x8x1xf32> to vector<8x1xf32>
    %455 = vector.broadcast %454 : vector<8x1xf32> to vector<8x384xf32>
    %456 = arith.mulf %455, %452 : vector<8x384xf32>
    %457 = arith.addf %451, %456 : vector<8x384xf32>
    %c365_i32_319 = arith.constant 365 : i32
    %458 = tpu.dynamic_rotate %410 by %c365_i32_319 dim 1 : vector<8x384xf32>, i32 -> vector<8x384xf32>
    %c2_320 = arith.constant 2 : index
    %c8_321 = arith.constant 8 : index
    %c0_322 = arith.constant 0 : index
    %c0_323 = arith.constant 0 : index
    %459 = vector.load %arg2[%c2_320, %c8_321, %c0_322, %c0_323] : memref<4x9x8x1xf32, #tpu.memory_space<vmem>>, vector<1x1x8x1xf32>
    %460 = vector.shape_cast %459 : vector<1x1x8x1xf32> to vector<8x1xf32>
    %461 = vector.broadcast %460 : vector<8x1xf32> to vector<8x384xf32>
    %462 = arith.mulf %461, %458 : vector<8x384xf32>
    %463 = arith.addf %457, %462 : vector<8x384xf32>
    %c2_i32_324 = arith.constant 2 : i32
    %464 = tpu.dynamic_rotate %301 by %c2_i32_324 dim 0 : vector<8x384xf32>, i32 -> vector<8x384xf32>
    %c19_i32_325 = arith.constant 19 : i32
    %465 = tpu.dynamic_rotate %464 by %c19_i32_325 dim 1 : vector<8x384xf32>, i32 -> vector<8x384xf32>
    %c3_326 = arith.constant 3 : index
    %c0_327 = arith.constant 0 : index
    %c0_328 = arith.constant 0 : index
    %c0_329 = arith.constant 0 : index
    %466 = vector.load %arg2[%c3_326, %c0_327, %c0_328, %c0_329] : memref<4x9x8x1xf32, #tpu.memory_space<vmem>>, vector<1x1x8x1xf32>
    %467 = vector.shape_cast %466 : vector<1x1x8x1xf32> to vector<8x1xf32>
    %468 = vector.broadcast %467 : vector<8x1xf32> to vector<8x384xf32>
    %469 = arith.mulf %468, %465 : vector<8x384xf32>
    %470 = arith.addf %463, %469 : vector<8x384xf32>
    %c18_i32_330 = arith.constant 18 : i32
    %471 = tpu.dynamic_rotate %464 by %c18_i32_330 dim 1 : vector<8x384xf32>, i32 -> vector<8x384xf32>
    %c3_331 = arith.constant 3 : index
    %c1_332 = arith.constant 1 : index
    %c0_333 = arith.constant 0 : index
    %c0_334 = arith.constant 0 : index
    %472 = vector.load %arg2[%c3_331, %c1_332, %c0_333, %c0_334] : memref<4x9x8x1xf32, #tpu.memory_space<vmem>>, vector<1x1x8x1xf32>
    %473 = vector.shape_cast %472 : vector<1x1x8x1xf32> to vector<8x1xf32>
    %474 = vector.broadcast %473 : vector<8x1xf32> to vector<8x384xf32>
    %475 = arith.mulf %474, %471 : vector<8x384xf32>
    %476 = arith.addf %470, %475 : vector<8x384xf32>
    %c17_i32_335 = arith.constant 17 : i32
    %477 = tpu.dynamic_rotate %464 by %c17_i32_335 dim 1 : vector<8x384xf32>, i32 -> vector<8x384xf32>
    %c3_336 = arith.constant 3 : index
    %c2_337 = arith.constant 2 : index
    %c0_338 = arith.constant 0 : index
    %c0_339 = arith.constant 0 : index
    %478 = vector.load %arg2[%c3_336, %c2_337, %c0_338, %c0_339] : memref<4x9x8x1xf32, #tpu.memory_space<vmem>>, vector<1x1x8x1xf32>
    %479 = vector.shape_cast %478 : vector<1x1x8x1xf32> to vector<8x1xf32>
    %480 = vector.broadcast %479 : vector<8x1xf32> to vector<8x384xf32>
    %481 = arith.mulf %480, %477 : vector<8x384xf32>
    %482 = arith.addf %476, %481 : vector<8x384xf32>
    %c1_i32_340 = arith.constant 1 : i32
    %483 = tpu.dynamic_rotate %464 by %c1_i32_340 dim 1 : vector<8x384xf32>, i32 -> vector<8x384xf32>
    %c3_341 = arith.constant 3 : index
    %c3_342 = arith.constant 3 : index
    %c0_343 = arith.constant 0 : index
    %c0_344 = arith.constant 0 : index
    %484 = vector.load %arg2[%c3_341, %c3_342, %c0_343, %c0_344] : memref<4x9x8x1xf32, #tpu.memory_space<vmem>>, vector<1x1x8x1xf32>
    %485 = vector.shape_cast %484 : vector<1x1x8x1xf32> to vector<8x1xf32>
    %486 = vector.broadcast %485 : vector<8x1xf32> to vector<8x384xf32>
    %487 = arith.mulf %486, %483 : vector<8x384xf32>
    %488 = arith.addf %482, %487 : vector<8x384xf32>
    %c3_345 = arith.constant 3 : index
    %c4_346 = arith.constant 4 : index
    %c0_347 = arith.constant 0 : index
    %c0_348 = arith.constant 0 : index
    %489 = vector.load %arg2[%c3_345, %c4_346, %c0_347, %c0_348] : memref<4x9x8x1xf32, #tpu.memory_space<vmem>>, vector<1x1x8x1xf32>
    %490 = vector.shape_cast %489 : vector<1x1x8x1xf32> to vector<8x1xf32>
    %491 = vector.broadcast %490 : vector<8x1xf32> to vector<8x384xf32>
    %492 = arith.mulf %491, %464 : vector<8x384xf32>
    %493 = arith.addf %488, %492 : vector<8x384xf32>
    %c383_i32_349 = arith.constant 383 : i32
    %494 = tpu.dynamic_rotate %464 by %c383_i32_349 dim 1 : vector<8x384xf32>, i32 -> vector<8x384xf32>
    %c3_350 = arith.constant 3 : index
    %c5_351 = arith.constant 5 : index
    %c0_352 = arith.constant 0 : index
    %c0_353 = arith.constant 0 : index
    %495 = vector.load %arg2[%c3_350, %c5_351, %c0_352, %c0_353] : memref<4x9x8x1xf32, #tpu.memory_space<vmem>>, vector<1x1x8x1xf32>
    %496 = vector.shape_cast %495 : vector<1x1x8x1xf32> to vector<8x1xf32>
    %497 = vector.broadcast %496 : vector<8x1xf32> to vector<8x384xf32>
    %498 = arith.mulf %497, %494 : vector<8x384xf32>
    %499 = arith.addf %493, %498 : vector<8x384xf32>
    %c367_i32_354 = arith.constant 367 : i32
    %500 = tpu.dynamic_rotate %464 by %c367_i32_354 dim 1 : vector<8x384xf32>, i32 -> vector<8x384xf32>
    %c3_355 = arith.constant 3 : index
    %c6_356 = arith.constant 6 : index
    %c0_357 = arith.constant 0 : index
    %c0_358 = arith.constant 0 : index
    %501 = vector.load %arg2[%c3_355, %c6_356, %c0_357, %c0_358] : memref<4x9x8x1xf32, #tpu.memory_space<vmem>>, vector<1x1x8x1xf32>
    %502 = vector.shape_cast %501 : vector<1x1x8x1xf32> to vector<8x1xf32>
    %503 = vector.broadcast %502 : vector<8x1xf32> to vector<8x384xf32>
    %504 = arith.mulf %503, %500 : vector<8x384xf32>
    %505 = arith.addf %499, %504 : vector<8x384xf32>
    %c366_i32_359 = arith.constant 366 : i32
    %506 = tpu.dynamic_rotate %464 by %c366_i32_359 dim 1 : vector<8x384xf32>, i32 -> vector<8x384xf32>
    %c3_360 = arith.constant 3 : index
    %c7_361 = arith.constant 7 : index
    %c0_362 = arith.constant 0 : index
    %c0_363 = arith.constant 0 : index
    %507 = vector.load %arg2[%c3_360, %c7_361, %c0_362, %c0_363] : memref<4x9x8x1xf32, #tpu.memory_space<vmem>>, vector<1x1x8x1xf32>
    %508 = vector.shape_cast %507 : vector<1x1x8x1xf32> to vector<8x1xf32>
    %509 = vector.broadcast %508 : vector<8x1xf32> to vector<8x384xf32>
    %510 = arith.mulf %509, %506 : vector<8x384xf32>
    %511 = arith.addf %505, %510 : vector<8x384xf32>
    %c365_i32_364 = arith.constant 365 : i32
    %512 = tpu.dynamic_rotate %464 by %c365_i32_364 dim 1 : vector<8x384xf32>, i32 -> vector<8x384xf32>
    %c3_365 = arith.constant 3 : index
    %c8_366 = arith.constant 8 : index
    %c0_367 = arith.constant 0 : index
    %c0_368 = arith.constant 0 : index
    %513 = vector.load %arg2[%c3_365, %c8_366, %c0_367, %c0_368] : memref<4x9x8x1xf32, #tpu.memory_space<vmem>>, vector<1x1x8x1xf32>
    %514 = vector.shape_cast %513 : vector<1x1x8x1xf32> to vector<8x1xf32>
    %515 = vector.broadcast %514 : vector<8x1xf32> to vector<8x384xf32>
    %516 = arith.mulf %515, %512 : vector<8x384xf32>
    %517 = arith.addf %511, %516 : vector<8x384xf32>
    %c0_369 = arith.constant 0 : index
    %c0_370 = arith.constant 0 : index
    %518 = vector.load %arg5[%c0_369, %c0_370] : memref<8x1xf32, #tpu.memory_space<vmem>>, vector<8x1xf32>
    %c0_371 = arith.constant 0 : index
    %c0_372 = arith.constant 0 : index
    %519 = vector.load %arg6[%c0_371, %c0_372] : memref<8x1xf32, #tpu.memory_space<vmem>>, vector<8x1xf32>
    %520 = vector.broadcast %22 : vector<1x384xf32> to vector<8x384xf32>
    %521 = arith.mulf %517, %520 : vector<8x384xf32>
    %cst_373 = arith.constant dense<0.000000e+00> : vector<8xf32>
    %522 = vector.multi_reduction <add>, %521, %cst_373 [1] : vector<8x384xf32> to vector<8xf32>
    %523 = vector.shape_cast %522 : vector<8xf32> to vector<8x1xf32>
    %524 = tpu.iota {dimensions = array<i32: 0>} : vector<8x1xi32>
    %c8_i32_374 = arith.constant 8 : i32
    %525 = vector.broadcast %c8_i32_374 : i32 to vector<8x1xi32>
    %526 = arith.muli %524, %525 : vector<8x1xi32>
    %c4_i32_375 = arith.constant 4 : i32
    %527 = vector.broadcast %c4_i32_375 : i32 to vector<8x1xi32>
    %528 = arith.shrsi %526, %527 : vector<8x1xi32>
    %c2_i32_376 = arith.constant 2 : i32
    %529 = vector.broadcast %c2_i32_376 : i32 to vector<8x1xi32>
    %530 = arith.muli %528, %529 : vector<8x1xi32>
    %531 = arith.subi %524, %530 : vector<8x1xi32>
    %c7_i32_377 = arith.constant 7 : i32
    %532 = tpu.dynamic_rotate %523 by %c7_i32_377 dim 0 : vector<8x1xf32>, i32 -> vector<8x1xf32>
    %c1_i32_378 = arith.constant 1 : i32
    %533 = tpu.dynamic_rotate %523 by %c1_i32_378 dim 0 : vector<8x1xf32>, i32 -> vector<8x1xf32>
    %c1_i32_379 = arith.constant 1 : i32
    %534 = vector.broadcast %c1_i32_379 : i32 to vector<8x1xi32>
    %535 = arith.addi %531, %534 : vector<8x1xi32>
    %c2_i32_380 = arith.constant 2 : i32
    %536 = vector.broadcast %c2_i32_380 : i32 to vector<8x1xi32>
    %537 = arith.cmpi slt, %535, %536 : vector<8x1xi32>
    %538 = arith.select %537, %532, %533 : vector<8x1xi1>, vector<8x1xf32>
    %539 = arith.addf %523, %538 : vector<8x1xf32>
    %cst_381 = arith.constant 0.001953125 : f32
    %540 = vector.broadcast %cst_381 : f32 to vector<8x1xf32>
    %541 = arith.mulf %539, %540 : vector<8x1xf32>
    %542 = vector.broadcast %541 : vector<8x1xf32> to vector<8x384xf32>
    %543 = arith.subf %517, %542 : vector<8x384xf32>
    %544 = vector.broadcast %22 : vector<1x384xf32> to vector<8x384xf32>
    %545 = arith.mulf %543, %544 : vector<8x384xf32>
    %546 = arith.mulf %545, %545 : vector<8x384xf32>
    %cst_382 = arith.constant dense<0.000000e+00> : vector<8xf32>
    %547 = vector.multi_reduction <add>, %546, %cst_382 [1] : vector<8x384xf32> to vector<8xf32>
    %548 = vector.shape_cast %547 : vector<8xf32> to vector<8x1xf32>
    %549 = tpu.iota {dimensions = array<i32: 0>} : vector<8x1xi32>
    %c8_i32_383 = arith.constant 8 : i32
    %550 = vector.broadcast %c8_i32_383 : i32 to vector<8x1xi32>
    %551 = arith.muli %549, %550 : vector<8x1xi32>
    %c4_i32_384 = arith.constant 4 : i32
    %552 = vector.broadcast %c4_i32_384 : i32 to vector<8x1xi32>
    %553 = arith.shrsi %551, %552 : vector<8x1xi32>
    %c2_i32_385 = arith.constant 2 : i32
    %554 = vector.broadcast %c2_i32_385 : i32 to vector<8x1xi32>
    %555 = arith.muli %553, %554 : vector<8x1xi32>
    %556 = arith.subi %549, %555 : vector<8x1xi32>
    %c7_i32_386 = arith.constant 7 : i32
    %557 = tpu.dynamic_rotate %548 by %c7_i32_386 dim 0 : vector<8x1xf32>, i32 -> vector<8x1xf32>
    %c1_i32_387 = arith.constant 1 : i32
    %558 = tpu.dynamic_rotate %548 by %c1_i32_387 dim 0 : vector<8x1xf32>, i32 -> vector<8x1xf32>
    %c1_i32_388 = arith.constant 1 : i32
    %559 = vector.broadcast %c1_i32_388 : i32 to vector<8x1xi32>
    %560 = arith.addi %556, %559 : vector<8x1xi32>
    %c2_i32_389 = arith.constant 2 : i32
    %561 = vector.broadcast %c2_i32_389 : i32 to vector<8x1xi32>
    %562 = arith.cmpi slt, %560, %561 : vector<8x1xi32>
    %563 = arith.select %562, %557, %558 : vector<8x1xi1>, vector<8x1xf32>
    %564 = arith.addf %548, %563 : vector<8x1xf32>
    %cst_390 = arith.constant 0.001953125 : f32
    %565 = vector.broadcast %cst_390 : f32 to vector<8x1xf32>
    %566 = arith.mulf %564, %565 : vector<8x1xf32>
    %cst_391 = arith.constant 9.99999974E-6 : f32
    %567 = vector.broadcast %cst_391 : f32 to vector<8x1xf32>
    %568 = arith.addf %566, %567 : vector<8x1xf32>
    %569 = math.rsqrt %568 : vector<8x1xf32>
    %570 = arith.mulf %518, %569 : vector<8x1xf32>
    %571 = vector.broadcast %541 : vector<8x1xf32> to vector<8x384xf32>
    %572 = arith.subf %517, %571 : vector<8x384xf32>
    %573 = vector.broadcast %570 : vector<8x1xf32> to vector<8x384xf32>
    %574 = arith.mulf %572, %573 : vector<8x384xf32>
    %575 = vector.broadcast %519 : vector<8x1xf32> to vector<8x384xf32>
    %576 = arith.addf %574, %575 : vector<8x384xf32>
    %577 = arith.addf %0, %576 : vector<8x384xf32>
    %c0_392 = arith.constant 0 : index
    %c0_393 = arith.constant 0 : index
    %578 = vector.load %arg7[%c0_392, %c0_393] : memref<8x384xf32, #tpu.memory_space<vmem>>, vector<8x384xf32>
    tpu.vector_store %arg7[%c0_392, %c0_393], %577 {strides = array<i32>} : memref<8x384xf32, #tpu.memory_space<vmem>>, vector<8x384xf32>,
    return
  }
}

</mosaic_0001>

<bundles_post_ra>
// kernel: resblock_forward.1
= control target key start
LH: loop header
LB: loop body
LE: loop exit
PB: predicated region body
PF: predicated region fallthrough
CT: control target
= control target key end

     0   :  { %v1830_v0 = vmov 0   ;;  %s1831_s9 = smov 19   ;;  %s1832_s14 = smov 18   ;;  %s3937_s1 = inlined_call_operand.vmem [shape: f32[4,9,8,1], index: 1, kind: input, shape index: {}]   ;;  %s3938_s0 = inlined_call_operand.vmem [shape: f32[8,384], index: 0, kind: input, shape index: {}]   ;;  %s3939_s4 = inlined_call_operand.vmem [shape: f32[8,1], index: 4, kind: input, shape index: {}]   ;;  %s3940_s2 = inlined_call_operand.vmem [shape: f32[4,9,8,1], index: 2, kind: input, shape index: {}]   ;;  %s3941_s3 = inlined_call_operand.vmem [shape: f32[8,1], index: 3, kind: input, shape index: {}]   ;;  %s3942_s6 = inlined_call_operand.vmem [shape: f32[8,1], index: 6, kind: input, shape index: {}]   ;;  %s3943_s5 = inlined_call_operand.vmem [shape: f32[8,1], index: 5, kind: input, shape index: {}]   ;;  %s3944_s7 = inlined_call_operand.vmem [shape: f32[8,384], index: 7, kind: output, shape index: {}]  }
   0x1   :  { %1822 = vset.pattern.permute.xlu1 %v1830_v0  ;;  %1821 = vset.pattern.permute.xlu0 %v1830_v0  ;;  %v1742_v1 = vld [vmem:[%s3937_s1 + $0x10] sm:$0xff]  ;;  %v79_v2 = vld [vmem:[%s3937_s1] sm:$0xff]  ;;  %v1741_v3 = vld [vmem:[%s3937_s1 + $0x8] sm:$0xff]  ;;  %s1833_s17 = smov 17   ;;  %s1834_s20 = smov 1  }
   0x2   :  { %128 = vperm.xlu1 %1822, %v1742_v1   ;;  %82 = vperm.xlu0 %1821, %v79_v2   ;;  %v1892_v4 = vld [vmem:[%s3938_s0] sm:$0xff]  ;;  %v1899_v5 = vld [vmem:[%s3938_s0 + $0x8] sm:$0xff]  ;;  %v1904_v6 = vld [vmem:[%s3938_s0 + $0x10] sm:$0xff]  ;;  %s1835_s25 = smov 127   ;;  %s1836_s28 = smov 111  }
   0x3   :  { %v1743_v7 = vld [vmem:[%s3937_s1 + $0x18] sm:$0xff]  ;;  %v1744_v8 = vld [vmem:[%s3937_s1 + $0x20] sm:$0xff]  ;;  %v1745_v9 = vld [vmem:[%s3937_s1 + $0x28] sm:$0xff]  ;;  %s1837_s8 = smov 110   ;;  %s1838_s12 = smov 109   ;;  %v1974_v14 = vrot.slane %v1892_v4, 2 }
   0x4   :  { %v1746_v10 = vld [vmem:[%s3937_s1 + $0x30] sm:$0xff]  ;;  %v1747_v11 = vld [vmem:[%s3937_s1 + $0x38] sm:$0xff]  ;;  %v1748_v12 = vld [vmem:[%s3937_s1 + $0x40] sm:$0xff]  ;;  %v1982_v16 = vrot.slane %v1899_v5, 2  ;;  %v1985_v17 = vrot.slane %v1904_v6, 2  ;;  %v2073_v33 = vrot.slane %v1892_v4, 4 }
   0x5   :  { %v1749_v13 = vld [vmem:[%s3937_s1 + $0x48] sm:$0xff]  ;;  %4012 = vst [vmem:[#allocation2_spill] sm:$0xff] %v1974_v14  ;;  %v1750_v15 = vld [vmem:[%s3937_s1 + $0x50] sm:$0xff]  ;;  %v1751_v18 = vld [vmem:[%s3937_s1 + $0x58] sm:$0xff]  ;;  %v2076_v34 = vrot.slane %v1899_v5, 4  ;;  %v2087_v37 = vrot.slane %v1904_v6, 4 }
   0x6   :  { %105 = vperm.xlu0 %1821, %v1741_v3   ;;  %69 = vrot.lane.b32.xlu1 %v1892_v4, %s1831_s9  ;;  %4013 = vst [vmem:[#allocation3_spill] sm:$0xff] %v1982_v16  ;;  %4014 = vst [vmem:[#allocation4_spill] sm:$0xff] %v1985_v17  ;;  %v1752_v19 = vld [vmem:[%s3937_s1 + $0x60] sm:$0xff]  ;;  %v1753_v20 = vld [vmem:[%s3937_s1 + $0x68] sm:$0xff] }
   0x7   :  { %v1754_v21 = vld [vmem:[%s3937_s1 + $0x70] sm:$0xff]  ;;  %v1755_v22 = vld [vmem:[%s3937_s1 + $0x78] sm:$0xff]  ;;  %v1756_v23 = vld [vmem:[%s3937_s1 + $0x80] sm:$0xff]  ;;  %4015 = vst [vmem:[#allocation5_spill] sm:$0xff] %v2073_v33 }
   0x8   :  { %v1757_v24 = vld [vmem:[%s3937_s1 + $0x88] sm:$0xff]  ;;  %v1758_v25 = vld [vmem:[%s3937_s1 + $0x90] sm:$0xff]  ;;  %v1759_v30 = vld [vmem:[%s3937_s1 + $0x98] sm:$0xff]  ;;  %4016 = vst [vmem:[#allocation6_spill] sm:$0xff] %v2076_v34 }
   0x9   :  { %4017 = vst [vmem:[#allocation7_spill] sm:$0xff] %v2087_v37  ;;  %v1760_v38 = vld [vmem:[%s3937_s1 + $0xa0] sm:$0xff]  ;;  %v1761_v43 = vld [vmem:[%s3937_s1 + $0xa8] sm:$0xff]  ;;  %v1762_v48 = vld [vmem:[%s3937_s1 + $0xb0] sm:$0xff] }
   0xa   :  { %71 = vrot.lane.b32.xlu0 %v1899_v5, %s1831_s9  ;;  %73 = vrot.lane.b32.xlu1 %v1904_v6, %s1831_s9  ;;  %v1763_v53 = vld [vmem:[%s3937_s1 + $0xb8] sm:$0xff]  ;;  %v1764_v56 = vld [vmem:[%s3937_s1 + $0xc0] sm:$0xff] }
   0xb   :  { %v1765_v61 = vld [vmem:[%s3937_s1 + $0xc8] sm:$0xff]  ;;  %v1766_v2 = vld [vmem:[%s3937_s1 + $0xd0] sm:$0xff] }
   0xe   :  { %91 = vrot.lane.b32.xlu0 %v1892_v4, %s1832_s14  ;;  %93 = vrot.lane.b32.xlu1 %v1899_v5, %s1832_s14 }
  0x12   :  { %95 = vrot.lane.b32.xlu0 %v1904_v6, %s1832_s14  ;;  %151 = vperm.xlu1 %1822, %v1743_v7  }
  0x16   :  { %114 = vrot.lane.b32.xlu0 %v1892_v4, %s1833_s17  ;;  %116 = vrot.lane.b32.xlu1 %v1899_v5, %s1833_s17 }
  0x1a   :  { %118 = vrot.lane.b32.xlu0 %v1904_v6, %s1833_s17  ;;  %164 = vperm.xlu1 %1822, %v1744_v8  }
  0x1e   :  { %137 = vrot.lane.b32.xlu0 %v1892_v4, %s1834_s20  ;;  %139 = vrot.lane.b32.xlu1 %v1899_v5, %s1834_s20 }
  0x22   :  { %141 = vrot.lane.b32.xlu0 %v1904_v6, %s1834_s20  ;;  %187 = vperm.xlu1 %1822, %v1745_v9  }
  0x26   :  { %210 = vperm.xlu0 %1821, %v1746_v10   ;;  %173 = vrot.lane.b32.xlu1 %v1892_v4, %s1835_s25  ;;  %v1767_v10 = vld [vmem:[%s3937_s1 + $0xd8] sm:$0xff] }
  0x2a   :  { %175 = vrot.lane.b32.xlu0 %v1899_v5, %s1835_s25  ;;  %177 = vrot.lane.b32.xlu1 %v1904_v6, %s1835_s25 }
  0x2e   :  { %233 = vperm.xlu0 %1821, %v1747_v11   ;;  %196 = vrot.lane.b32.xlu1 %v1892_v4, %s1836_s28 }
  0x32   :  { %198 = vrot.lane.b32.xlu0 %v1899_v5, %s1836_s28  ;;  %200 = vrot.lane.b32.xlu1 %v1904_v6, %s1836_s28 }
  0x36   :  { %256 = vperm.xlu0 %1821, %v1748_v12   ;;  %219 = vrot.lane.b32.xlu1 %v1892_v4, %s1837_s8 }
  0x3a   :  { %221 = vrot.lane.b32.xlu0 %v1899_v5, %s1837_s8  ;;  %223 = vrot.lane.b32.xlu1 %v1904_v6, %s1837_s8 }
  0x3e   :  { %281 = vperm.xlu0 %1821, %v1749_v13   ;;  %242 = vrot.lane.b32.xlu1 %v1892_v4, %s1838_s12 }
  0x42   :  { %244 = vrot.lane.b32.xlu0 %v1899_v5, %s1838_s12  ;;  %246 = vrot.lane.b32.xlu1 %v1904_v6, %s1838_s12 }
  0x46   :  { %303 = vperm.xlu0 %1821, %v1750_v15   ;;  %268 = vrot.lane.b32.xlu1 %v1974_v14, %s1831_s9 }
  0x4a   :  { %270 = vrot.lane.b32.xlu0 %v1982_v16, %s1831_s9  ;;  %272 = vrot.lane.b32.xlu1 %v1985_v17, %s1831_s9 }
  0x4e   :  { %325 = vperm.xlu0 %1821, %v1751_v18   ;;  %290 = vrot.lane.b32.xlu1 %v1974_v14, %s1832_s14  ;;  %v1768_v18 = vld [vmem:[%s3937_s1 + $0xe0] sm:$0xff] }
  0x52   :  { %292 = vrot.lane.b32.xlu0 %v1982_v16, %s1832_s14  ;;  %294 = vrot.lane.b32.xlu1 %v1985_v17, %s1832_s14 }
  0x56   :  { %347 = vperm.xlu0 %1821, %v1752_v19   ;;  %312 = vrot.lane.b32.xlu1 %v1974_v14, %s1833_s17  ;;  %v2221_v19 = vrot.slane %v1892_v4, 6 }
  0x58   :  { %4018 = vst [vmem:[#allocation8_spill] sm:$0xff] %v2221_v19 }
  0x5a   :  { %314 = vrot.lane.b32.xlu0 %v1982_v16, %s1833_s17  ;;  %316 = vrot.lane.b32.xlu1 %v1985_v17, %s1833_s17 }
  0x5e   :  { %360 = vperm.xlu0 %1821, %v1753_v20   ;;  %334 = vrot.lane.b32.xlu1 %v1974_v14, %s1834_s20 }
  0x62   :  { %336 = vrot.lane.b32.xlu0 %v1982_v16, %s1834_s20  ;;  %338 = vrot.lane.b32.xlu1 %v1985_v17, %s1834_s20 }
  0x66   :  { %382 = vperm.xlu0 %1821, %v1754_v21   ;;  %404 = vperm.xlu1 %1822, %v1755_v22   ;;  %v2228_v22 = vrot.slane %v1899_v5, 6 }
  0x68   :  { %4019 = vst [vmem:[#allocation9_spill] sm:$0xff] %v2228_v22 }
  0x6a   :  { %369 = vrot.lane.b32.xlu0 %v1974_v14, %s1835_s25  ;;  %371 = vrot.lane.b32.xlu1 %v1982_v16, %s1835_s25 }
  0x6e   :  { %373 = vrot.lane.b32.xlu0 %v1985_v17, %s1835_s25  ;;  %426 = vperm.xlu1 %1822, %v1756_v23   ;;  %v2233_v23 = vrot.slane %v1904_v6, 6 }
  0x70   :  { %4020 = vst [vmem:[#allocation10_spill] sm:$0xff] %v2233_v23 }
  0x72   :  { %391 = vrot.lane.b32.xlu0 %v1974_v14, %s1836_s28  ;;  %393 = vrot.lane.b32.xlu1 %v1982_v16, %s1836_s28 }
  0x76   :  { %395 = vrot.lane.b32.xlu0 %v1985_v17, %s1836_s28  ;;  %448 = vperm.xlu1 %1822, %v1757_v24  }
  0x7a   :  { %413 = vrot.lane.b32.xlu0 %v1974_v14, %s1837_s8  ;;  %415 = vrot.lane.b32.xlu1 %v1982_v16, %s1837_s8 }
  0x7d   :  { %v2049_v26 = vpop.permute.xlu1 %128  ;;  %v2051_v27 = vpop.permute.xlu0 %82 }
  0x7e   :  { %417 = vrot.lane.b32.xlu0 %v1985_v17, %s1837_s8  ;;  %473 = vperm.xlu1 %1822, %v1758_v25  }
  0x81   :  { %v2055_v28 = vpop.permute.xlu0 %105  ;;  %v2057_v29 = vpop.permute.xlu1 %69 }
  0x82   :  { %435 = vrot.lane.b32.xlu0 %v1974_v14, %s1838_s12  ;;  %437 = vrot.lane.b32.xlu1 %v1982_v16, %s1838_s12  ;;  %v1774_v14 = vld [vmem:[%s3937_s1 + $0x110] sm:$0xff] }
  0x85   :  { %v2066_v31 = vpop.permute.xlu0 %71  ;;  %v2068_v32 = vpop.permute.xlu1 %73 }
  0x86   :  { %439 = vrot.lane.b32.xlu0 %v1985_v17, %s1838_s12  ;;  %495 = vperm.xlu1 %1822, %v1759_v30   ;;  %v1769_v30 = vld [vmem:[%s3937_s1 + $0xe8] sm:$0xff] }
  0x89   :  { %v2078_v35 = vpop.permute.xlu0 %91  ;;  %v2080_v36 = vpop.permute.xlu1 %93 }
  0x8a   :  { %460 = vrot.lane.b32.xlu0 %v2073_v33, %s1831_s9  ;;  %462 = vrot.lane.b32.xlu1 %v2076_v34, %s1831_s9 }
  0x8d   :  { %v2092_v39 = vpop.permute.xlu0 %95  ;;  %v2094_v40 = vpop.permute.xlu1 %151 }
  0x8e   :  { %464 = vrot.lane.b32.xlu0 %v2087_v37, %s1831_s9  ;;  %517 = vperm.xlu1 %1822, %v1760_v38  }
  0x91   :  { %v2098_v41 = vpop.permute.xlu0 %114  ;;  %v2100_v42 = vpop.permute.xlu1 %116 }
  0x92   :  { %482 = vrot.lane.b32.xlu0 %v2073_v33, %s1832_s14  ;;  %484 = vrot.lane.b32.xlu1 %v2076_v34, %s1832_s14 }
  0x95   :  { %v2109_v44 = vpop.permute.xlu0 %118  ;;  %v2111_v45 = vpop.permute.xlu1 %164 }
  0x96   :  { %486 = vrot.lane.b32.xlu0 %v2087_v37, %s1832_s14  ;;  %539 = vperm.xlu1 %1822, %v1761_v43  }
  0x99   :  { %v2115_v46 = vpop.permute.xlu0 %137  ;;  %v2117_v47 = vpop.permute.xlu1 %139 }
  0x9a   :  { %504 = vrot.lane.b32.xlu0 %v2073_v33, %s1833_s17  ;;  %506 = vrot.lane.b32.xlu1 %v2076_v34, %s1833_s17 }
  0x9d   :  { %v2126_v49 = vpop.permute.xlu0 %141  ;;  %v2128_v50 = vpop.permute.xlu1 %187 }
  0x9e   :  { %508 = vrot.lane.b32.xlu0 %v2087_v37, %s1833_s17  ;;  %552 = vperm.xlu1 %1822, %v1762_v48  }
  0xa1   :  { %v2132_v51 = vpop.permute.xlu0 %210  ;;  %v2134_v52 = vpop.permute.xlu1 %173 }
  0xa2   :  { %526 = vrot.lane.b32.xlu0 %v2073_v33, %s1834_s20  ;;  %528 = vrot.lane.b32.xlu1 %v2076_v34, %s1834_s20 }
  0xa5   :  { %v2143_v54 = vpop.permute.xlu0 %175  ;;  %v2145_v55 = vpop.permute.xlu1 %177 }
  0xa6   :  { %530 = vrot.lane.b32.xlu0 %v2087_v37, %s1834_s20  ;;  %574 = vperm.xlu1 %1822, %v1763_v53  }
  0xa9   :  { %v2152_v57 = vpop.permute.xlu0 %233  ;;  %v2154_v58 = vpop.permute.xlu1 %196 }
  0xaa   :  { %596 = vperm.xlu0 %1821, %v1764_v56   ;;  %561 = vrot.lane.b32.xlu1 %v2073_v33, %s1835_s25  ;;  %v1770_v56 = vld [vmem:[%s3937_s1 + $0xf0] sm:$0xff] }
  0xad   :  { %v2158_v59 = vpop.permute.xlu0 %198  ;;  %v2160_v60 = vpop.permute.xlu1 %200 }
  0xae   :  { %563 = vrot.lane.b32.xlu0 %v2076_v34, %s1835_s25  ;;  %565 = vrot.lane.b32.xlu1 %v2087_v37, %s1835_s25 }
  0xb1   :  { %v2169_v62 = vpop.permute.xlu0 %256  ;;  %v2171_v63 = vpop.permute.xlu1 %219 }
  0xb2   :  { %618 = vperm.xlu0 %1821, %v1765_v61   ;;  %583 = vrot.lane.b32.xlu1 %v2073_v33, %s1836_s28 }
  0xb5   :  { %v2175_v0 = vpop.permute.xlu0 %221  ;;  %v2177_v1 = vpop.permute.xlu1 %223 }
  0xb6   :  { %585 = vrot.lane.b32.xlu0 %v2076_v34, %s1836_s28  ;;  %587 = vrot.lane.b32.xlu1 %v2087_v37, %s1836_s28 }
  0xb9   :  { %v2186_v3 = vpop.permute.xlu0 %281  ;;  %v2188_v7 = vpop.permute.xlu1 %242 }
  0xba   :  { %640 = vperm.xlu0 %1821, %v1766_v2   ;;  %605 = vrot.lane.b32.xlu1 %v2073_v33, %s1837_s8 }
  0xbd   :  { %v2192_v8 = vpop.permute.xlu0 %244  ;;  %v2194_v9 = vpop.permute.xlu1 %246 }
  0xbe   :  { %607 = vrot.lane.b32.xlu0 %v2076_v34, %s1837_s8  ;;  %609 = vrot.lane.b32.xlu1 %v2087_v37, %s1837_s8 }
  0xc1   :  { %v2203_v11 = vpop.permute.xlu0 %303  ;;  %v2205_v12 = vpop.permute.xlu1 %268 }
  0xc2   :  { %665 = vperm.xlu0 %1821, %v1767_v10   ;;  %627 = vrot.lane.b32.xlu1 %v2073_v33, %s1838_s12 }
  0xc5   :  { %v2209_v13 = vpop.permute.xlu0 %270  ;;  %v2211_v15 = vpop.permute.xlu1 %272 }
  0xc6   :  { %629 = vrot.lane.b32.xlu0 %v2076_v34, %s1838_s12  ;;  %631 = vrot.lane.b32.xlu1 %v2087_v37, %s1838_s12 }
  0xc9   :  { %v2223_v20 = vpop.permute.xlu0 %325  ;;  %v2225_v21 = vpop.permute.xlu1 %290 }
  0xca   :  { %687 = vperm.xlu0 %1821, %v1768_v18   ;;  %652 = vrot.lane.b32.xlu1 %v2221_v19, %s1831_s9 }
  0xcd   :  { %v2235_v24 = vpop.permute.xlu0 %292  ;;  %v2237_v25 = vpop.permute.xlu1 %294 }
  0xce   :  { %654 = vrot.lane.b32.xlu0 %v2228_v22, %s1831_s9  ;;  %656 = vrot.lane.b32.xlu1 %v2233_v23, %s1831_s9 }
  0xd1   :  { %v2246_v38 = vpop.permute.xlu0 %347  ;;  %v2248_v43 = vpop.permute.xlu1 %312 }
  0xd2   :  { %709 = vperm.xlu0 %1821, %v1769_v30   ;;  %674 = vrot.lane.b32.xlu1 %v2221_v19, %s1832_s14  ;;  %v1771_v30 = vld [vmem:[%s3937_s1 + $0xf8] sm:$0xff] }
  0xd5   :  { %v2252_v48 = vpop.permute.xlu0 %314  ;;  %v2254_v53 = vpop.permute.xlu1 %316 }
  0xd6   :  { %676 = vrot.lane.b32.xlu0 %v2228_v22, %s1832_s14  ;;  %678 = vrot.lane.b32.xlu1 %v2233_v23, %s1832_s14 }
  0xd9   :  { %v2263_v61 = vpop.permute.xlu0 %360  ;;  %v2265_v2 = vpop.permute.xlu1 %334 }
  0xda   :  { %4021 = vst [vmem:[#allocation11_spill] sm:$0xff] %v2263_v61  ;;  %731 = vperm.xlu0 %1821, %v1770_v56   ;;  %696 = vrot.lane.b32.xlu1 %v2221_v19, %s1833_s17 }
  0xdd   :  { %v2269_v10 = vpop.permute.xlu0 %336  ;;  %v2271_v18 = vpop.permute.xlu1 %338 }
  0xde   :  { %698 = vrot.lane.b32.xlu0 %v2228_v22, %s1833_s17  ;;  %700 = vrot.lane.b32.xlu1 %v2233_v23, %s1833_s17 }
  0xe1   :  { %v2280_v37 = vpop.permute.xlu0 %382  ;;  %v2282_v56 = vpop.permute.xlu1 %404 }
  0xe2   :  { %4022 = vst [vmem:[#allocation12_spill] sm:$0xff] %v2280_v37  ;;  %4023 = vst [vmem:[#allocation13_spill] sm:$0xff] %v2282_v56  ;;  %744 = vperm.xlu0 %1821, %v1771_v30   ;;  %718 = vrot.lane.b32.xlu1 %v2221_v19, %s1834_s20  ;;  %v1772_v37 = vld [vmem:[%s3937_s1 + $0x100] sm:$0xff]  ;;  %v1773_v30 = vld [vmem:[%s3937_s1 + $0x108] sm:$0xff] }
  0xe5   :  { %v2286_v34 = vpop.permute.xlu0 %369  ;;  %v2288_v33 = vpop.permute.xlu1 %371 }
  0xe6   :  { %4024 = vst [vmem:[#allocation14_spill] sm:$0xff] %v2286_v34  ;;  %4025 = vst [vmem:[#allocation15_spill] sm:$0xff] %v2288_v33  ;;  %720 = vrot.lane.b32.xlu0 %v2228_v22, %s1834_s20  ;;  %722 = vrot.lane.b32.xlu1 %v2233_v23, %s1834_s20 }
  0xe9   :  { %v2300_v56 = vpop.permute.xlu0 %373  ;;  %v2302_v17 = vpop.permute.xlu1 %426 }
  0xea   :  { %4026 = vst [vmem:[#allocation16_spill] sm:$0xff] %v2300_v56  ;;  %4027 = vst [vmem:[#allocation17_spill] sm:$0xff] %v2302_v17  ;;  %766 = vperm.xlu0 %1821, %v1772_v37   ;;  %788 = vperm.xlu1 %1822, %v1773_v30   ;;  %v1775_v17 = vld [vmem:[%s3937_s1 + $0x118] sm:$0xff] }
  0xed   :  { %v2304_v16 = vpop.permute.xlu0 %391  ;;  %v2306_v61 = vpop.permute.xlu1 %393 }
  0xee   :  { %4028 = vst [vmem:[#allocation18_spill] sm:$0xff] %v2304_v16  ;;  %4029 = vst [vmem:[#allocation19_spill] sm:$0xff] %v2306_v61  ;;  %753 = vrot.lane.b32.xlu0 %v2221_v19, %s1835_s25  ;;  %755 = vrot.lane.b32.xlu1 %v2228_v22, %s1835_s25 }
  0xf1   :  { %v2315_v34 = vpop.permute.xlu0 %395  ;;  %v2317_v56 = vpop.permute.xlu1 %448 }
  0xf2   :  { %4030 = vst [vmem:[#allocation20_spill] sm:$0xff] %v2315_v34  ;;  %4031 = vst [vmem:[#allocation21_spill] sm:$0xff] %v2317_v56  ;;  %757 = vrot.lane.b32.xlu0 %v2233_v23, %s1835_s25  ;;  %810 = vperm.xlu1 %1822, %v1774_v14  }
  0xf5   :  { %v2321_v37 = vpop.permute.xlu0 %413  ;;  %v2323_v30 = vpop.permute.xlu1 %415 }
  0xf6   :  { %4032 = vst [vmem:[#allocation22_spill] sm:$0xff] %v2321_v37  ;;  %4033 = vst [vmem:[#allocation23_spill] sm:$0xff] %v2323_v30  ;;  %775 = vrot.lane.b32.xlu0 %v2221_v19, %s1836_s28  ;;  %777 = vrot.lane.b32.xlu1 %v2228_v22, %s1836_s28 }
  0xf9   :  { %v2332_v34 = vpop.permute.xlu0 %417  ;;  %v2334_v56 = vpop.permute.xlu1 %473 }
  0xfa   :  { %4034 = vst [vmem:[#allocation24_spill] sm:$0xff] %v2332_v34  ;;  %4035 = vst [vmem:[#allocation25_spill] sm:$0xff] %v2334_v56  ;;  %779 = vrot.lane.b32.xlu0 %v2233_v23, %s1836_s28  ;;  %832 = vperm.xlu1 %1822, %v1775_v17  }
  0xfd   :  { %v2338_v14 = vpop.permute.xlu0 %435  ;;  %v2340_v37 = vpop.permute.xlu1 %437 }
  0xfe   :  { %4036 = vst [vmem:[#allocation26_spill] sm:$0xff] %v2338_v14  ;;  %4037 = vst [vmem:[#allocation27_spill] sm:$0xff] %v2340_v37  ;;  %797 = vrot.lane.b32.xlu0 %v2221_v19, %s1837_s8  ;;  %799 = vrot.lane.b32.xlu1 %v2228_v22, %s1837_s8 }
 0x101   :  { %v2346_v30 = vpop.permute.xlu0 %439  ;;  %v2348_v16 = vpop.permute.xlu1 %495 }
 0x102   :  { %4038 = vst [vmem:[#allocation28_spill] sm:$0xff] %v2346_v30  ;;  %4039 = vst [vmem:[#allocation29_spill] sm:$0xff] %v2348_v16  ;;  %801 = vrot.lane.b32.xlu0 %v2233_v23, %s1837_s8  ;;  %819 = vrot.lane.b32.xlu1 %v2221_v19, %s1838_s12  ;;  %v842_v16 = vld [vmem:[%s3939_s4] sm:$0xff] }
 0x105   :  { %v2354_v17 = vpop.permute.xlu0 %460  ;;  %v2356_v56 = vpop.permute.xlu1 %462 }
 0x106   :  { %4040 = vst [vmem:[#allocation30_spill] sm:$0xff] %v2354_v17  ;;  %4041 = vst [vmem:[#allocation31_spill] sm:$0xff] %v2356_v56  ;;  %821 = vrot.lane.b32.xlu0 %v2228_v22, %s1838_s12  ;;  %823 = vrot.lane.b32.xlu1 %v2233_v23, %s1838_s12 }
 0x109   :  { %v2365_v30 = vpop.permute.xlu0 %464  ;;  %v2367_v14 = vpop.permute.xlu1 %517 }
 0x10a   :  { %4042 = vst [vmem:[#allocation32_spill] sm:$0xff] %v2365_v30  ;;  %4043 = vst [vmem:[#allocation33_spill] sm:$0xff] %v2367_v14  ;;  %899 = vperm.xlu1 %1822, %v842_v16   ;;  %v3983_v16 = vlaneseq }
 0x10d   :  { %v2369_v19 = vpop.permute.xlu0 %482  ;;  %v2371_v17 = vpop.permute.xlu1 %484 }
 0x10e   :  { %4044 = vst [vmem:[#allocation34_spill] sm:$0xff] %v2369_v19  ;;  %4045 = vst [vmem:[#allocation35_spill] sm:$0xff] %v2371_v17 }
 0x111   :  { %v2373_v56 = vpop.permute.xlu0 %486  ;;  %v2375_v37 = vpop.permute.xlu1 %539 }
 0x112   :  { %4046 = vst [vmem:[#allocation36_spill] sm:$0xff] %v2373_v56  ;;  %4047 = vst [vmem:[#allocation37_spill] sm:$0xff] %v2375_v37  ;;  %v2394_v56 = vand.u32 127, %v3983_v16 }
 0x114   :  { %vm97_vm0 = vcmp.lt.s32.totalorder %v2394_v56, 18  ;;  %vm75_vm1 = vcmp.lt.s32.totalorder %v2394_v56, 19  ;;  %vm3996_vm2 = vcmp.lt.s32.totalorder %v2394_v56, 17  ;;  %vm3995_vm3 = vcmp.lt.s32.totalorder %v2394_v56, 1 }
 0x115   :  { %v2377_v22 = vpop.permute.xlu0 %504  ;;  %v2379_v23 = vpop.permute.xlu1 %506  ;;  %v99_v16 = vsel %vm97_vm0, %v2078_v35, %v2080_v36  ;;  %vm179_vm4 = vcmp.lt.s32.totalorder %v2394_v56, 127  ;;  %vm3997_vm5 = vcmp.lt.s32.totalorder %v2394_v56, 111  ;;  %vm225_vm6 = vcmp.lt.s32.totalorder %v2394_v56, 110 }
 0x116   :  { %4048 = vst [vmem:[#allocation38_spill] sm:$0xff] %v2377_v22  ;;  %4049 = vst [vmem:[#allocation39_spill] sm:$0xff] %v2379_v23  ;;  %vm248_vm7 = vcmp.lt.s32.totalorder %v2394_v56, 109 }
 0x119   :  { %v2381_v34 = vpop.permute.xlu0 %508  ;;  %v2383_v61 = vpop.permute.xlu1 %552 }
 0x11a   :  { %4050 = vst [vmem:[#allocation40_spill] sm:$0xff] %v2381_v34  ;;  %4051 = vst [vmem:[#allocation41_spill] sm:$0xff] %v2383_v61  ;;  %v100_v61 = vsel %vm97_vm0, %v2092_v39, %v2078_v35  ;;  %v123_v35 = vsel %vm3996_vm2, %v2109_v44, %v2098_v41 }
 0x11d   :  { %v2385_v30 = vpop.permute.xlu0 %526  ;;  %v2387_v14 = vpop.permute.xlu1 %528 }
 0x11e   :  { %4052 = vst [vmem:[#allocation42_spill] sm:$0xff] %v2385_v30  ;;  %4053 = vst [vmem:[#allocation43_spill] sm:$0xff] %v2387_v14 }
 0x121   :  { %v2389_v19 = vpop.permute.xlu0 %530  ;;  %v2391_v17 = vpop.permute.xlu1 %574 }
 0x122   :  { %4054 = vst [vmem:[#allocation44_spill] sm:$0xff] %v2389_v19  ;;  %4055 = vst [vmem:[#allocation45_spill] sm:$0xff] %v2391_v17  ;;  %v109_v19 = vmul.f32 %v2055_v28, %v99_v16 }
 0x125   :  { %v2396_v37 = vpop.permute.xlu0 %596  ;;  %v2398_v22 = vpop.permute.xlu1 %561 }
 0x126   :  { %4056 = vst [vmem:[#allocation46_spill] sm:$0xff] %v2396_v37  ;;  %4057 = vst [vmem:[#allocation47_spill] sm:$0xff] %v2398_v22  ;;  %v98_v37 = vsel %vm97_vm0, %v2080_v36, %v2092_v39  ;;  %v77_v22 = vsel %vm75_vm1, %v2057_v29, %v2066_v31  ;;  %v76_v36 = vsel %vm75_vm1, %v2066_v31, %v2068_v32 }
 0x127   :  { %v108_v39 = vmul.f32 %v2055_v28, %v100_v61  ;;  %v110_v30 = vmul.f32 %v2055_v28, %v98_v37  ;;  %v146_v31 = vsel %vm3995_vm3, %v2126_v49, %v2115_v46  ;;  %v144_v28 = vsel %vm3995_vm3, %v2117_v47, %v2126_v49 }
 0x128   :  { %v86_v37 = vmul.f32 %v2051_v27, %v77_v22  ;;  %v87_v16 = vmul.f32 %v2051_v27, %v76_v36  ;;  %v154_v23 = vmul.f32 %v2094_v40, %v146_v31  ;;  %v181_v36 = vsel %vm179_vm4, %v2134_v52, %v2143_v54 }
 0x129   :  { %v2407_v14 = vpop.permute.xlu0 %563  ;;  %v2417_v17 = vpop.permute.xlu1 %565  ;;  %v168_v31 = vmul.f32 %v2111_v45, %v1899_v5  ;;  %v227_v5 = vsel %vm225_vm6, %v2171_v63, %v2175_v0 }
 0x12a   :  { %4058 = vst [vmem:[#allocation48_spill] sm:$0xff] %v2407_v14  ;;  %4059 = vst [vmem:[#allocation49_spill] sm:$0xff] %v2417_v17  ;;  %v78_v14 = vsel %vm75_vm1, %v2068_v32, %v2057_v29  ;;  %v122_v17 = vsel %vm3996_vm2, %v2098_v41, %v2100_v42  ;;  %v121_v29 = vsel %vm3996_vm2, %v2100_v42, %v2109_v44 }
 0x12b   :  { %v85_v61 = vmul.f32 %v2051_v27, %v78_v14  ;;  %v131_v41 = vmul.f32 %v2049_v26, %v123_v35  ;;  %v145_v42 = vsel %vm3995_vm3, %v2115_v46, %v2117_v47  ;;  %v132_v14 = vmul.f32 %v2049_v26, %v122_v17 }
 0x12c   :  { %v133_v35 = vmul.f32 %v2049_v26, %v121_v29  ;;  %v112_v46 = vadd.f32 %v109_v19, %v86_v37  ;;  %v113_v34 = vadd.f32 %v110_v30, %v87_v16  ;;  %v155_v33 = vmul.f32 %v2094_v40, %v145_v42 }
 0x12d   :  { %v2451_v32 = vpop.permute.xlu0 %618  ;;  %v2463_v44 = vpop.permute.xlu1 %583  ;;  %v156_v47 = vmul.f32 %v2094_v40, %v144_v28  ;;  %v180_v40 = vsel %vm179_vm4, %v2143_v54, %v2145_v55  ;;  %v167_v54 = vmul.f32 %v2111_v45, %v1892_v4  ;;  %v205_v4 = vsel %vm3997_vm5, %v2160_v60, %v2154_v58 }
 0x12e   :  { %4060 = vst [vmem:[#allocation50_spill] sm:$0xff] %v2451_v32  ;;  %v111_v32 = vadd.f32 %v108_v39, %v85_v61  ;;  %v135_v17 = vadd.f32 %v132_v14, %v112_v46  ;;  %v136_v26 = vadd.f32 %v133_v35, %v113_v34  ;;  %v182_v34 = vsel %vm179_vm4, %v2145_v55, %v2134_v52 }
 0x12f   :  { %v203_v52 = vsel %vm3997_vm5, %v2158_v59, %v2160_v60  ;;  %v191_v61 = vmul.f32 %v2128_v50, %v180_v40  ;;  %v236_v14 = vmul.f32 %v2152_v57, %v227_v5 }
 0x130   :  { %v134_v22 = vadd.f32 %v131_v41, %v111_v32  ;;  %v158_v30 = vadd.f32 %v155_v33, %v135_v17  ;;  %v159_v39 = vadd.f32 %v156_v47, %v136_v26  ;;  %v190_v33 = vmul.f32 %v2128_v50, %v181_v36 }
 0x131   :  { %v2473_v49 = vpop.permute.xlu0 %585  ;;  %v2476_v27 = vpop.permute.xlu1 %587  ;;  %v169_v32 = vmul.f32 %v2111_v45, %v1904_v6  ;;  %v226_v6 = vsel %vm225_vm6, %v2175_v0, %v2177_v1  ;;  %v214_v37 = vmul.f32 %v2132_v51, %v203_v52  ;;  %v250_v0 = vsel %vm248_vm7, %v2188_v7, %v2192_v8 }
 0x132   :  { %v157_v19 = vadd.f32 %v154_v23, %v134_v22  ;;  %v204_v23 = vsel %vm3997_vm5, %v2154_v58, %v2158_v59  ;;  %v192_v59 = vmul.f32 %v2128_v50, %v182_v34  ;;  %v171_v45 = vadd.f32 %v168_v31, %v158_v30 }
 0x133   :  { %v213_v42 = vmul.f32 %v2132_v51, %v204_v23  ;;  %v172_v28 = vadd.f32 %v169_v32, %v159_v39  ;;  %v228_v58 = vsel %vm225_vm6, %v2177_v1, %v2171_v63  ;;  %v215_v50 = vmul.f32 %v2132_v51, %v205_v4 }
 0x134   :  { %v170_v41 = vadd.f32 %v167_v54, %v157_v19  ;;  %v194_v46 = vadd.f32 %v191_v61, %v171_v45  ;;  %v237_v47 = vmul.f32 %v2152_v57, %v226_v6  ;;  %v249_v63 = vsel %vm248_vm7, %v2192_v8, %v2194_v9 }
 0x135   :  { %v2496_v29 = vpop.permute.xlu0 %640  ;;  %v2507_v55 = vpop.permute.xlu1 %605  ;;  %v195_v1 = vadd.f32 %v192_v59, %v172_v28  ;;  %v238_v51 = vmul.f32 %v2152_v57, %v228_v58  ;;  %v251_v17 = vsel %vm248_vm7, %v2194_v9, %v2188_v7  ;;  %v259_v36 = vmul.f32 %v2169_v62, %v250_v0 }
 0x136   :  { %v193_v16 = vadd.f32 %v190_v33, %v170_v41  ;;  %v217_v26 = vadd.f32 %v214_v37, %v194_v46  ;;  %v275_v19 = vsel %vm75_vm1, %v2205_v12, %v2209_v13  ;;  %v276_v8 = vsel %vm75_vm1, %v2211_v15, %v2205_v12 }
 0x137   :  { %v218_v57 = vadd.f32 %v215_v50, %v195_v1  ;;  %v260_v39 = vmul.f32 %v2169_v62, %v249_v63  ;;  %v274_v7 = vsel %vm75_vm1, %v2209_v13, %v2211_v15  ;;  %v261_v23 = vmul.f32 %v2169_v62, %v251_v17  ;;  %v4062_v17 = vld [vmem:[#allocation14_spill] sm:$0xff] }
 0x138   :  { %v216_v22 = vadd.f32 %v213_v42, %v193_v16  ;;  %v240_v34 = vadd.f32 %v237_v47, %v217_v26  ;;  %v297_v12 = vsel %vm97_vm0, %v2225_v21, %v2235_v24  ;;  %v298_v54 = vsel %vm97_vm0, %v2237_v25, %v2225_v21 }
 0x139   :  { %v2531_v60 = vpop.permute.xlu0 %607  ;;  %v2539_v35 = vpop.permute.xlu1 %609  ;;  %v241_v31 = vadd.f32 %v238_v51, %v218_v57  ;;  %v285_v33 = vmul.f32 %v2186_v3, %v275_v19  ;;  %v284_v13 = vmul.f32 %v2186_v3, %v276_v8  ;;  %v296_v62 = vsel %vm97_vm0, %v2235_v24, %v2237_v25  ;;  %v4064_v57 = vld [vmem:[#allocation2_spill] sm:$0xff] }
 0x13a   :  { %v239_v30 = vadd.f32 %v236_v14, %v216_v22  ;;  %v286_v52 = vmul.f32 %v2186_v3, %v274_v7  ;;  %v319_v32 = vsel %vm3996_vm2, %v2248_v43, %v2252_v48  ;;  %v320_v21 = vsel %vm3996_vm2, %v2254_v53, %v2248_v43  ;;  %v4066_v7 = vld [vmem:[#allocation3_spill] sm:$0xff] }
 0x13b   :  { %v263_v4 = vadd.f32 %v260_v39, %v240_v34  ;;  %v307_v5 = vmul.f32 %v2203_v11, %v297_v12  ;;  %v306_v24 = vmul.f32 %v2203_v11, %v298_v54  ;;  %v318_v3 = vsel %vm3996_vm2, %v2252_v48, %v2254_v53  ;;  %v4067_v12 = vld [vmem:[#allocation19_spill] sm:$0xff]  ;;  %v4068_v54 = vld [vmem:[#allocation18_spill] sm:$0xff] }
 0x13c   :  { %v262_v15 = vadd.f32 %v259_v36, %v239_v30  ;;  %v264_v41 = vadd.f32 %v261_v23, %v241_v31  ;;  %v308_v59 = vmul.f32 %v2203_v11, %v296_v62  ;;  %v341_v43 = vsel %vm3995_vm3, %v2265_v2, %v2269_v10  ;;  %v4063_v36 = vld [vmem:[#allocation16_spill] sm:$0xff]  ;;  %v4065_v30 = vld [vmem:[#allocation11_spill] sm:$0xff] }
 0x13d   :  { %v2560_v40 = vpop.permute.xlu0 %665  ;;  %v2567_v9 = vpop.permute.xlu1 %627  ;;  %v342_v42 = vsel %vm3995_vm3, %v2271_v18, %v2265_v2  ;;  %v288_v6 = vadd.f32 %v285_v33, %v263_v4  ;;  %v329_v28 = vmul.f32 %v2223_v20, %v319_v32  ;;  %v328_v48 = vmul.f32 %v2223_v20, %v320_v21  ;;  %v4069_v33 = vld [vmem:[#allocation20_spill] sm:$0xff] }
 0x13e   :  { %v287_v45 = vadd.f32 %v284_v13, %v262_v15  ;;  %v289_v53 = vadd.f32 %v286_v52, %v264_v41  ;;  %v330_v37 = vmul.f32 %v2223_v20, %v318_v3  ;;  %v340_v11 = vsel %vm3995_vm3, %v2269_v10, %v2271_v18  ;;  %v4061_v18 = vld [vmem:[#allocation15_spill] sm:$0xff]  ;;  %v4070_v62 = vld [vmem:[#allocation4_spill] sm:$0xff] }
 0x13f   :  { %v310_v16 = vadd.f32 %v307_v5, %v288_v6  ;;  %v351_v2 = vmul.f32 %v2246_v38, %v341_v43  ;;  %v350_v14 = vmul.f32 %v2246_v38, %v342_v42  ;;  %v352_v20 = vmul.f32 %v2246_v38, %v340_v11  ;;  %v4071_v52 = vld [vmem:[#allocation12_spill] sm:$0xff]  ;;  %v4073_v43 = vld [vmem:[#allocation22_spill] sm:$0xff] }
 0x140   :  { %v309_v50 = vadd.f32 %v306_v24, %v287_v45  ;;  %v311_v46 = vadd.f32 %v308_v59, %v289_v53  ;;  %v376_v26 = vsel %vm179_vm4, %v4062_v17, %v4061_v18  ;;  %v375_v19 = vsel %vm179_vm4, %v4061_v18, %v4063_v36  ;;  %v4072_v59 = vld [vmem:[#allocation23_spill] sm:$0xff]  ;;  %v4074_v45 = vld [vmem:[#allocation13_spill] sm:$0xff]  ;;  %v4075_v53 = vld [vmem:[#allocation24_spill] sm:$0xff] }
 0x141   :  { %v2593_v61 = vpop.permute.xlu0 %629  ;;  %v2601_v25 = vpop.permute.xlu1 %631  ;;  %v332_v47 = vadd.f32 %v329_v28, %v310_v16  ;;  %v363_v38 = vmul.f32 %v4065_v30, %v4064_v57  ;;  %v377_v39 = vsel %vm179_vm4, %v4063_v36, %v4062_v17  ;;  %v364_v34 = vmul.f32 %v4065_v30, %v4066_v7  ;;  %v4077_v18 = vld [vmem:[#allocation27_spill] sm:$0xff]  ;;  %v4078_v17 = vld [vmem:[#allocation26_spill] sm:$0xff] }
 0x142   :  { %v331_v63 = vadd.f32 %v328_v48, %v309_v50  ;;  %v333_v1 = vadd.f32 %v330_v37, %v311_v46  ;;  %v398_v31 = vsel %vm3997_vm5, %v4068_v54, %v4067_v12  ;;  %v397_v13 = vsel %vm3997_vm5, %v4067_v12, %v4069_v33 }
 0x143   :  { %v354_v51 = vadd.f32 %v351_v2, %v332_v47  ;;  %v365_v15 = vmul.f32 %v4065_v30, %v4070_v62  ;;  %v385_v32 = vmul.f32 %v4071_v52, %v376_v26  ;;  %v386_v21 = vmul.f32 %v4071_v52, %v375_v19  ;;  %v4076_v47 = vld [vmem:[#allocation17_spill] sm:$0xff]  ;;  %v4079_v30 = vld [vmem:[#allocation28_spill] sm:$0xff] }
 0x144   :  { %v353_v10 = vadd.f32 %v350_v14, %v331_v63  ;;  %v355_v23 = vadd.f32 %v352_v20, %v333_v1  ;;  %v399_v4 = vsel %vm3997_vm5, %v4069_v33, %v4068_v54  ;;  %v387_v41 = vmul.f32 %v4071_v52, %v377_v39  ;;  %v4082_v62 = vld [vmem:[#allocation32_spill] sm:$0xff] }
 0x145   :  { %v2619_v58 = vpop.permute.xlu0 %687  ;;  %v2623_v0 = vpop.permute.xlu1 %652  ;;  %v367_v3 = vadd.f32 %v364_v34, %v354_v51  ;;  %v420_v42 = vsel %vm225_vm6, %v4073_v43, %v4072_v59  ;;  %v407_v28 = vmul.f32 %v4074_v45, %v398_v31  ;;  %v408_v48 = vmul.f32 %v4074_v45, %v397_v13  ;;  %v4080_v31 = vld [vmem:[#allocation21_spill] sm:$0xff]  ;;  %v4081_v13 = vld [vmem:[#allocation30_spill] sm:$0xff] }
 0x146   :  { %v366_v24 = vadd.f32 %v363_v38, %v353_v10  ;;  %v419_v37 = vsel %vm225_vm6, %v4072_v59, %v4075_v53  ;;  %v421_v11 = vsel %vm225_vm6, %v4075_v53, %v4073_v43  ;;  %v368_v16 = vadd.f32 %v365_v15, %v355_v23  ;;  %v4086_v53 = vld [vmem:[#allocation25_spill] sm:$0xff] }
 0x147   :  { %v409_v50 = vmul.f32 %v4074_v45, %v399_v4  ;;  %v2683_v2 = vadd.s32 128, %v2394_v56  ;;  %v389_v46 = vadd.f32 %v386_v21, %v367_v3  ;;  %v429_v63 = vmul.f32 %v4076_v47, %v420_v42  ;;  %v4084_v42 = vld [vmem:[#allocation34_spill] sm:$0xff]  ;;  %v4085_v45 = vld [vmem:[#allocation36_spill] sm:$0xff] }
 0x148   :  { %v388_v14 = vadd.f32 %v385_v32, %v366_v24  ;;  %v390_v1 = vadd.f32 %v387_v41, %v368_v16  ;;  %v430_v51 = vmul.f32 %v4076_v47, %v419_v37  ;;  %v431_v10 = vmul.f32 %v4076_v47, %v421_v11  ;;  %v4083_v24 = vld [vmem:[#allocation31_spill] sm:$0xff] }
 0x149   :  { %v2626_v22 = vpop.permute.xlu0 %654  ;;  %v2636_v8 = vpop.permute.xlu1 %656  ;;  %v442_v26 = vsel %vm248_vm7, %v4078_v17, %v4077_v18  ;;  %v411_v57 = vadd.f32 %v408_v48, %v389_v46  ;;  %v441_v38 = vsel %vm248_vm7, %v4077_v18, %v4079_v30  ;;  %v2701_v39 = vadd.s32 256, %v2394_v56  ;;  %v4087_v11 = vld [vmem:[#allocation35_spill] sm:$0xff] }
 0x14a   :  { %v410_v19 = vadd.f32 %v407_v28, %v388_v14  ;;  %v412_v7 = vadd.f32 %v409_v50, %v390_v1  ;;  %v443_v34 = vsel %vm248_vm7, %v4079_v30, %v4078_v17  ;;  %v33_v23 = vmul.u32 456, %v2394_v56  ;;  %v4088_v1 = vld [vmem:[#allocation38_spill] sm:$0xff]  ;;  %v4091_v30 = vld [vmem:[#allocation39_spill] sm:$0xff] }
 0x14b   :  { %v34_v12 = vmul.u32 456, %v2683_v2  ;;  %v451_v33 = vmul.f32 %v4080_v31, %v442_v26  ;;  %v468_v15 = vsel %vm75_vm1, %v4082_v62, %v4081_v13  ;;  %v433_v32 = vadd.f32 %v430_v51, %v411_v57  ;;  %v4089_v51 = vld [vmem:[#allocation40_spill] sm:$0xff] }
 0x14c   :  { %v432_v54 = vadd.f32 %v429_v63, %v410_v19  ;;  %v434_v21 = vadd.f32 %v431_v10, %v412_v7  ;;  %v452_v4 = vmul.f32 %v4080_v31, %v441_v38  ;;  %v467_v3 = vsel %vm75_vm1, %v4081_v13, %v4083_v24  ;;  %v4090_v19 = vld [vmem:[#allocation29_spill] sm:$0xff] }
 0x14d   :  { %v2662_v5 = vpop.permute.xlu0 %709  ;;  %v2669_v6 = vpop.permute.xlu1 %674  ;;  %v453_v59 = vmul.f32 %v4080_v31, %v443_v34  ;;  %v466_v43 = vsel %vm75_vm1, %v4083_v24, %v4082_v62  ;;  %v490_v28 = vsel %vm97_vm0, %v4085_v45, %v4084_v42  ;;  %v35_v48 = vmul.u32 456, %v2701_v39  ;;  %v4093_v31 = vld [vmem:[#allocation44_spill] sm:$0xff] }
 0x14e   :  { %v476_v37 = vmul.f32 %v4086_v53, %v468_v15  ;;  %v489_v16 = vsel %vm97_vm0, %v4084_v42, %v4087_v11  ;;  %v2738_v50 = vshra.s32 %v33_v23, 13  ;;  %v2740_v14 = vshra.s32 %v34_v12, 13  ;;  %v4094_v15 = vld [vmem:[#allocation33_spill] sm:$0xff] }
 0x14f   :  { %v454_v46 = vadd.f32 %v451_v33, %v432_v54  ;;  %v477_v47 = vmul.f32 %v4086_v53, %v467_v3  ;;  %v488_v63 = vsel %vm97_vm0, %v4087_v11, %v4085_v45  ;;  %v512_v10 = vsel %vm3996_vm2, %v4089_v51, %v4088_v1  ;;  %v4092_v54 = vld [vmem:[#allocation42_spill] sm:$0xff] }
 0x150   :  { %v455_v17 = vadd.f32 %v452_v4, %v433_v32  ;;  %v478_v26 = vmul.f32 %v4086_v53, %v466_v43  ;;  %v498_v57 = vmul.f32 %v4090_v19, %v490_v28  ;;  %v511_v38 = vsel %vm3996_vm2, %v4088_v1, %v4091_v30  ;;  %v4095_v4 = vld [vmem:[#allocation43_spill] sm:$0xff] }
 0x151   :  { %v2686_v20 = vpop.permute.xlu0 %676  ;;  %v2694_v36 = vpop.permute.xlu1 %678  ;;  %v456_v34 = vadd.f32 %v453_v59, %v434_v21  ;;  %v499_v23 = vmul.f32 %v4090_v19, %v489_v16  ;;  %v510_v12 = vsel %vm3996_vm2, %v4091_v30, %v4089_v51  ;;  %v534_v33 = vsel %vm3995_vm3, %v4093_v31, %v4092_v54 }
 0x152   :  { %v479_v13 = vadd.f32 %v476_v37, %v454_v46  ;;  %v500_v62 = vmul.f32 %v4090_v19, %v488_v63  ;;  %v520_v32 = vmul.f32 %v4094_v15, %v512_v10  ;;  %v533_v21 = vsel %vm3995_vm3, %v4092_v54, %v4095_v4  ;;  %v4096_v37 = vld [vmem:[#allocation37_spill] sm:$0xff]  ;;  %v4098_v19 = vld [vmem:[#allocation47_spill] sm:$0xff] }
 0x153   :  { %v480_v24 = vadd.f32 %v477_v47, %v455_v17  ;;  %v521_v3 = vmul.f32 %v4094_v15, %v511_v38  ;;  %v532_v59 = vsel %vm3995_vm3, %v4095_v4, %v4093_v31  ;;  %v2783_v42 = vshra.s32 %v35_v48, 13  ;;  %v4097_v48 = vld [vmem:[#allocation48_spill] sm:$0xff] }
 0x154   :  { %v481_v45 = vadd.f32 %v478_v26, %v456_v34  ;;  %v501_v28 = vadd.f32 %v498_v57, %v479_v13  ;;  %v522_v53 = vmul.f32 %v4094_v15, %v510_v12  ;;  %v542_v11 = vmul.f32 %v4096_v37, %v534_v33  ;;  %v4100_v33 = vld [vmem:[#allocation5_spill] sm:$0xff] }
 0x155   :  { %v2714_v52 = vpop.permute.xlu0 %731  ;;  %v2721_v41 = vpop.permute.xlu1 %696  ;;  %v502_v46 = vadd.f32 %v499_v23, %v480_v24  ;;  %v543_v47 = vmul.f32 %v4096_v37, %v533_v21  ;;  %v39_v63 = vmul.u32 18, %v2738_v50  ;;  %v544_v10 = vmul.f32 %v4096_v37, %v532_v59  ;;  %v4099_v23 = vld [vmem:[#allocation49_spill] sm:$0xff]  ;;  %v4104_v37 = vld [vmem:[#allocation7_spill] sm:$0xff] }
 0x156   :  { %v503_v1 = vadd.f32 %v500_v62, %v481_v45  ;;  %v523_v51 = vadd.f32 %v520_v32, %v501_v28  ;;  %v568_v26 = vsel %vm179_vm4, %v4098_v19, %v4097_v48  ;;  %v40_v30 = vmul.u32 18, %v2740_v14  ;;  %v4101_v13 = vld [vmem:[#allocation41_spill] sm:$0xff]  ;;  %v4103_v28 = vld [vmem:[#allocation6_spill] sm:$0xff] }
 0x157   :  { %v524_v17 = vadd.f32 %v521_v3, %v502_v46  ;;  %v567_v12 = vsel %vm179_vm4, %v4097_v48, %v4099_v23  ;;  %v41_v31 = vmul.u32 18, %v2783_v42  ;;  %v555_v62 = vmul.f32 %v4101_v13, %v4100_v33  ;;  %v4102_v24 = vld [vmem:[#allocation45_spill] sm:$0xff]  ;;  %v4106_v33 = vld [vmem:[#allocation50_spill] sm:$0xff] }
 0x158   :  { %v525_v38 = vadd.f32 %v522_v53, %v503_v1  ;;  %v545_v34 = vadd.f32 %v542_v11, %v523_v51  ;;  %v569_v32 = vsel %vm179_vm4, %v4099_v23, %v4098_v19  ;;  %v2813_v4 = vsub.s32 %v2394_v56, %v39_v63  ;;  %v4105_v19 = vld [vmem:[#allocation46_spill] sm:$0xff] }
 0x159   :  { %v2751_v18 = vpop.permute.xlu0 %698  ;;  %v2759_v7 = vpop.permute.xlu1 %700  ;;  %v546_v15 = vadd.f32 %v543_v47, %v524_v17  ;;  %v577_v3 = vmul.f32 %v4102_v24, %v568_v26  ;;  %v590_v59 = vsel %vm3997_vm5, %v2463_v44, %v2473_v49  ;;  %v589_v45 = vsel %vm3997_vm5, %v2473_v49, %v2476_v27 }
 0x15a   :  { %v547_v21 = vadd.f32 %v544_v10, %v525_v38  ;;  %v556_v53 = vmul.f32 %v4101_v13, %v4103_v28  ;;  %v557_v11 = vmul.f32 %v4101_v13, %v4104_v37  ;;  %v578_v46 = vmul.f32 %v4102_v24, %v567_v12 }
 0x15b   :  { %v591_v47 = vsel %vm3997_vm5, %v2476_v27, %v2463_v44  ;;  %v558_v1 = vadd.f32 %v555_v62, %v545_v34  ;;  %v579_v51 = vmul.f32 %v4102_v24, %v569_v32  ;;  %v612_v49 = vsel %vm225_vm6, %v2507_v55, %v2531_v60 }
 0x15c   :  { %v611_v10 = vsel %vm225_vm6, %v2531_v60, %v2539_v35  ;;  %v559_v48 = vadd.f32 %v556_v53, %v546_v15  ;;  %v599_v44 = vmul.f32 %v4105_v19, %v590_v59  ;;  %v600_v27 = vmul.f32 %v4105_v19, %v589_v45 }
 0x15d   :  { %v2781_v43 = vpop.permute.xlu0 %744  ;;  %v2787_v16 = vpop.permute.xlu1 %718  ;;  %v613_v26 = vsel %vm225_vm6, %v2539_v35, %v2507_v55  ;;  %v580_v38 = vadd.f32 %v577_v3, %v558_v1  ;;  %v560_v34 = vadd.f32 %v557_v11, %v547_v21  ;;  %v601_v23 = vmul.f32 %v4105_v19, %v591_v47 }
 0x15e   :  { %v634_v60 = vsel %vm248_vm7, %v2567_v9, %v2593_v61  ;;  %v581_v12 = vadd.f32 %v578_v46, %v559_v48  ;;  %v621_v13 = vmul.f32 %v4106_v33, %v612_v49  ;;  %v622_v62 = vmul.f32 %v4106_v33, %v611_v10 }
 0x15f   :  { %v633_v15 = vsel %vm248_vm7, %v2593_v61, %v2601_v25  ;;  %v582_v35 = vadd.f32 %v579_v51, %v560_v34  ;;  %v623_v32 = vmul.f32 %v4106_v33, %v613_v26  ;;  %v635_v21 = vsel %vm248_vm7, %v2601_v25, %v2567_v9 }
 0x160   :  { %v2873_v3 = vsub.s32 %v2683_v2, %v40_v30  ;;  %v602_v59 = vadd.f32 %v599_v44, %v580_v38  ;;  %v603_v45 = vadd.f32 %v600_v27, %v581_v12  ;;  %v643_v28 = vmul.f32 %v2496_v29, %v634_v60 }
 0x161   :  { %v2796_v57 = vpop.permute.xlu0 %720  ;;  %v2803_v54 = vpop.permute.xlu1 %722  ;;  %v659_v61 = vsel %vm75_vm1, %v2623_v0, %v2626_v22  ;;  %v604_v53 = vadd.f32 %v601_v23, %v582_v35  ;;  %v644_v37 = vmul.f32 %v2496_v29, %v633_v15  ;;  %v658_v9 = vsel %vm75_vm1, %v2626_v22, %v2636_v8 }
 0x162   :  { %v660_v25 = vsel %vm75_vm1, %v2636_v8, %v2623_v0  ;;  %v624_v2 = vadd.f32 %v621_v13, %v602_v59  ;;  %v625_v30 = vadd.f32 %v622_v62, %v603_v45  ;;  %v645_v11 = vmul.f32 %v2496_v29, %v635_v21 }
 0x163   :  { %v681_v46 = vsel %vm97_vm0, %v2669_v6, %v2686_v20  ;;  %v626_v1 = vadd.f32 %v623_v32, %v604_v53  ;;  %v669_v51 = vmul.f32 %v2560_v40, %v659_v61  ;;  %v680_v22 = vsel %vm97_vm0, %v2686_v20, %v2694_v36 }
 0x164   :  { %v682_v0 = vsel %vm97_vm0, %v2694_v36, %v2669_v6  ;;  %v646_v8 = vadd.f32 %v643_v28, %v624_v2  ;;  %v668_v49 = vmul.f32 %v2560_v40, %v660_v25  ;;  %v670_v10 = vmul.f32 %v2560_v40, %v658_v9  ;;  %v4107_v9 = vld [vmem:[#allocation8_spill] sm:$0xff]  ;;  %v4108_v2 = vld [vmem:[#allocation9_spill] sm:$0xff] }
 0x165   :  { %v2833_v63 = vpop.permute.xlu0 %766  ;;  %v2844_v17 = vpop.permute.xlu1 %788  ;;  %v703_v48 = vsel %vm3996_vm2, %v2721_v41, %v2751_v18  ;;  %v647_v19 = vadd.f32 %v644_v37, %v625_v30  ;;  %v691_v20 = vmul.f32 %v2619_v58, %v681_v46  ;;  %v702_v6 = vsel %vm3996_vm2, %v2751_v18, %v2759_v7 }
 0x166   :  { %v704_v36 = vsel %vm3996_vm2, %v2759_v7, %v2721_v41  ;;  %v648_v44 = vadd.f32 %v645_v11, %v626_v1  ;;  %v690_v40 = vmul.f32 %v2619_v58, %v682_v0  ;;  %v692_v27 = vmul.f32 %v2619_v58, %v680_v22 }
 0x167   :  { %v725_v26 = vsel %vm3995_vm3, %v2787_v16, %v2796_v57  ;;  %v672_v34 = vadd.f32 %v669_v51, %v647_v19  ;;  %v713_v23 = vmul.f32 %v2662_v5, %v703_v48  ;;  %v724_v18 = vsel %vm3995_vm3, %v2796_v57, %v2803_v54  ;;  %v1798_v51 = vld [vmem:[%s3940_s2 + $0xb8] sm:$0xff] }
 0x168   :  { %v726_v41 = vsel %vm3995_vm3, %v2803_v54, %v2787_v16  ;;  %v671_v7 = vadd.f32 %v668_v49, %v646_v8  ;;  %v673_v60 = vadd.f32 %v670_v10, %v648_v44  ;;  %v712_v12 = vmul.f32 %v2662_v5, %v704_v36 }
 0x169   :  { %v2863_v55 = vpop.permute.xlu0 %753  ;;  %v2870_v24 = vpop.permute.xlu1 %755  ;;  %v714_v33 = vmul.f32 %v2662_v5, %v702_v6  ;;  %v694_v13 = vadd.f32 %v691_v20, %v672_v34  ;;  %v735_v62 = vmul.f32 %v2714_v52, %v725_v26  ;;  %v2941_v15 = vsub.s32 %v2701_v39, %v41_v31 }
 0x16a   :  { %vm45_vm8 = vcmp.ge.s32.totalorder %v2738_v50, 1  ;;  %v693_v57 = vadd.f32 %v690_v40, %v671_v7  ;;  %v695_v35 = vadd.f32 %v692_v27, %v673_v60  ;;  %v734_v16 = vmul.f32 %v2714_v52, %v726_v41 }
 0x16b   :  { %v736_v54 = vmul.f32 %v2714_v52, %v724_v18  ;;  %v716_v21 = vadd.f32 %v713_v23, %v694_v13  ;;  %vm46_vm9 = vcmp.ge.s32.totalorder %v2740_v14, 1  ;;  %vm47_vm10 = vcmp.ge.s32.totalorder %v2783_v42, 1 }
 0x16c   :  { %vm48_vm11 = vcmp.le.s32.totalorder %v2738_v50, 16  ;;  %v715_v5 = vadd.f32 %v712_v12, %v693_v57  ;;  %v717_v39 = vadd.f32 %v714_v33, %v695_v35  ;;  %vm49_vm12 = vcmp.le.s32.totalorder %v2740_v14, 16 }
 0x16d   :  { %v758_v47 = vpop.permute.xlu0 %757  ;;  %v2903_v29 = vpop.permute.xlu1 %810  ;;  %vm50_vm13 = vcmp.le.s32.totalorder %v2783_v42, 16  ;;  %v738_v31 = vadd.f32 %v735_v62, %v716_v21  ;;  %v760_v52 = vsel %vm179_vm4, %v2863_v55, %v2870_v24  ;;  %vm54_vm14 = vcmp.ge.s32.totalorder %v2813_v4, 1  ;;  %vm51_vm3 = vmand %vm45_vm8, %vm48_vm11 }
 0x16e   :  { %vm55_vm15 = vcmp.ge.s32.totalorder %v2873_v3, 1  ;;  %v737_v45 = vadd.f32 %v734_v16, %v715_v5  ;;  %v739_v28 = vadd.f32 %v736_v54, %v717_v39  ;;  %v759_v61 = vsel %vm179_vm4, %v2870_v24, %v758_v47  ;;  %v4109_v24 = vld [vmem:[#allocation10_spill] sm:$0xff]  ;;  %vm2985_vm8 = vmand %vm46_vm9, %vm49_vm12 }
 0x16f   :  { %v761_v53 = vsel %vm179_vm4, %v758_v47, %v2863_v55  ;;  %v747_v25 = vmul.f32 %v2781_v43, %v4107_v9  ;;  %v748_v30 = vmul.f32 %v2781_v43, %v4108_v2  ;;  %vm56_vm2 = vcmp.ge.s32.totalorder %v2941_v15, 1  ;;  %vm2995_vm11 = vmand %vm51_vm3, %vm54_vm14  ;;  %v1778_v9 = vld [vmem:[%s3940_s2 + $0x18] sm:$0xff]  ;;  %v1780_v2 = vld [vmem:[%s3940_s2 + $0x28] sm:$0xff] }
 0x170   :  { %v749_v1 = vmul.f32 %v2781_v43, %v4109_v24  ;;  %v769_v55 = vmul.f32 %v2833_v63, %v760_v52  ;;  %v770_v22 = vmul.f32 %v2833_v63, %v759_v61  ;;  %v771_v43 = vmul.f32 %v2833_v63, %v761_v53  ;;  %vm3005_vm9 = vmand %vm47_vm10, %vm50_vm13  ;;  %v920_v53 = vld [vmem:[%s3940_s2] sm:$0xff]  ;;  %v1793_v24 = vld [vmem:[%s3940_s2 + $0x90] sm:$0xff] }
 0x171   :  { %v776_v38 = vpop.permute.xlu0 %775  ;;  %v778_v58 = vpop.permute.xlu1 %777  ;;  %v750_v14 = vadd.f32 %v747_v25, %v737_v45  ;;  %v751_v49 = vadd.f32 %v748_v30, %v738_v31  ;;  %vm3019_vm3 = vmand %vm2985_vm8, %vm55_vm15  ;;  %vm61_vm10 = vcmp.le.s32.totalorder %v2873_v3, 16  ;;  %vm62_vm14 = vcmp.le.s32.totalorder %v2941_v15, 16  ;;  %v1779_v25 = vld [vmem:[%s3940_s2 + $0x20] sm:$0xff]  ;;  %v1790_v30 = vld [vmem:[%s3940_s2 + $0x78] sm:$0xff] }
 0x172   :  { %v782_v11 = vsel %vm3997_vm5, %v776_v38, %v778_v58  ;;  %v752_v10 = vadd.f32 %v749_v1, %v739_v28  ;;  %vm3035_vm13 = vmand %vm3005_vm9, %vm56_vm2  ;;  %v1794_v1 = vld [vmem:[%s3940_s2 + $0x98] sm:$0xff]  ;;  %v4123_v8 = vlaneseq  ;;  %vm4129_vm8 = vcmp.lt.s32.totalorder %v2394_v56, 17 }
 0x173   :  { %v791_v48 = vmul.f32 %v2844_v17, %v782_v11  ;;  %v772_v27 = vadd.f32 %v769_v55, %v750_v14  ;;  %vm65_vm2 = vmand %vm3035_vm13, %vm62_vm14  ;;  %v1791_v11 = vld [vmem:[%s3940_s2 + $0x80] sm:$0xff]  ;;  %vm4136_vm13 = vcmp.lt.s32.totalorder %v2394_v56, 111 }
 0x174   :  { %v1795_v55 = vld [vmem:[%s3940_s2 + $0xa0] sm:$0xff]  ;;  %v851_v14 = vshrl.u32 %v4123_v8, 7  ;;  %vm4131_vm9 = vmmov %vm4129_vm8 }
 0x175   :  { %v780_v32 = vpop.permute.xlu0 %779  ;;  %v2946_v59 = vpop.permute.xlu1 %832  ;;  %v794_v18 = vadd.f32 %v791_v48, %v772_v27  ;;  %v1777_v27 = vld [vmem:[%s3940_s2 + $0x10] sm:$0xff]  ;;  %vm4137_vm14 = vmmov %vm4136_vm13 }
 0x176   :  { %v781_v50 = vsel %vm3997_vm5, %v778_v58, %v780_v32  ;;  %v783_v47 = vsel %vm3997_vm5, %v780_v32, %v776_v38  ;;  %vm60_vm5 = vcmp.le.s32.totalorder %v2813_v4, 16  ;;  %v774_v38 = vadd.f32 %v771_v43, %v752_v10  ;;  %v1809_v43 = vld [vmem:[%s3940_s2 + $0x110] sm:$0xff]  ;;  %v1788_v58 = vld [vmem:[%s3940_s2 + $0x68] sm:$0xff] }
 0x177   :  { %v792_v20 = vmul.f32 %v2844_v17, %v781_v50  ;;  %v793_v6 = vmul.f32 %v2844_v17, %v783_v47  ;;  %vm63_vm12 = vmand %vm2995_vm11, %vm60_vm5  ;;  %v773_v17 = vadd.f32 %v770_v22, %v751_v49  ;;  %v1796_v50 = vld [vmem:[%s3940_s2 + $0xa8] sm:$0xff]  ;;  %v1797_v47 = vld [vmem:[%s3940_s2 + $0xb0] sm:$0xff]  ;;  %v852_v49 = vmul.u32 8, %v851_v14 }
 0x178   :  { %vm64_vm5 = vmand %vm3019_vm3, %vm61_vm10  ;;  %v1808_v22 = vld [vmem:[%s3940_s2 + $0x108] sm:$0xff]  ;;  %vm4132_vm3 = vcmp.lt.s32.totalorder %v2394_v56, 1 }
 0x179   :  { %v798_v37 = vpop.permute.xlu0 %797  ;;  %v800_v46 = vpop.permute.xlu1 %799  ;;  %v795_v4 = vadd.f32 %v792_v20, %v773_v17  ;;  %v796_v3 = vadd.f32 %v793_v6, %v774_v38  ;;  %v853_v10 = vshra.s32 %v852_v49, 4  ;;  %v1782_v17 = vld [vmem:[%s3940_s2 + $0x38] sm:$0xff]  ;;  %v1783_v38 = vld [vmem:[%s3940_s2 + $0x40] sm:$0xff]  ;;  %vm4130_vm11 = vmmov %vm4129_vm8 }
 0x17a   :  { %v804_v0 = vsel %vm225_vm6, %v798_v37, %v800_v46  ;;  %vm4134_vm10 = vmmov %vm4132_vm3 }
 0x17b   :  { %v813_v26 = vmul.f32 %v2903_v29, %v804_v0  ;;  %v1810_v0 = vld [vmem:[%s3940_s2 + $0x118] sm:$0xff]  ;;  %v854_v48 = vmul.u32 2, %v853_v10 }
 0x17d   :  { %v802_v19 = vpop.permute.xlu0 %801  ;;  %v820_v40 = vpop.permute.xlu1 %819  ;;  %v816_v33 = vadd.f32 %v813_v26, %v794_v18  ;;  %v1781_v26 = vld [vmem:[%s3940_s2 + $0x30] sm:$0xff]  ;;  %v1786_v18 = vld [vmem:[%s3940_s2 + $0x58] sm:$0xff] }
 0x17e   :  { %v803_v36 = vsel %vm225_vm6, %v800_v46, %v802_v19  ;;  %v805_v44 = vsel %vm225_vm6, %v802_v19, %v798_v37  ;;  %v1776_v37 = vld [vmem:[%s3940_s2 + $0x8] sm:$0xff]  ;;  %v855_v19 = vsub.s32 %v851_v14, %v854_v48 }
 0x17f   :  { %v814_v34 = vmul.f32 %v2903_v29, %v803_v36  ;;  %v815_v23 = vmul.f32 %v2903_v29, %v805_v44  ;;  %v1839_v29 = vmov 0.0   ;;  %v1792_v46 = vld [vmem:[%s3940_s2 + $0x88] sm:$0xff] }
 0x180   :  { %v3044_v12 = vsel %vm63_vm12, 1.0, %v1839_v29  ;;  %v3059_v5 = vsel %vm64_vm5, 1.0, %v1839_v29  ;;  %v3065_v52 = vsel %vm65_vm2, 1.0, %v1839_v29  ;;  %v3125_v63 = vadd.s32 1, %v855_v19  ;;  %v1802_v29 = vld [vmem:[%s3940_s2 + $0xd8] sm:$0xff]  ;;  %vm4135_vm12 = vmmov %vm4132_vm3 }
 0x181   :  { %v822_v41 = vpop.permute.xlu0 %821  ;;  %v824_v60 = vpop.permute.xlu1 %823  ;;  %4120 = vst [vmem:[#allocation15_spill] sm:$0xff] %v3044_v12  ;;  %v817_v35 = vadd.f32 %v814_v34, %v795_v4  ;;  %v818_v16 = vadd.f32 %v815_v23, %v796_v3  ;;  %4121 = vst [vmem:[#allocation14_spill] sm:$0xff] %v3059_v5  ;;  %v1784_v34 = vld [vmem:[%s3940_s2 + $0x48] sm:$0xff]  ;;  %v1785_v23 = vld [vmem:[%s3940_s2 + $0x50] sm:$0xff] }
 0x182   :  { %v826_v7 = vsel %vm248_vm7, %v820_v40, %v822_v41  ;;  %v825_v62 = vsel %vm248_vm7, %v822_v41, %v824_v60  ;;  %v827_v57 = vsel %vm248_vm7, %v824_v60, %v820_v40  ;;  %4122 = vst [vmem:[#allocation16_spill] sm:$0xff] %v3065_v52  ;;  %4124 = vst [vmem:[#allocation2_spill] sm:$0xff] %v3125_v63  ;;  %vm859_vm15 = vcmp.lt.s32.totalorder %v3125_v63, 2  ;;  %v1787_v41 = vld [vmem:[%s3940_s2 + $0x60] sm:$0xff]  ;;  %v1789_v4 = vld [vmem:[%s3940_s2 + $0x70] sm:$0xff] }
 0x183   :  { %v835_v13 = vmul.f32 %v2946_v59, %v826_v7  ;;  %v836_v54 = vmul.f32 %v2946_v59, %v825_v62  ;;  %v837_v32 = vmul.f32 %v2946_v59, %v827_v57  ;;  %v1799_v3 = vld [vmem:[%s3940_s2 + $0xc0] sm:$0xff]  ;;  %v1800_v7 = vld [vmem:[%s3940_s2 + $0xc8] sm:$0xff]  ;;  %v1801_v60 = vld [vmem:[%s3940_s2 + $0xd0] sm:$0xff] }
 0x184   :  { %vm4138_vm5 = vmmov %vm4136_vm13 }
 0x185   :  { %v3057_v21 = vadd.f32 %v835_v13, %v816_v33  ;;  %v3061_v39 = vadd.f32 %v836_v54, %v817_v35  ;;  %v3063_v31 = vadd.f32 %v837_v32, %v818_v16  ;;  %v3172_v33 = vpop.permute.xlu1 %899  ;;  %vm4140_vm2 = vmmov %vm4129_vm8 }
 0x187   :  { %v843_v45 = vmul.f32 %v3057_v21, %v3044_v12  ;;  %v844_v59 = vmul.f32 %v3061_v39, %v3059_v5  ;;  %v845_v15 = vmul.f32 %v3063_v31, %v3065_v52 }
 0x189   :  { %v846_v28 = vadd.f32 %v844_v59, %v843_v45 }
 0x18b   :  { %v847_v61 = vadd.f32 %v846_v28, %v845_v15 }
 0x18d   :  { %848 = vadd.xlane.f32.xlu0 %v847_v61  ;;  %v1805_v61 = vld [vmem:[%s3940_s2 + $0xf0] sm:$0xff] }
 0x1a3   :  { %923 = vperm.xlu0 %1821, %v920_v53   ;;  %v1806_v53 = vld [vmem:[%s3940_s2 + $0xf8] sm:$0xff] }
 0x1a7   :  { %945 = vperm.xlu0 %1821, %v1776_v37   ;;  %v1807_v37 = vld [vmem:[%s3940_s2 + $0x100] sm:$0xff] }
 0x1ab   :  { %989 = vperm.xlu0 %1821, %v1778_v9  }
 0x1af   :  { %1002 = vperm.xlu0 %1821, %v1779_v25  }
 0x1b3   :  { %1024 = vperm.xlu0 %1821, %v1780_v2  }
 0x1b7   :  { %1238 = vperm.xlu0 %1821, %v1790_v30  }
 0x1bb   :  { %1260 = vperm.xlu0 %1821, %v1791_v11  }
 0x1bf   :  { %1282 = vperm.xlu0 %1821, %v1792_v46  }
 0x1c3   :  { %1307 = vperm.xlu0 %1821, %v1793_v24  }
 0x1c7   :  { %1329 = vperm.xlu0 %1821, %v1794_v1  }
 0x1cb   :  { %1351 = vperm.xlu0 %1821, %v1795_v55  }
 0x1cf   :  { %1373 = vperm.xlu0 %1821, %v1796_v50  }
 0x1d3   :  { %1386 = vperm.xlu0 %1821, %v1797_v47  }
 0x1d7   :  { %1408 = vperm.xlu0 %1821, %v1798_v51  }
 0x1db   :  { %1622 = vperm.xlu0 %1821, %v1808_v22  }
 0x1df   :  { %1644 = vperm.xlu0 %1821, %v1809_v43  }
 0x1e3   :  { %1666 = vperm.xlu0 %1821, %v1810_v0  }
 0x216   :  { %v849_v20 = vpop.xlane.xlu0 %848 }
 0x217   :  { %v856_v6 = vrot.slane %v849_v20, 1  ;;  %v857_v36 = vrot.slane %v849_v20, 7 }
 0x219   :  { %v860_v44 = vsel %vm859_vm15, %v856_v6, %v857_v36 }
 0x21a   :  { %v861_v40 = vadd.f32 %v860_v44, %v849_v20  ;;  %v841_v20 = vld [vmem:[%s3941_s3] sm:$0xff] }
 0x21c   :  { %v862_v42 = vmul.f32 0.001953125, %v861_v40 }
 0x21e   :  { %865 = vperm.xlu1 %1822, %v862_v42   ;;  %v3237_v44 = vpop.permute.xlu0 %923 }
 0x222   :  { %967 = vperm.xlu1 %1822, %v1777_v27   ;;  %v3239_v40 = vpop.permute.xlu0 %945 }
 0x226   :  { %1046 = vperm.xlu1 %1822, %v1781_v26   ;;  %v3241_v42 = vpop.permute.xlu0 %989 }
 0x22a   :  { %1068 = vperm.xlu1 %1822, %v1782_v17   ;;  %v3243_v27 = vpop.permute.xlu0 %1002 }
 0x22e   :  { %1090 = vperm.xlu1 %1822, %v1783_v38   ;;  %v3245_v26 = vpop.permute.xlu0 %1024 }
 0x232   :  { %1115 = vperm.xlu1 %1822, %v1784_v34   ;;  %v3247_v17 = vpop.permute.xlu0 %1238 }
 0x236   :  { %1137 = vperm.xlu1 %1822, %v1785_v23   ;;  %v3249_v38 = vpop.permute.xlu0 %1260 }
 0x23a   :  { %1159 = vperm.xlu1 %1822, %v1786_v18   ;;  %v3251_v34 = vpop.permute.xlu0 %1282 }
 0x23e   :  { %1181 = vperm.xlu1 %1822, %v1787_v41   ;;  %v3253_v23 = vpop.permute.xlu0 %1307 }
 0x242   :  { %1194 = vperm.xlu1 %1822, %v1788_v58   ;;  %v3255_v18 = vpop.permute.xlu0 %1329 }
 0x246   :  { %1216 = vperm.xlu1 %1822, %v1789_v4   ;;  %v3257_v41 = vpop.permute.xlu0 %1351 }
 0x24a   :  { %1430 = vperm.xlu1 %1822, %v1799_v3   ;;  %v3259_v58 = vpop.permute.xlu0 %1373 }
 0x24e   :  { %1452 = vperm.xlu1 %1822, %v1800_v7   ;;  %v3261_v4 = vpop.permute.xlu0 %1386 }
 0x252   :  { %1474 = vperm.xlu1 %1822, %v1801_v60   ;;  %v3263_v3 = vpop.permute.xlu0 %1408 }
 0x256   :  { %1499 = vperm.xlu1 %1822, %v1802_v29   ;;  %v3265_v7 = vpop.permute.xlu0 %1622 }
 0x257   :  { %4125 = vst [vmem:[#allocation11_spill] sm:$0xff] %v3265_v7 }
 0x25a   :  { %v3267_v60 = vpop.permute.xlu0 %1644 }
 0x25b   :  { %4126 = vst [vmem:[#allocation3_spill] sm:$0xff] %v3267_v60 }
 0x25e   :  { %v3269_v29 = vpop.permute.xlu0 %1666 }
 0x25f   :  { %4127 = vst [vmem:[#allocation19_spill] sm:$0xff] %v3269_v29 }
 0x299   :  { %v866_v13 = vpop.permute.xlu1 %865 }
 0x29a   :  { %v3175_v62 = vsub.f32 %v3057_v21, %v866_v13  ;;  %v3178_v57 = vsub.f32 %v3061_v39, %v866_v13  ;;  %v3181_v35 = vsub.f32 %v3063_v31, %v866_v13  ;;  %v1803_v39 = vld [vmem:[%s3940_s2 + $0xe0] sm:$0xff]  ;;  %v1804_v31 = vld [vmem:[%s3940_s2 + $0xe8] sm:$0xff] }
 0x29c   :  { %v871_v16 = vmul.f32 %v3175_v62, %v3044_v12  ;;  %v872_v54 = vmul.f32 %v3178_v57, %v3059_v5  ;;  %v873_v32 = vmul.f32 %v3181_v35, %v3065_v52 }
 0x29d   :  { %v3204_v9 = vpop.permute.xlu1 %967 }
 0x29e   :  { %v874_v45 = vmul.f32 %v871_v16, %v871_v16  ;;  %v875_v59 = vmul.f32 %v872_v54, %v872_v54  ;;  %v876_v15 = vmul.f32 %v873_v32, %v873_v32 }
 0x2a0   :  { %v877_v21 = vadd.f32 %v875_v59, %v874_v45 }
 0x2a1   :  { %v3206_v25 = vpop.permute.xlu1 %1046 }
 0x2a2   :  { %v878_v28 = vadd.f32 %v877_v21, %v876_v15 }
 0x2a4   :  { %879 = vadd.xlane.f32.xlu1 %v878_v28 }
 0x2a5   :  { %v3208_v2 = vpop.permute.xlu1 %1068 }
 0x2a9   :  { %v3210_v30 = vpop.permute.xlu1 %1090 }
 0x2ad   :  { %v3212_v11 = vpop.permute.xlu1 %1115 }
 0x2b1   :  { %v3214_v46 = vpop.permute.xlu1 %1137 }
 0x2b5   :  { %1521 = vperm.xlu1 %1822, %v1803_v39   ;;  %v3216_v24 = vpop.permute.xlu1 %1159 }
 0x2b9   :  { %1543 = vperm.xlu1 %1822, %v1804_v31   ;;  %v3218_v1 = vpop.permute.xlu1 %1181 }
 0x2bd   :  { %1565 = vperm.xlu1 %1822, %v1805_v61   ;;  %v3220_v55 = vpop.permute.xlu1 %1194 }
 0x2c1   :  { %1578 = vperm.xlu1 %1822, %v1806_v53   ;;  %v3222_v50 = vpop.permute.xlu1 %1216 }
 0x2c5   :  { %1600 = vperm.xlu1 %1822, %v1807_v37   ;;  %v3224_v47 = vpop.permute.xlu1 %1430 }
 0x2c9   :  { %v3226_v51 = vpop.permute.xlu1 %1452 }
 0x2cd   :  { %v3228_v22 = vpop.permute.xlu1 %1474 }
 0x2d1   :  { %v3230_v43 = vpop.permute.xlu1 %1499 }
 0x32d   :  { %v880_v0 = vpop.xlane.xlu1 %879 }
 0x32e   :  { %v881_v8 = vrot.slane %v880_v0, 1  ;;  %v882_v14 = vrot.slane %v880_v0, 7 }
 0x330   :  { %v883_v49 = vsel %vm859_vm15, %v881_v8, %v882_v14 }
 0x331   :  { %v884_v10 = vadd.f32 %v883_v49, %v880_v0  ;;  %v3383_v53 = vpop.permute.xlu1 %1521 }
 0x333   :  { %v885_v48 = vmul.f32 0.001953125, %v884_v10 }
 0x335   :  { %v886_v19 = vadd.f32 1e-05, %v885_v48  ;;  %v3392_v0 = vpop.permute.xlu1 %1543 }
 0x337   :  { %1823 = vrsqrt.f32 %v886_v19 }
 0x339   :  { %v3405_v14 = vpop.permute.xlu1 %1565 }
 0x33d   :  { %v3414_v10 = vpop.permute.xlu1 %1578 }
 0x341   :  { %v3424_v48 = vpop.permute.xlu1 %1600 }
 0x342   :  { %4128 = vst [vmem:[#allocation18_spill] sm:$0xff] %v3424_v48 }
 0x344   :  { %v1824_v6 = vpop.eup %1823 }
 0x345   :  { %v888_v36 = vmul.f32 %v1824_v6, %v841_v20 }
 0x347   :  { %891 = vperm.xlu0 %1821, %v888_v36  }
 0x3c2   :  { %v892_v13 = vpop.permute.xlu0 %891 }
 0x3c3   :  { %v894_v16 = vmul.f32 %v892_v13, %v3175_v62  ;;  %v895_v54 = vmul.f32 %v892_v13, %v3178_v57  ;;  %v896_v32 = vmul.f32 %v892_v13, %v3181_v35 }
 0x3c5   :  { %v902_v45 = vadd.f32 %v3172_v33, %v894_v16  ;;  %v903_v59 = vadd.f32 %v3172_v33, %v895_v54  ;;  %v904_v15 = vadd.f32 %v3172_v33, %v896_v32 }
 0x3c7   :  { %v905_v21 = vmax.f32 %v902_v45, 0.0  ;;  %v906_v28 = vmax.f32 %v903_v59, 0.0  ;;  %v907_v39 = vmax.f32 %v904_v15, 0.0 }
 0x3c9   :  { %v3278_v31 = vmul.f32 %v905_v21, %v3044_v12  ;;  %v3281_v61 = vmul.f32 %v906_v28, %v3059_v5  ;;  %v3288_v62 = vmul.f32 %v907_v39, %v3065_v52 }
 0x3cb   :  { %913 = vrot.lane.b32.xlu1 %v3281_v61, %s1831_s9  ;;  %911 = vrot.lane.b32.xlu0 %v3278_v31, %s1831_s9  ;;  %v3331_v33 = vrot.slane %v3281_v61, 2  ;;  %v3342_v57 = vrot.slane %v3278_v31, 2  ;;  %v3349_v35 = vrot.slane %v3288_v62, 2  ;;  %v3390_v37 = vrot.slane %v3278_v31, 4 }
 0x3cc   :  { %v3399_v8 = vrot.slane %v3288_v62, 4  ;;  %v3408_v49 = vrot.slane %v3281_v61, 4 }
 0x3cf   :  { %932 = vrot.lane.b32.xlu1 %v3278_v31, %s1832_s14  ;;  %915 = vrot.lane.b32.xlu0 %v3288_v62, %s1831_s9 }
 0x3d3   :  { %936 = vrot.lane.b32.xlu1 %v3288_v62, %s1832_s14  ;;  %934 = vrot.lane.b32.xlu0 %v3281_v61, %s1832_s14 }
 0x3d7   :  { %954 = vrot.lane.b32.xlu1 %v3278_v31, %s1833_s17  ;;  %956 = vrot.lane.b32.xlu0 %v3281_v61, %s1833_s17 }
 0x3db   :  { %958 = vrot.lane.b32.xlu1 %v3288_v62, %s1833_s17  ;;  %978 = vrot.lane.b32.xlu0 %v3281_v61, %s1834_s20 }
 0x3df   :  { %976 = vrot.lane.b32.xlu1 %v3278_v31, %s1834_s20  ;;  %1011 = vrot.lane.b32.xlu0 %v3278_v31, %s1835_s25 }
 0x3e3   :  { %980 = vrot.lane.b32.xlu1 %v3288_v62, %s1834_s20  ;;  %1015 = vrot.lane.b32.xlu0 %v3288_v62, %s1835_s25 }
 0x3e7   :  { %1013 = vrot.lane.b32.xlu1 %v3281_v61, %s1835_s25  ;;  %1033 = vrot.lane.b32.xlu0 %v3278_v31, %s1836_s28 }
 0x3eb   :  { %1035 = vrot.lane.b32.xlu1 %v3281_v61, %s1836_s28  ;;  %1037 = vrot.lane.b32.xlu0 %v3288_v62, %s1836_s28 }
 0x3ef   :  { %1057 = vrot.lane.b32.xlu1 %v3281_v61, %s1837_s8  ;;  %1055 = vrot.lane.b32.xlu0 %v3278_v31, %s1837_s8 }
 0x3f3   :  { %1079 = vrot.lane.b32.xlu1 %v3281_v61, %s1838_s12  ;;  %1059 = vrot.lane.b32.xlu0 %v3288_v62, %s1837_s8 }
 0x3f7   :  { %1104 = vrot.lane.b32.xlu1 %v3331_v33, %s1831_s9  ;;  %1077 = vrot.lane.b32.xlu0 %v3278_v31, %s1838_s12 }
 0x3fb   :  { %1126 = vrot.lane.b32.xlu1 %v3331_v33, %s1832_s14  ;;  %1081 = vrot.lane.b32.xlu0 %v3288_v62, %s1838_s12 }
 0x3ff   :  { %1148 = vrot.lane.b32.xlu1 %v3331_v33, %s1833_s17  ;;  %1102 = vrot.lane.b32.xlu0 %v3342_v57, %s1831_s9 }
 0x403   :  { %1170 = vrot.lane.b32.xlu1 %v3331_v33, %s1834_s20  ;;  %1106 = vrot.lane.b32.xlu0 %v3349_v35, %s1831_s9 }
 0x407   :  { %1203 = vrot.lane.b32.xlu1 %v3342_v57, %s1835_s25  ;;  %1124 = vrot.lane.b32.xlu0 %v3342_v57, %s1832_s14 }
 0x40b   :  { %1207 = vrot.lane.b32.xlu1 %v3349_v35, %s1835_s25  ;;  %1128 = vrot.lane.b32.xlu0 %v3349_v35, %s1832_s14 }
 0x40f   :  { %1225 = vrot.lane.b32.xlu1 %v3342_v57, %s1836_s28  ;;  %1146 = vrot.lane.b32.xlu0 %v3342_v57, %s1833_s17 }
 0x413   :  { %1229 = vrot.lane.b32.xlu1 %v3349_v35, %s1836_s28  ;;  %1150 = vrot.lane.b32.xlu0 %v3349_v35, %s1833_s17 }
 0x417   :  { %1247 = vrot.lane.b32.xlu1 %v3342_v57, %s1837_s8  ;;  %1168 = vrot.lane.b32.xlu0 %v3342_v57, %s1834_s20 }
 0x41b   :  { %1251 = vrot.lane.b32.xlu1 %v3349_v35, %s1837_s8  ;;  %1172 = vrot.lane.b32.xlu0 %v3349_v35, %s1834_s20 }
 0x41f   :  { %1269 = vrot.lane.b32.xlu1 %v3342_v57, %s1838_s12  ;;  %1205 = vrot.lane.b32.xlu0 %v3331_v33, %s1835_s25 }
 0x423   :  { %1273 = vrot.lane.b32.xlu1 %v3349_v35, %s1838_s12  ;;  %1227 = vrot.lane.b32.xlu0 %v3331_v33, %s1836_s28 }
 0x427   :  { %1294 = vrot.lane.b32.xlu1 %v3390_v37, %s1831_s9  ;;  %1249 = vrot.lane.b32.xlu0 %v3331_v33, %s1837_s8 }
 0x42b   :  { %1298 = vrot.lane.b32.xlu1 %v3399_v8, %s1831_s9  ;;  %1271 = vrot.lane.b32.xlu0 %v3331_v33, %s1838_s12 }
 0x42f   :  { %1316 = vrot.lane.b32.xlu1 %v3390_v37, %s1832_s14  ;;  %1296 = vrot.lane.b32.xlu0 %v3408_v49, %s1831_s9 }
 0x433   :  { %1320 = vrot.lane.b32.xlu1 %v3399_v8, %s1832_s14  ;;  %1318 = vrot.lane.b32.xlu0 %v3408_v49, %s1832_s14 }
 0x437   :  { %1338 = vrot.lane.b32.xlu1 %v3390_v37, %s1833_s17  ;;  %1340 = vrot.lane.b32.xlu0 %v3408_v49, %s1833_s17 }
 0x43b   :  { %1342 = vrot.lane.b32.xlu1 %v3399_v8, %s1833_s17  ;;  %1362 = vrot.lane.b32.xlu0 %v3408_v49, %s1834_s20 }
 0x43d   :  { %v914_v19 = vpop.permute.xlu1 %913  ;;  %v912_v20 = vpop.permute.xlu0 %911 }
 0x43e   :  { %v918_v13 = vsel %vm75_vm1, %v912_v20, %v914_v19 }
 0x43f   :  { %1360 = vrot.lane.b32.xlu1 %v3390_v37, %s1834_s20  ;;  %1395 = vrot.lane.b32.xlu0 %v3390_v37, %s1835_s25  ;;  %v927_v45 = vmul.f32 %v3237_v44, %v918_v13 }
 0x441   :  { %v933_v6 = vpop.permute.xlu1 %932  ;;  %v916_v36 = vpop.permute.xlu0 %915 }
 0x442   :  { %v917_v16 = vsel %vm75_vm1, %v914_v19, %v916_v36 }
 0x443   :  { %1364 = vrot.lane.b32.xlu1 %v3399_v8, %s1834_s20  ;;  %1399 = vrot.lane.b32.xlu0 %v3399_v8, %s1835_s25  ;;  %v928_v28 = vmul.f32 %v3237_v44, %v917_v16 }
 0x445   :  { %v937_v54 = vpop.permute.xlu1 %936  ;;  %v935_v32 = vpop.permute.xlu0 %934 }
 0x446   :  { %v940_v59 = vsel %vm97_vm0, %v937_v54, %v933_v6  ;;  %v938_v15 = vsel %vm97_vm0, %v935_v32, %v937_v54  ;;  %v939_v21 = vsel %vm97_vm0, %v933_v6, %v935_v32  ;;  %v919_v54 = vsel %vm75_vm1, %v916_v36, %v912_v20 }
 0x447   :  { %v949_v39 = vmul.f32 %v3239_v40, %v939_v21  ;;  %v950_v63 = vmul.f32 %v3239_v40, %v938_v15  ;;  %1397 = vrot.lane.b32.xlu1 %v3408_v49, %s1835_s25  ;;  %1417 = vrot.lane.b32.xlu0 %v3390_v37, %s1836_s28  ;;  %v948_v16 = vmul.f32 %v3239_v40, %v940_v59 }
 0x449   :  { %v952_v19 = vadd.f32 %v949_v39, %v927_v45  ;;  %v953_v13 = vadd.f32 %v950_v63, %v928_v28  ;;  %v955_v52 = vpop.permute.xlu1 %954  ;;  %v957_v5 = vpop.permute.xlu0 %956  ;;  %v926_v63 = vmul.f32 %v3237_v44, %v919_v54 }
 0x44a   :  { %v961_v6 = vsel %vm4129_vm8, %v955_v52, %v957_v5  ;;  %vm4141_vm8 = vmmov %vm4138_vm5 }
 0x44b   :  { %v971_v32 = vmul.f32 %v3204_v9, %v961_v6  ;;  %1419 = vrot.lane.b32.xlu1 %v3408_v49, %s1836_s28  ;;  %1421 = vrot.lane.b32.xlu0 %v3399_v8, %s1836_s28  ;;  %v951_v40 = vadd.f32 %v948_v16, %v926_v63 }
 0x44d   :  { %v974_v45 = vadd.f32 %v971_v32, %v952_v19  ;;  %v959_v15 = vpop.permute.xlu1 %958  ;;  %v979_v21 = vpop.permute.xlu0 %978  ;;  %v3485_v32 = vrot.slane %v3281_v61, 6 }
 0x44e   :  { %v960_v20 = vsel %vm4130_vm11, %v957_v5, %v959_v15  ;;  %v962_v36 = vsel %vm4131_vm9, %v959_v15, %v955_v52  ;;  %vm4142_vm11 = vmmov %vm4140_vm2 }
 0x44f   :  { %v970_v59 = vmul.f32 %v3204_v9, %v962_v36  ;;  %v972_v28 = vmul.f32 %v3204_v9, %v960_v20  ;;  %1441 = vrot.lane.b32.xlu1 %v3408_v49, %s1837_s8  ;;  %1439 = vrot.lane.b32.xlu0 %v3390_v37, %s1837_s8  ;;  %4133 = vst [vmem:[#allocation20_spill] sm:$0xff] %v3485_v32  ;;  %vm4143_vm9 = vmmov %vm4140_vm2 }
 0x450   :  { %v1006_v20 = vmul.f32 %v3243_v27, %v3281_v61  ;;  %v1005_v61 = vmul.f32 %v3243_v27, %v3278_v31 }
 0x451   :  { %v973_v44 = vadd.f32 %v970_v59, %v951_v40  ;;  %v975_v39 = vadd.f32 %v972_v28, %v953_v13  ;;  %v977_v19 = vpop.permute.xlu1 %976  ;;  %v1012_v54 = vpop.permute.xlu0 %1011  ;;  %v1007_v28 = vmul.f32 %v3243_v27, %v3288_v62 }
 0x452   :  { %v983_v5 = vsel %vm4132_vm3, %v977_v19, %v979_v21 }
 0x453   :  { %v993_v52 = vmul.f32 %v3241_v42, %v983_v5  ;;  %1463 = vrot.lane.b32.xlu1 %v3408_v49, %s1838_s12  ;;  %1443 = vrot.lane.b32.xlu0 %v3399_v8, %s1837_s8 }
 0x455   :  { %v996_v9 = vadd.f32 %v993_v52, %v974_v45  ;;  %v981_v6 = vpop.permute.xlu1 %980  ;;  %v1016_v16 = vpop.permute.xlu0 %1015 }
 0x456   :  { %v982_v13 = vsel %vm4134_vm10, %v979_v21, %v981_v6  ;;  %v984_v63 = vsel %vm4135_vm12, %v981_v6, %v977_v19  ;;  %v1019_v15 = vsel %vm179_vm4, %v1016_v16, %v1012_v54  ;;  %vm4144_vm10 = vmmov %vm4132_vm3 }
 0x457   :  { %v992_v36 = vmul.f32 %v3241_v42, %v984_v63  ;;  %v994_v45 = vmul.f32 %v3241_v42, %v982_v13  ;;  %1488 = vrot.lane.b32.xlu1 %v3485_v32, %s1831_s9  ;;  %1461 = vrot.lane.b32.xlu0 %v3390_v37, %s1838_s12  ;;  %v1009_v21 = vadd.f32 %v1006_v20, %v996_v9  ;;  %vm4145_vm12 = vmmov %vm4132_vm3 }
 0x458   :  { %v1029_v52 = vmul.f32 %v3245_v26, %v1019_v15 }
 0x459   :  { %v995_v40 = vadd.f32 %v992_v36, %v973_v44  ;;  %v997_v59 = vadd.f32 %v994_v45, %v975_v39  ;;  %v1014_v19 = vpop.permute.xlu1 %1013  ;;  %v1034_v5 = vpop.permute.xlu0 %1033  ;;  %v3523_v45 = vrot.slane %v3278_v31, 6 }
 0x45a   :  { %v1017_v42 = vsel %vm179_vm4, %v1014_v19, %v1016_v16  ;;  %v1018_v6 = vsel %vm179_vm4, %v1012_v54, %v1014_v19 }
 0x45b   :  { %v1010_v13 = vadd.f32 %v1007_v28, %v997_v59  ;;  %v1008_v9 = vadd.f32 %v1005_v61, %v995_v40  ;;  %v1027_v44 = vmul.f32 %v3245_v26, %v1018_v6  ;;  %v1028_v39 = vmul.f32 %v3245_v26, %v1017_v42  ;;  %1510 = vrot.lane.b32.xlu1 %v3485_v32, %s1832_s14 }
 0x45c   :  { %1465 = vrot.lane.b32.xlu0 %v3399_v8, %s1838_s12  ;;  %4139 = vst [vmem:[#allocation4_spill] sm:$0xff] %v3523_v45  ;;  %v3535_v42 = vrot.slane %v3288_v62, 6 }
 0x45d   :  { %v1032_v27 = vadd.f32 %v1029_v52, %v1010_v13  ;;  %v1030_v63 = vadd.f32 %v1027_v44, %v1008_v9  ;;  %v1031_v15 = vadd.f32 %v1028_v39, %v1009_v21  ;;  %v1036_v20 = vpop.permute.xlu1 %1035  ;;  %v1038_v16 = vpop.permute.xlu0 %1037 }
 0x45e   :  { %v1040_v54 = vsel %vm4136_vm13, %v1034_v5, %v1036_v20  ;;  %v1039_v36 = vsel %vm4137_vm14, %v1036_v20, %v1038_v16  ;;  %v1041_v26 = vsel %vm4138_vm5, %v1038_v16, %v1034_v5  ;;  %vm4146_vm13 = vmmov %vm4138_vm5 }
 0x45f   :  { %v1049_v40 = vmul.f32 %v3206_v25, %v1040_v54  ;;  %v1050_v59 = vmul.f32 %v3206_v25, %v1039_v36  ;;  %v1051_v21 = vmul.f32 %v3206_v25, %v1041_v26  ;;  %1532 = vrot.lane.b32.xlu1 %v3485_v32, %s1833_s17  ;;  %vm4147_vm14 = vmmov %vm4138_vm5 }
 0x460   :  { %1486 = vrot.lane.b32.xlu0 %v3523_v45, %s1831_s9  ;;  %vm4148_vm5 = vmmov %vm4140_vm2 }
 0x461   :  { %v1052_v28 = vadd.f32 %v1049_v40, %v1030_v63  ;;  %v1053_v19 = vadd.f32 %v1050_v59, %v1031_v15  ;;  %v1054_v61 = vadd.f32 %v1051_v21, %v1032_v27  ;;  %v1058_v52 = vpop.permute.xlu1 %1057  ;;  %v1056_v5 = vpop.permute.xlu0 %1055 }
 0x462   :  { %v1062_v31 = vsel %vm225_vm6, %v1056_v5, %v1058_v52 }
 0x463   :  { %v1071_v6 = vmul.f32 %v3208_v2, %v1062_v31  ;;  %1554 = vrot.lane.b32.xlu1 %v3485_v32, %s1834_s20 }
 0x464   :  { %1490 = vrot.lane.b32.xlu0 %v3535_v42, %s1831_s9 }
 0x465   :  { %v1074_v25 = vadd.f32 %v1071_v6, %v1052_v28  ;;  %v1080_v13 = vpop.permute.xlu1 %1079  ;;  %v1060_v9 = vpop.permute.xlu0 %1059 }
 0x466   :  { %v1061_v44 = vsel %vm225_vm6, %v1058_v52, %v1060_v9  ;;  %v1063_v39 = vsel %vm225_vm6, %v1060_v9, %v1056_v5 }
 0x467   :  { %v1072_v62 = vmul.f32 %v3208_v2, %v1061_v44  ;;  %v1073_v27 = vmul.f32 %v3208_v2, %v1063_v39  ;;  %1587 = vrot.lane.b32.xlu1 %v3523_v45, %s1835_s25 }
 0x468   :  { %1508 = vrot.lane.b32.xlu0 %v3523_v45, %s1832_s14 }
 0x469   :  { %v1075_v63 = vadd.f32 %v1072_v62, %v1053_v19  ;;  %v1076_v15 = vadd.f32 %v1073_v27, %v1054_v61  ;;  %v1105_v20 = vpop.permute.xlu1 %1104  ;;  %v1078_v16 = vpop.permute.xlu0 %1077 }
 0x46a   :  { %v1084_v54 = vsel %vm248_vm7, %v1078_v16, %v1080_v13 }
 0x46b   :  { %v1093_v36 = vmul.f32 %v3210_v30, %v1084_v54  ;;  %1591 = vrot.lane.b32.xlu1 %v3535_v42, %s1835_s25 }
 0x46c   :  { %1512 = vrot.lane.b32.xlu0 %v3535_v42, %s1832_s14 }
 0x46d   :  { %v1096_v2 = vadd.f32 %v1093_v36, %v1074_v25  ;;  %v1127_v26 = vpop.permute.xlu1 %1126  ;;  %v1082_v40 = vpop.permute.xlu0 %1081 }
 0x46e   :  { %v1083_v59 = vsel %vm248_vm7, %v1080_v13, %v1082_v40  ;;  %v1085_v21 = vsel %vm248_vm7, %v1082_v40, %v1078_v16 }
 0x46f   :  { %v1094_v28 = vmul.f32 %v3210_v30, %v1083_v59  ;;  %v1095_v19 = vmul.f32 %v3210_v30, %v1085_v21  ;;  %1609 = vrot.lane.b32.xlu1 %v3523_v45, %s1836_s28 }
 0x470   :  { %1530 = vrot.lane.b32.xlu0 %v3523_v45, %s1833_s17 }
 0x471   :  { %v1097_v61 = vadd.f32 %v1094_v28, %v1075_v63  ;;  %v1098_v52 = vadd.f32 %v1095_v19, %v1076_v15  ;;  %v1149_v5 = vpop.permute.xlu1 %1148  ;;  %v1103_v31 = vpop.permute.xlu0 %1102 }
 0x472   :  { %v1109_v6 = vsel %vm75_vm1, %v1103_v31, %v1105_v20 }
 0x473   :  { %v1119_v25 = vmul.f32 %v3212_v11, %v1109_v6  ;;  %1613 = vrot.lane.b32.xlu1 %v3535_v42, %s1836_s28 }
 0x474   :  { %1534 = vrot.lane.b32.xlu0 %v3535_v42, %s1833_s17 }
 0x475   :  { %v1122_v30 = vadd.f32 %v1119_v25, %v1097_v61  ;;  %v1171_v13 = vpop.permute.xlu1 %1170  ;;  %v1107_v9 = vpop.permute.xlu0 %1106 }
 0x476   :  { %v1108_v44 = vsel %vm75_vm1, %v1105_v20, %v1107_v9  ;;  %v1110_v39 = vsel %vm75_vm1, %v1107_v9, %v1103_v31 }
 0x477   :  { %v1118_v62 = vmul.f32 %v3212_v11, %v1110_v39  ;;  %v1120_v27 = vmul.f32 %v3212_v11, %v1108_v44  ;;  %1631 = vrot.lane.b32.xlu1 %v3523_v45, %s1837_s8 }
 0x478   :  { %1552 = vrot.lane.b32.xlu0 %v3523_v45, %s1834_s20 }
 0x479   :  { %v1121_v63 = vadd.f32 %v1118_v62, %v1096_v2  ;;  %v1123_v15 = vadd.f32 %v1120_v27, %v1098_v52  ;;  %v1204_v16 = vpop.permute.xlu1 %1203  ;;  %v1125_v54 = vpop.permute.xlu0 %1124 }
 0x47a   :  { %v1131_v20 = vsel %vm97_vm0, %v1125_v54, %v1127_v26 }
 0x47b   :  { %v1141_v36 = vmul.f32 %v3214_v46, %v1131_v20  ;;  %1635 = vrot.lane.b32.xlu1 %v3535_v42, %s1837_s8 }
 0x47c   :  { %1556 = vrot.lane.b32.xlu0 %v3535_v42, %s1834_s20 }
 0x47d   :  { %v1144_v11 = vadd.f32 %v1141_v36, %v1122_v30  ;;  %v1208_v40 = vpop.permute.xlu1 %1207  ;;  %v1129_v59 = vpop.permute.xlu0 %1128 }
 0x47e   :  { %v1211_v2 = vsel %vm179_vm4, %v1208_v40, %v1204_v16  ;;  %v1130_v21 = vsel %vm97_vm0, %v1127_v26, %v1129_v59  ;;  %v1132_v28 = vsel %vm97_vm0, %v1129_v59, %v1125_v54 }
 0x47f   :  { %v1140_v19 = vmul.f32 %v3214_v46, %v1132_v28  ;;  %v1142_v61 = vmul.f32 %v3214_v46, %v1130_v21  ;;  %1655 = vrot.lane.b32.xlu1 %v3485_v32, %s1838_s12 }
 0x480   :  { %1589 = vrot.lane.b32.xlu0 %v3485_v32, %s1835_s25 }
 0x481   :  { %v1143_v52 = vadd.f32 %v1140_v19, %v1121_v63  ;;  %v1145_v31 = vadd.f32 %v1142_v61, %v1123_v15  ;;  %v1226_v6 = vpop.permute.xlu1 %1225  ;;  %v1147_v25 = vpop.permute.xlu0 %1146 }
 0x482   :  { %v1153_v26 = vsel %vm4140_vm2, %v1147_v25, %v1149_v5  ;;  %vm4149_vm2 = vmmov %vm4132_vm3 }
 0x483   :  { %v1163_v30 = vmul.f32 %v3216_v24, %v1153_v26  ;;  %v1198_v26 = vmul.f32 %v3220_v55, %v3331_v33 }
 0x484   :  { %1611 = vrot.lane.b32.xlu0 %v3485_v32, %s1836_s28 }
 0x485   :  { %v1166_v9 = vadd.f32 %v1163_v30, %v1144_v11  ;;  %v1230_v46 = vpop.permute.xlu1 %1229  ;;  %v1151_v44 = vpop.permute.xlu0 %1150  ;;  %v1199_v30 = vmul.f32 %v3220_v55, %v3349_v35 }
 0x486   :  { %v1233_v39 = vsel %vm4141_vm8, %v1230_v46, %v1226_v6  ;;  %v1152_v62 = vsel %vm4142_vm11, %v1149_v5, %v1151_v44  ;;  %v1154_v27 = vsel %vm4143_vm9, %v1151_v44, %v1147_v25  ;;  %vm4150_vm8 = vmmov %vm4148_vm5 }
 0x487   :  { %v1162_v63 = vmul.f32 %v3216_v24, %v1154_v27  ;;  %v1164_v15 = vmul.f32 %v3216_v24, %v1152_v62  ;;  %v1197_v27 = vmul.f32 %v3220_v55, %v3342_v57  ;;  %vm4151_vm11 = vmmov %vm4148_vm5 }
 0x488   :  { %1633 = vrot.lane.b32.xlu0 %v3485_v32, %s1837_s8  ;;  %vm4152_vm9 = vmmov %vm4149_vm2 }
 0x489   :  { %v1165_v54 = vadd.f32 %v1162_v63, %v1143_v52  ;;  %v1167_v20 = vadd.f32 %v1164_v15, %v1145_v31  ;;  %v1248_v36 = vpop.permute.xlu1 %1247  ;;  %v1169_v11 = vpop.permute.xlu0 %1168  ;;  %v1221_v63 = vmul.f32 %v3222_v50, %v1211_v2 }
 0x48a   :  { %v1175_v59 = vsel %vm4132_vm3, %v1169_v11, %v1171_v13  ;;  %vm4153_vm3 = vmmov %vm4149_vm2 }
 0x48b   :  { %v1185_v21 = vmul.f32 %v3218_v1, %v1175_v59 }
 0x48c   :  { %1653 = vrot.lane.b32.xlu0 %v3523_v45, %s1838_s12 }
 0x48d   :  { %v1188_v5 = vadd.f32 %v1185_v21, %v1166_v9  ;;  %v1252_v28 = vpop.permute.xlu1 %1251  ;;  %v1173_v19 = vpop.permute.xlu0 %1172 }
 0x48e   :  { %v1255_v24 = vsel %vm225_vm6, %v1252_v28, %v1248_v36  ;;  %v1174_v61 = vsel %vm4144_vm10, %v1171_v13, %v1173_v19  ;;  %v1176_v52 = vsel %vm4145_vm12, %v1173_v19, %v1169_v11  ;;  %vm4154_vm10 = vmmov %vm4146_vm13 }
 0x48f   :  { %v1184_v31 = vmul.f32 %v3218_v1, %v1176_v52  ;;  %v1186_v25 = vmul.f32 %v3218_v1, %v1174_v61  ;;  %v1201_v15 = vadd.f32 %v1198_v26, %v1188_v5  ;;  %vm4155_vm12 = vmmov %vm4154_vm10 }
 0x490   :  { %1657 = vrot.lane.b32.xlu0 %v3535_v42, %s1838_s12 }
 0x491   :  { %v1187_v9 = vadd.f32 %v1184_v31, %v1165_v54  ;;  %v1189_v44 = vadd.f32 %v1186_v25, %v1167_v20  ;;  %v1270_v62 = vpop.permute.xlu1 %1269  ;;  %v1206_v13 = vpop.permute.xlu0 %1205  ;;  %v1243_v20 = vmul.f32 %v3247_v17, %v1233_v39 }
 0x492   :  { %v1209_v1 = vsel %vm179_vm4, %v1206_v13, %v1208_v40  ;;  %v1210_v11 = vsel %vm179_vm4, %v1204_v16, %v1206_v13  ;;  %v1265_v16 = vmul.f32 %v3249_v38, %v1255_v24 }
 0x493   :  { %v1202_v33 = vadd.f32 %v1199_v30, %v1189_v44  ;;  %v1200_v59 = vadd.f32 %v1197_v27, %v1187_v9  ;;  %v1219_v35 = vmul.f32 %v3222_v50, %v1210_v11  ;;  %v1220_v54 = vmul.f32 %v3222_v50, %v1209_v1 }
 0x495   :  { %v1224_v21 = vadd.f32 %v1221_v63, %v1202_v33  ;;  %v1222_v19 = vadd.f32 %v1219_v35, %v1200_v59  ;;  %v1223_v55 = vadd.f32 %v1220_v54, %v1201_v15  ;;  %v1274_v57 = vpop.permute.xlu1 %1273  ;;  %v1228_v2 = vpop.permute.xlu0 %1227 }
 0x496   :  { %v1231_v5 = vsel %vm4146_vm13, %v1228_v2, %v1230_v46  ;;  %v1232_v40 = vsel %vm4147_vm14, %v1226_v6, %v1228_v2  ;;  %vm4156_vm13 = vmmov %vm4154_vm10 }
 0x497   :  { %v1246_v61 = vadd.f32 %v1243_v20, %v1224_v21  ;;  %v1241_v52 = vmul.f32 %v3247_v17, %v1232_v40  ;;  %v1242_v50 = vmul.f32 %v3247_v17, %v1231_v5  ;;  %v1277_v17 = vsel %vm248_vm7, %v1274_v57, %v1270_v62  ;;  %vm4157_vm14 = vmmov %vm4148_vm5 }
 0x498   :  { %v1287_v11 = vmul.f32 %v3251_v34, %v1277_v17 }
 0x499   :  { %v1268_v31 = vadd.f32 %v1265_v16, %v1246_v61  ;;  %v1244_v39 = vadd.f32 %v1241_v52, %v1222_v19  ;;  %v1245_v25 = vadd.f32 %v1242_v50, %v1223_v55  ;;  %v1295_v26 = vpop.permute.xlu1 %1294  ;;  %v1250_v30 = vpop.permute.xlu0 %1249 }
 0x49a   :  { %v1253_v9 = vsel %vm225_vm6, %v1250_v30, %v1252_v28  ;;  %v1254_v46 = vsel %vm225_vm6, %v1248_v36, %v1250_v30 }
 0x49b   :  { %v1263_v6 = vmul.f32 %v3249_v38, %v1254_v46  ;;  %v1264_v24 = vmul.f32 %v3249_v38, %v1253_v9  ;;  %v1290_v20 = vadd.f32 %v1287_v11, %v1268_v31 }
 0x49d   :  { %v1266_v44 = vadd.f32 %v1263_v6, %v1244_v39  ;;  %v1267_v13 = vadd.f32 %v1264_v24, %v1245_v25  ;;  %v1299_v27 = vpop.permute.xlu1 %1298  ;;  %v1272_v63 = vpop.permute.xlu0 %1271 }
 0x49e   :  { %v1275_v15 = vsel %vm248_vm7, %v1272_v63, %v1274_v57  ;;  %v1276_v28 = vsel %vm248_vm7, %v1270_v62, %v1272_v63 }
 0x49f   :  { %v1285_v1 = vmul.f32 %v3251_v34, %v1276_v28  ;;  %v1286_v36 = vmul.f32 %v3251_v34, %v1275_v15 }
 0x4a1   :  { %v1288_v38 = vadd.f32 %v1285_v1, %v1266_v44  ;;  %v1289_v33 = vadd.f32 %v1286_v36, %v1267_v13  ;;  %v1317_v59 = vpop.permute.xlu1 %1316  ;;  %v1297_v35 = vpop.permute.xlu0 %1296  ;;  %v1302_v36 = vsel %vm75_vm1, %v1299_v27, %v1295_v26 }
 0x4a2   :  { %v1300_v54 = vsel %vm75_vm1, %v1297_v35, %v1299_v27  ;;  %v1301_v11 = vsel %vm75_vm1, %v1295_v26, %v1297_v35  ;;  %v1310_v35 = vmul.f32 %v3253_v23, %v1302_v36 }
 0x4a3   :  { %v1312_v21 = vmul.f32 %v3253_v23, %v1300_v54 }
 0x4a5   :  { %v1315_v19 = vadd.f32 %v1312_v21, %v1290_v20  ;;  %v1321_v55 = vpop.permute.xlu1 %1320  ;;  %v1319_v57 = vpop.permute.xlu0 %1318 }
 0x4a6   :  { %v1322_v15 = vsel %vm97_vm0, %v1319_v57, %v1321_v55  ;;  %v1324_v54 = vsel %vm97_vm0, %v1321_v55, %v1317_v59  ;;  %v1323_v60 = vsel %vm97_vm0, %v1317_v59, %v1319_v57  ;;  %v1311_v55 = vmul.f32 %v3253_v23, %v1301_v11 }
 0x4a7   :  { %v1334_v20 = vmul.f32 %v3255_v18, %v1322_v15  ;;  %v1332_v15 = vmul.f32 %v3255_v18, %v1324_v54  ;;  %v1313_v57 = vadd.f32 %v1310_v35, %v1288_v38 }
 0x4a8   :  { %v1314_v11 = vadd.f32 %v1311_v55, %v1289_v33 }
 0x4a9   :  { %v1339_v62 = vpop.permute.xlu1 %1338  ;;  %v1341_v2 = vpop.permute.xlu0 %1340  ;;  %v1337_v7 = vadd.f32 %v1334_v20, %v1315_v19  ;;  %v1391_v20 = vmul.f32 %v3261_v4, %v3399_v8 }
 0x4aa   :  { %v1345_v32 = vsel %vm4151_vm11, %v1339_v62, %v1341_v2  ;;  %vm4164_vm11 = vmmov %vm4154_vm10 }
 0x4ad   :  { %v1343_v5 = vpop.permute.xlu1 %1342  ;;  %v1363_v40 = vpop.permute.xlu0 %1362 }
 0x4ae   :  { %v1344_v1 = vsel %vm4148_vm5, %v1341_v2, %v1343_v5  ;;  %v1346_v27 = vsel %vm4150_vm8, %v1343_v5, %v1339_v62  ;;  %v1333_v5 = vmul.f32 %v3255_v18, %v1323_v60  ;;  %v1335_v62 = vadd.f32 %v1332_v15, %v1313_v57  ;;  %vm4160_vm8 = vmmov %vm4148_vm5 }
 0x4af   :  { %v1356_v26 = vmul.f32 %v3257_v41, %v1344_v1  ;;  %v1354_v1 = vmul.f32 %v3257_v41, %v1346_v27  ;;  %v1355_v2 = vmul.f32 %v3257_v41, %v1345_v32  ;;  %v1390_v15 = vmul.f32 %v3261_v4, %v3408_v49 }
 0x4b0   :  { %v1336_v38 = vadd.f32 %v1333_v5, %v1314_v11 }
 0x4b1   :  { %v1361_v16 = vpop.permute.xlu1 %1360  ;;  %v1396_v61 = vpop.permute.xlu0 %1395  ;;  %v1359_v23 = vadd.f32 %v1356_v26, %v1337_v7  ;;  %v1357_v54 = vadd.f32 %v1354_v1, %v1335_v62 }
 0x4b2   :  { %v1367_v19 = vsel %vm4153_vm3, %v1361_v16, %v1363_v40  ;;  %v1358_v27 = vadd.f32 %v1355_v2, %v1336_v38 }
 0x4b3   :  { %v1377_v18 = vmul.f32 %v3259_v58, %v1367_v19 }
 0x4b5   :  { %v1365_v34 = vpop.permute.xlu1 %1364  ;;  %v1400_v52 = vpop.permute.xlu0 %1399  ;;  %v1380_v8 = vadd.f32 %v1377_v18, %v1358_v27 }
 0x4b6   :  { %v1366_v12 = vsel %vm4149_vm2, %v1363_v40, %v1365_v34  ;;  %v1368_v48 = vsel %vm4152_vm9, %v1365_v34, %v1361_v16  ;;  %v1403_v40 = vsel %vm179_vm4, %v1400_v52, %v1396_v61  ;;  %v1389_v16 = vmul.f32 %v3261_v4, %v3390_v37  ;;  %vm4165_vm9 = vmmov %vm4154_vm10 }
 0x4b7   :  { %v1378_v59 = vmul.f32 %v3259_v58, %v1366_v12  ;;  %v1376_v34 = vmul.f32 %v3259_v58, %v1368_v48  ;;  %v1413_v55 = vmul.f32 %v3263_v3, %v1403_v40  ;;  %v1393_v1 = vadd.f32 %v1390_v15, %v1380_v8  ;;  %vm4166_vm3 = vmmov %vm4165_vm9 }
 0x4b9   :  { %v1398_v50 = vpop.permute.xlu1 %1397  ;;  %v3674_v39 = vpop.permute.xlu0 %1417  ;;  %v1381_v12 = vadd.f32 %v1378_v59, %v1359_v23  ;;  %v1379_v7 = vadd.f32 %v1376_v34, %v1357_v54 }
 0x4ba   :  { %v1401_v58 = vsel %vm179_vm4, %v1398_v50, %v1400_v52  ;;  %v1402_v33 = vsel %vm179_vm4, %v1396_v61, %v1398_v50 }
 0x4bb   :  { %v1394_v32 = vadd.f32 %v1391_v20, %v1381_v12  ;;  %v1392_v50 = vadd.f32 %v1389_v16, %v1379_v7  ;;  %v1411_v37 = vmul.f32 %v3263_v3, %v1402_v33  ;;  %v1412_v59 = vmul.f32 %v3263_v3, %v1401_v58 }
 0x4bd   :  { %v3676_v25 = vpop.permute.xlu1 %1419  ;;  %v3678_v30 = vpop.permute.xlu0 %1421  ;;  %v1416_v5 = vadd.f32 %v1413_v55, %v1394_v32  ;;  %v1414_v2 = vadd.f32 %v1411_v37, %v1392_v50  ;;  %v1415_v54 = vadd.f32 %v1412_v59, %v1393_v1 }
 0x4be   :  { %v1425_v41 = vsel %vm4154_vm10, %v3678_v30, %v3674_v39  ;;  %v1424_v61 = vsel %vm4155_vm12, %v3674_v39, %v3676_v25  ;;  %v1423_v4 = vsel %vm4156_vm13, %v3676_v25, %v3678_v30 }
 0x4bf   :  { %v1435_v52 = vmul.f32 %v3224_v47, %v1425_v41  ;;  %v1433_v3 = vmul.f32 %v3224_v47, %v1424_v61  ;;  %v1434_v34 = vmul.f32 %v3224_v47, %v1423_v4 }
 0x4c1   :  { %v3680_v31 = vpop.permute.xlu1 %1441  ;;  %v3682_v9 = vpop.permute.xlu0 %1439  ;;  %v1438_v62 = vadd.f32 %v1435_v52, %v1416_v5 }
 0x4c2   :  { %v1446_v49 = vsel %vm225_vm6, %v3682_v9, %v3680_v31 }
 0x4c3   :  { %v1455_v12 = vmul.f32 %v3226_v51, %v1446_v49 }
 0x4c5   :  { %v3684_v46 = vpop.permute.xlu1 %1463  ;;  %v3686_v6 = vpop.permute.xlu0 %1443 }
 0x4c6   :  { %v1447_v26 = vsel %vm225_vm6, %v3686_v6, %v3682_v9  ;;  %v1445_v25 = vsel %vm225_vm6, %v3680_v31, %v3686_v6 }
 0x4c7   :  { %v1457_v39 = vmul.f32 %v3226_v51, %v1447_v26  ;;  %v1456_v20 = vmul.f32 %v3226_v51, %v1445_v25  ;;  %v1437_v51 = vadd.f32 %v1434_v34, %v1415_v54  ;;  %v4162_v54 = vld [vmem:[#allocation4_spill] sm:$0xff] }
 0x4c9   :  { %v3688_v24 = vpop.permute.xlu1 %1488  ;;  %v3690_v44 = vpop.permute.xlu0 %1461  ;;  %v1460_v18 = vadd.f32 %v1457_v39, %v1438_v62  ;;  %v1459_v55 = vadd.f32 %v1456_v20, %v1437_v51  ;;  %v4168_v51 = vld [vmem:[#allocation11_spill] sm:$0xff] }
 0x4ca   :  { %v1468_v30 = vsel %vm248_vm7, %v3690_v44, %v3684_v46 }
 0x4cb   :  { %v1477_v47 = vmul.f32 %v3228_v22, %v1468_v30 }
 0x4cd   :  { %v3692_v13 = vpop.permute.xlu1 %1510 }
 0x4ce   :  { %v3694_v63 = vpop.permute.xlu0 %1465 }
 0x4cf   :  { %v1469_v57 = vsel %vm248_vm7, %v3694_v63, %v3690_v44  ;;  %v1436_v44 = vadd.f32 %v1433_v3, %v1414_v2  ;;  %v1467_v40 = vsel %vm248_vm7, %v3684_v46, %v3694_v63 }
 0x4d0   :  { %v1479_v9 = vmul.f32 %v3228_v22, %v1469_v57  ;;  %v1478_v15 = vmul.f32 %v3228_v22, %v1467_v40 }
 0x4d1   :  { %v3696_v17 = vpop.permute.xlu1 %1532  ;;  %v1458_v58 = vadd.f32 %v1455_v12, %v1436_v44 }
 0x4d2   :  { %v3700_v28 = vpop.permute.xlu0 %1486  ;;  %v1482_v41 = vadd.f32 %v1479_v9, %v1460_v18  ;;  %v4163_v18 = vld [vmem:[#allocation18_spill] sm:$0xff] }
 0x4d3   :  { %v1493_v16 = vsel %vm75_vm1, %v3700_v28, %v3688_v24 }
 0x4d4   :  { %v1503_v59 = vmul.f32 %v3230_v43, %v1493_v16 }
 0x4d5   :  { %v3711_v21 = vpop.permute.xlu1 %1554 }
 0x4d6   :  { %v3715_v29 = vpop.permute.xlu0 %1490 }
 0x4d7   :  { %v1492_v23 = vsel %vm75_vm1, %v3688_v24, %v3715_v29  ;;  %v1494_v31 = vsel %vm75_vm1, %v3715_v29, %v3700_v28  ;;  %vm4158_vm1 = vmmov %vm4149_vm2 }
 0x4d8   :  { %v1504_v6 = vmul.f32 %v3230_v43, %v1492_v23  ;;  %v1502_v33 = vmul.f32 %v3230_v43, %v1494_v31  ;;  %vm4159_vm2 = vmmov %vm4158_vm1 }
 0x4d9   :  { %v3732_v45 = vpop.permute.xlu1 %1587 }
 0x4da   :  { %v3734_v36 = vpop.permute.xlu0 %1508  ;;  %v1507_v26 = vadd.f32 %v1504_v6, %v1482_v41  ;;  %v4167_v41 = vld [vmem:[#allocation20_spill] sm:$0xff] }
 0x4db   :  { %v1515_v50 = vsel %vm97_vm0, %v3734_v36, %v3692_v13 }
 0x4dc   :  { %v1525_v49 = vmul.f32 %v3383_v53, %v1515_v50 }
 0x4dd   :  { %v3749_v48 = vpop.permute.xlu1 %1591 }
 0x4de   :  { %v1513_v60 = vpop.permute.xlu0 %1512 }
 0x4df   :  { %v1514_v38 = vsel %vm97_vm0, %v3692_v13, %v1513_v60  ;;  %v1516_v29 = vsel %vm97_vm0, %v1513_v60, %v3734_v36  ;;  %v1480_v60 = vadd.f32 %v1477_v47, %v1458_v58  ;;  %v1481_v36 = vadd.f32 %v1478_v15, %v1459_v55  ;;  %vm4161_vm0 = vmmov %vm4158_vm1  ;;  %v4169_v55 = vld [vmem:[#allocation3_spill] sm:$0xff] }
 0x4e0   :  { %v1526_v32 = vmul.f32 %v3383_v53, %v1514_v38  ;;  %v1524_v61 = vmul.f32 %v3383_v53, %v1516_v29  ;;  %v1595_v53 = vsel %vm179_vm4, %v3749_v48, %v3732_v45  ;;  %v1582_v29 = vmul.f32 %v3414_v10, %v4167_v41 }
 0x4e1   :  { %v3789_v19 = vpop.permute.xlu1 %1609  ;;  %v1505_v57 = vadd.f32 %v1502_v33, %v1480_v60  ;;  %v1506_v62 = vadd.f32 %v1503_v59, %v1481_v36  ;;  %v1605_v31 = vmul.f32 %v4163_v18, %v1595_v53 }
 0x4e2   :  { %v1531_v35 = vpop.permute.xlu0 %1530  ;;  %v1529_v37 = vadd.f32 %v1526_v32, %v1507_v26 }
 0x4e3   :  { %v1537_v4 = vsel %vm4160_vm8, %v1531_v35, %v3696_v17  ;;  %v1527_v39 = vadd.f32 %v1524_v61, %v1505_v57 }
 0x4e4   :  { %v1547_v25 = vmul.f32 %v3392_v0, %v1537_v4 }
 0x4e5   :  { %v1614_v8 = vpop.permute.xlu1 %1613 }
 0x4e6   :  { %v1535_v11 = vpop.permute.xlu0 %1534  ;;  %v1617_v44 = vsel %vm4165_vm9, %v1614_v8, %v3789_v19 }
 0x4e7   :  { %v1536_v27 = vsel %vm4157_vm14, %v3696_v17, %v1535_v11  ;;  %v1538_v46 = vsel %vm4148_vm5, %v1535_v11, %v1531_v35  ;;  %v1583_v17 = vmul.f32 %v3414_v10, %v3535_v42  ;;  %v1528_v35 = vadd.f32 %v1525_v49, %v1506_v62 }
 0x4e8   :  { %v1548_v63 = vmul.f32 %v3392_v0, %v1536_v27  ;;  %v1546_v22 = vmul.f32 %v3392_v0, %v1538_v46  ;;  %v1581_v42 = vmul.f32 %v3414_v10, %v4162_v54 }
 0x4e9   :  { %v1632_v1 = vpop.permute.xlu1 %1631  ;;  %v1550_v0 = vadd.f32 %v1547_v25, %v1528_v35  ;;  %v4172_v25 = vld [vmem:[#allocation14_spill] sm:$0xff] }
 0x4ea   :  { %v1553_v7 = vpop.permute.xlu0 %1552  ;;  %v1551_v13 = vadd.f32 %v1548_v63, %v1529_v37  ;;  %v1549_v30 = vadd.f32 %v1546_v22, %v1527_v39 }
 0x4eb   :  { %v1559_v43 = vsel %vm4161_vm0, %v1553_v7, %v3711_v21 }
 0x4ec   :  { %v1569_v9 = vmul.f32 %v3405_v14, %v1559_v43 }
 0x4ed   :  { %v1636_v38 = vpop.permute.xlu1 %1635 }
 0x4ee   :  { %v1557_v52 = vpop.permute.xlu0 %1556  ;;  %v1639_v33 = vsel %vm225_vm6, %v1636_v38, %v1632_v1 }
 0x4ef   :  { %v1558_v24 = vsel %vm4158_vm1, %v3711_v21, %v1557_v52  ;;  %v1560_v28 = vsel %vm4159_vm2, %v1557_v52, %v1553_v7  ;;  %v1649_v59 = vmul.f32 %v4169_v55, %v1639_v33  ;;  %v1675_v33 = vld [vmem:[%s3943_s5] sm:$0xff] }
 0x4f0   :  { %v1570_v5 = vmul.f32 %v3405_v14, %v1558_v24  ;;  %v1568_v3 = vmul.f32 %v3405_v14, %v1560_v28  ;;  %v4170_v24 = vld [vmem:[#allocation19_spill] sm:$0xff] }
 0x4f1   :  { %v1656_v26 = vpop.permute.xlu1 %1655 }
 0x4f2   :  { %v1590_v23 = vpop.permute.xlu0 %1589  ;;  %v1573_v11 = vadd.f32 %v1570_v5, %v1551_v13  ;;  %v1571_v2 = vadd.f32 %v1568_v3, %v1549_v30 }
 0x4f3   :  { %v1594_v21 = vsel %vm179_vm4, %v3732_v45, %v1590_v23  ;;  %v1593_v6 = vsel %vm179_vm4, %v1590_v23, %v3749_v48  ;;  %v1572_v45 = vadd.f32 %v1569_v9, %v1550_v0 }
 0x4f4   :  { %v1586_v12 = vadd.f32 %v1583_v17, %v1573_v11  ;;  %v1584_v20 = vadd.f32 %v1581_v42, %v1571_v2  ;;  %v1603_v47 = vmul.f32 %v4163_v18, %v1594_v21  ;;  %v1604_v32 = vmul.f32 %v4163_v18, %v1593_v6  ;;  %v4171_v11 = vld [vmem:[#allocation15_spill] sm:$0xff]  ;;  %v4173_v17 = vld [vmem:[#allocation16_spill] sm:$0xff] }
 0x4f6   :  { %v1612_v34 = vpop.permute.xlu0 %1611  ;;  %v1608_v7 = vadd.f32 %v1605_v31, %v1586_v12  ;;  %v1606_v46 = vadd.f32 %v1603_v47, %v1584_v20 }
 0x4f7   :  { %v1616_v14 = vsel %vm4164_vm11, %v3789_v19, %v1612_v34  ;;  %v1615_v40 = vsel %vm4166_vm3, %v1612_v34, %v1614_v8  ;;  %v1627_v19 = vmul.f32 %v4168_v51, %v1617_v44  ;;  %v1585_v8 = vadd.f32 %v1582_v29, %v1572_v45 }
 0x4f8   :  { %v1625_v58 = vmul.f32 %v4168_v51, %v1616_v14  ;;  %v1626_v63 = vmul.f32 %v4168_v51, %v1615_v40  ;;  %v1676_v40 = vld [vmem:[%s3942_s6] sm:$0xff] }
 0x4f9   :  { %v1630_v61 = vadd.f32 %v1627_v19, %v1608_v7  ;;  %v1607_v52 = vadd.f32 %v1604_v32, %v1585_v8 }
 0x4fa   :  { %v1634_v27 = vpop.permute.xlu0 %1633  ;;  %v1628_v50 = vadd.f32 %v1625_v58, %v1606_v46 }
 0x4fb   :  { %v1638_v48 = vsel %vm225_vm6, %v1632_v1, %v1634_v27  ;;  %v1637_v16 = vsel %vm225_vm6, %v1634_v27, %v1636_v38  ;;  %v1629_v57 = vadd.f32 %v1626_v63, %v1607_v52  ;;  %v1652_v4 = vadd.f32 %v1649_v59, %v1630_v61  ;;  %v1827_v52 = vld [vmem:[%s3938_s0] sm:$0xff] }
 0x4fc   :  { %v1647_v60 = vmul.f32 %v4169_v55, %v1638_v48  ;;  %v1648_v37 = vmul.f32 %v4169_v55, %v1637_v16 }
 0x4fe   :  { %v1654_v10 = vpop.permute.xlu0 %1653  ;;  %v1650_v22 = vadd.f32 %v1647_v60, %v1628_v50  ;;  %v1651_v49 = vadd.f32 %v1648_v37, %v1629_v57  ;;  %v1828_v37 = vld [vmem:[%s3938_s0 + $0x8] sm:$0xff] }
 0x4ff   :  { %v1660_v15 = vsel %vm248_vm7, %v1654_v10, %v1656_v26 }
 0x500   :  { %v1669_v28 = vmul.f32 %v4170_v24, %v1660_v15 }
 0x502   :  { %v1658_v5 = vpop.permute.xlu0 %1657  ;;  %v1672_v39 = vadd.f32 %v1669_v28, %v1650_v22  ;;  %v1829_v28 = vld [vmem:[%s3938_s0 + $0x10] sm:$0xff] }
 0x503   :  { %v1659_v13 = vsel %vm248_vm7, %v1656_v26, %v1658_v5  ;;  %v1661_v36 = vsel %vm248_vm7, %v1658_v5, %v1654_v10 }
 0x504   :  { %v1670_v1 = vmul.f32 %v4170_v24, %v1659_v13  ;;  %v1671_v3 = vmul.f32 %v4170_v24, %v1661_v36  ;;  %v1677_v62 = vmul.f32 %v1672_v39, %v4171_v11 }
 0x506   :  { %v1673_v23 = vadd.f32 %v1670_v1, %v1651_v49  ;;  %v1674_v43 = vadd.f32 %v1671_v3, %v1652_v4 }
 0x508   :  { %v1678_v30 = vmul.f32 %v1673_v23, %v4172_v25  ;;  %v1679_v35 = vmul.f32 %v1674_v43, %v4173_v17 }
 0x50a   :  { %v1680_v53 = vadd.f32 %v1678_v30, %v1677_v62 }
 0x50c   :  { %v1681_v9 = vadd.f32 %v1680_v53, %v1679_v35 }
 0x50e   :  { %1682 = vadd.xlane.f32.xlu1 %v1681_v9 }
 0x597   :  { %v1683_v2 = vpop.xlane.xlu1 %1682 }
 0x598   :  { %v1684_v56 = vrot.slane %v1683_v2, 1  ;;  %v1685_v34 = vrot.slane %v1683_v2, 7 }
 0x59a   :  { %v1686_v21 = vsel %vm859_vm15, %v1684_v56, %v1685_v34 }
 0x59b   :  { %v1687_v0 = vadd.f32 %v1686_v21, %v1683_v2 }
 0x59d   :  { %v1688_v38 = vmul.f32 0.001953125, %v1687_v0 }
 0x59f   :  { %1691 = vperm.xlu0 %1821, %v1688_v38  }
 0x61a   :  { %v1692_v54 = vpop.permute.xlu0 %1691 }
 0x61b   :  { %v1694_v42 = vsub.f32 %v1672_v39, %v1692_v54  ;;  %v1695_v18 = vsub.f32 %v1673_v23, %v1692_v54  ;;  %v1696_v31 = vsub.f32 %v1674_v43, %v1692_v54 }
 0x61d   :  { %v1697_v6 = vmul.f32 %v1694_v42, %v4171_v11  ;;  %v1698_v14 = vmul.f32 %v1695_v18, %v4172_v25  ;;  %v1699_v44 = vmul.f32 %v1696_v31, %v4173_v17 }
 0x61f   :  { %v1700_v45 = vmul.f32 %v1697_v6, %v1697_v6  ;;  %v1701_v20 = vmul.f32 %v1698_v14, %v1698_v14  ;;  %v1702_v47 = vmul.f32 %v1699_v44, %v1699_v44 }
 0x621   :  { %v1703_v27 = vadd.f32 %v1701_v20, %v1700_v45 }
 0x623   :  { %v1704_v7 = vadd.f32 %v1703_v27, %v1702_v47 }
 0x625   :  { %1705 = vadd.xlane.f32.xlu0 %v1704_v7 }
 0x63b   :  { %1725 = vperm.xlu0 %1821, %v1676_v40  }
 0x6ae   :  { %v1706_v48 = vpop.xlane.xlu0 %1705 }
 0x6af   :  { %v1707_v41 = vrot.slane %v1706_v48, 1  ;;  %v1708_v29 = vrot.slane %v1706_v48, 7 }
 0x6b1   :  { %v1709_v32 = vsel %vm859_vm15, %v1707_v41, %v1708_v29 }
 0x6b2   :  { %v1710_v51 = vadd.f32 %v1709_v32, %v1706_v48 }
 0x6b4   :  { %v1711_v58 = vmul.f32 0.001953125, %v1710_v51 }
 0x6b6   :  { %v1712_v19 = vadd.f32 1e-05, %v1711_v58  ;;  %v1726_v60 = vpop.permute.xlu0 %1725 }
 0x6b8   :  { %1825 = vrsqrt.f32 %v1712_v19 }
 0x6c5   :  { %v1826_v16 = vpop.eup %1825 }
 0x6c6   :  { %v1714_v26 = vmul.f32 %v1826_v16, %v1675_v33 }
 0x6c8   :  { %1717 = vperm.xlu1 %1822, %v1714_v26  }
 0x743   :  { %v1718_v8 = vpop.permute.xlu1 %1717 }
 0x744   :  { %v1720_v46 = vmul.f32 %v1718_v8, %v1694_v42  ;;  %v1721_v63 = vmul.f32 %v1718_v8, %v1695_v18  ;;  %v1722_v55 = vmul.f32 %v1718_v8, %v1696_v31 }
 0x746   :  { %v1728_v10 = vadd.f32 %v1726_v60, %v1720_v46  ;;  %v1729_v15 = vadd.f32 %v1726_v60, %v1721_v63  ;;  %v1730_v61 = vadd.f32 %v1726_v60, %v1722_v55 }
 0x748   :  { %v1731_v50 = vadd.f32 %v1827_v52, %v1728_v10  ;;  %v1732_v24 = vadd.f32 %v1828_v37, %v1729_v15  ;;  %v1733_v59 = vadd.f32 %v1829_v28, %v1730_v61 }
 0x74a   :  { %1734 = vst [vmem:[%s3944_s7] sm:$0xff] %v1731_v50  ;;  %1735 = vst [vmem:[%s3944_s7 + $0x8] sm:$0xff] %v1732_v24 }
 0x74b   :  { %1736 = vst [vmem:[%s3944_s7 + $0x10] sm:$0xff] %v1733_v59 }

</bundles_post_ra>
